<compile_context>
chip_gen: v5e
topology: v5e:2x2
jax: 0.10.0
libtpu: 0.0.40
codegen_flags: <defaults>
</compile_context>

<pallas_src>
import jax
import jax.numpy as jnp
from jax.experimental import pallas as pl
from jax.experimental.pallas import tpu as pltpu

EPS = 1e-5  # nn.InstanceNorm2d default eps


def _resblock_kernel(x_ref, w1_ref, b1_ref, w2_ref, b2_ref, o_ref, tap_sc):
    """One batch image per grid step.

    x_ref : (H, W, C)      f32  NHWC activation block (batch dim squeezed)
    w*_ref: (3, 3*C, C)    bf16 conv weights, kx taps fused along rows [kx=0; kx=1; kx=2]
    b*_ref: (1, C)         f32  conv biases
    o_ref : (H, W, C)      f32  output block
    tap_sc: (H+2, W, 3*C)  bf16 row-reflection-padded [left|center|right] scratch
                                (reused by both convs)
    """
    H, W, C = x_ref.shape
    inv_hw = 1.0 / float(H * W)

    # Column-boundary masks for the W (sublane) reflection, kept at (1, W, 1) so they
    # broadcast in jnp.where instead of materializing full-image int32 compares.
    w_idx = jax.lax.broadcasted_iota(jnp.int32, (1, W, 1), 1)
    first_col = w_idx == 0
    last_col = w_idx == (W - 1)

    def conv3x3(y, w_ref_, b_ref_):
        """3x3 conv with ReflectionPad2d(1) semantics. y: (H, W, C) f32 value."""
        # Column shifts on the XLU: only 2 rolls per conv, shared by all three dy taps.
        # Rolls stay f32 (safe sublane-rotate path); bf16 cast happens at the stores below.
        r_m1 = pltpu.roll(y, shift=1, axis=1)       # y[(w-1) % W]
        r_p1 = pltpu.roll(y, shift=W - 1, axis=1)   # y[(w+1) % W]
        left = jnp.where(first_col, r_p1, r_m1)     # column reflect(w-1)
        right = jnp.where(last_col, r_m1, r_p1)     # column reflect(w+1)

        # im2col-lite in bf16: rows 1..H hold [left | center | right] per padded row.
        # Full-(W, C)-slab stores only; no masked single-column writes.
        tap_sc[1:H + 1, :, 0:C] = left.astype(jnp.bfloat16)
        tap_sc[1:H + 1, :, C:2 * C] = y.astype(jnp.bfloat16)
        tap_sc[1:H + 1, :, 2 * C:3 * C] = right.astype(jnp.bfloat16)
        # Row reflection: padded row -1 -> image row 1 (= padded row 2),
        #                 padded row  H -> image row H-2 (= padded row H-1).
        tap_sc[0:1] = tap_sc[2:3]
        tap_sc[H + 1:H + 2] = tap_sc[H - 1:H]

        # 3 fused matmuls per conv (K = 3C) instead of 9 (K = C): fewer MXU result pops
        # and fewer full-size f32 accumulate adds; acc initialized from the first dot.
        acc = None
        for dy in range(3):
            mat = tap_sc[dy:dy + H].reshape(H * W, 3 * C)   # aligned row slab, bf16
            d = jnp.dot(mat, w_ref_[dy], preferred_element_type=jnp.float32)
            acc = d if acc is None else acc + d
        return acc.reshape(H, W, C) + b_ref_[...].reshape(1, 1, C)

    def inst_norm(y):
        # Two-pass InstanceNorm2d(affine=False): mean first, then centered sum of squares.
        # Avoids the E[x^2] - mean^2 cancellation (conv bias can dominate the mean).
        mean = jnp.sum(y, axis=(0, 1), keepdims=True) * inv_hw
        yc = y - mean
        var = jnp.sum(yc * yc, axis=(0, 1), keepdims=True) * inv_hw
        return yc * jax.lax.rsqrt(var + EPS)   # rsqrt -> EUP slot

    h = conv3x3(x_ref[...], w1_ref, b1_ref)
    h = jnp.maximum(inst_norm(h), 0.0)
    h = conv3x3(h, w2_ref, b2_ref)
    h = inst_norm(h)
    # Residual: re-read x from the pipelined input buffer instead of keeping an f32 copy
    # live across both convs (shorter live range -> lower peak VMEM / spill pressure).
    o_ref[...] = (x_ref[...] + h).astype(o_ref.dtype)


def _derive_vmem_limit_bytes():
    """~75% of the chip's per-core VMEM, leaving headroom for Mosaic internal scratch."""
    cap = 0
    try:
        cap = int(getattr(pltpu.get_tpu_info(), "vmem_capacity_bytes", 0) or 0)
    except Exception:
        cap = 0
    if cap <= 0:
        cap = 64 * 1024 * 1024   # conservative fallback (v7x per-TensorCore VMEM)
    return (cap * 3) // 4


def resblock_nhwc(x, w1, b1, w2, b2):
    """Fused Resblock on NHWC activations (preferred entry point: no layout transposes)."""
    B, H, W, C = x.shape
    assert H >= 2 and W >= 2, "reflection pad of 1 needs H, W >= 2"

    # Pre-cast weights to bf16 once (MXU operands; f32 accumulation in-kernel) and fuse
    # the kx taps along the input-channel axis: (3, 3, Cin, Cout) HWIO -> (3, 3*Cin, Cout)
    # with rows ordered [kx=0; kx=1; kx=2], matching the [left|center|right] tap scratch.
    w1f = jnp.asarray(w1, jnp.float32).astype(jnp.bfloat16).reshape(3, 3 * C, C)
    w2f = jnp.asarray(w2, jnp.float32).astype(jnp.bfloat16).reshape(3, 3 * C, C)
    b1f = jnp.asarray(b1, jnp.float32).reshape(1, C)
    b2f = jnp.asarray(b2, jnp.float32).reshape(1, C)

    # Advisory cost estimate so XLA schedules the surrounding ops sensibly.
    flops = 4 * 9 * B * H * W * C * C                     # 2 convs, 2 flops/MAC
    bytes_accessed = (2 * x.size * 4                      # activations in + out
                      + (w1f.size + w2f.size) * 2         # bf16 weights
                      + (b1f.size + b2f.size) * 4)
    cost = pl.CostEstimate(flops=int(flops),
                           transcendentals=int(2 * B * C),   # rsqrt per (image, channel, norm)
                           bytes_accessed=int(bytes_accessed))

    weight_spec = pl.BlockSpec((3, 3 * C, C), lambda b: (0, 0, 0))   # resident across grid
    bias_spec = pl.BlockSpec((1, C), lambda b: (0, 0))

    # TODO(synk): for images whose f32 in/out blocks no longer fit VMEM (e.g. 128x128x256),
    #             add an H-tile grid axis with 1-row halos and make InstanceNorm two-pass
    #             across that axis; this also exposes parallel grid work when B == 1.
    # TODO(synk): on v7x, mark the batch axis pltpu.CORE_PARALLEL (2 TensorCores/chip) and
    #             verify both cores receive grid steps; plain "parallel" is kept here since
    #             it is safe on every generation.
    # TODO(synk): optional fp8 weights on v7x only, gated on an accuracy check.
    return pl.pallas_call(
        _resblock_kernel,
        out_shape=jax.ShapeDtypeStruct((B, H, W, C), x.dtype),
        grid=(B,),
        in_specs=[
            pl.BlockSpec((None, H, W, C), lambda b: (b, 0, 0, 0)),
            weight_spec, bias_spec, weight_spec, bias_spec,
        ],
        out_specs=pl.BlockSpec((None, H, W, C), lambda b: (b, 0, 0, 0)),
        scratch_shapes=[pltpu.VMEM((H + 2, W, 3 * C), jnp.bfloat16)],
        compiler_params=pltpu.CompilerParams(
            dimension_semantics=("parallel",),           # megacore-shard the batch
            vmem_limit_bytes=_derive_vmem_limit_bytes()),
        cost_estimate=cost,
    )(x, w1f, b1f, w2f, b2f)


def resblock_forward(x_nchw, params):
    """Pallas Resblock forward. x_nchw: (B, C, H, W) f32 -> (B, C, H, W) f32.

    Prefer resblock_nhwc directly if the surrounding network can stay NHWC -- these two
    transposes are full-tensor HBM round trips and pure overhead on every TPU generation.
    """
    w1, b1, w2, b2 = params
    x = jnp.transpose(x_nchw, (0, 2, 3, 1))
    out = resblock_nhwc(x, w1, b1, w2, b2)
    return jnp.transpose(out, (0, 3, 1, 2))


def resblock_reference(x_nchw, params, *, emulate_bf16=False):
    """Pure-JAX reference (PyTorch forward with InstanceNorm2d, affine=False).

    With emulate_bf16=True the conv operands are rounded to bf16 (f32 accumulation),
    matching the kernel's MXU arithmetic up to summation order.
    """
    w1, b1, w2, b2 = params
    x = jnp.transpose(x_nchw, (0, 2, 3, 1)).astype(jnp.float32)

    def conv(y, w, b):
        yp = jnp.pad(y, ((0, 0), (1, 1), (1, 1), (0, 0)), mode="reflect")
        if emulate_bf16:
            yp = yp.astype(jnp.bfloat16).astype(jnp.float32)
            w = w.astype(jnp.bfloat16).astype(jnp.float32)
        out = jax.lax.conv_general_dilated(
            yp, w, window_strides=(1, 1), padding="VALID",
            dimension_numbers=("NHWC", "HWIO", "NHWC"),
            precision=jax.lax.Precision.HIGHEST)
        return out + b.reshape(1, 1, 1, -1)

    def inorm(y):
        m = jnp.mean(y, axis=(1, 2), keepdims=True)
        v = jnp.mean((y - m) ** 2, axis=(1, 2), keepdims=True)
        return (y - m) * jax.lax.rsqrt(v + EPS)

    h = jnp.maximum(inorm(conv(x, w1, b1)), 0.0)
    h = inorm(conv(h, w2, b2))
    return jnp.transpose(x + h, (0, 3, 1, 2))


def make_params(key, c):
    k1, k2, k3, k4 = jax.random.split(key, 4)
    # Conv2d(C, C, 3) weights in HWIO layout (3, 3, Cin, Cout); deterministic init.
    w1 = 0.1 * jax.random.normal(k1, (3, 3, c, c), jnp.float32)
    b1 = 0.1 * jax.random.normal(k2, (1, c), jnp.float32)
    w2 = 0.1 * jax.random.normal(k3, (3, 3, c, c), jnp.float32)
    b2 = 0.1 * jax.random.normal(k4, (1, c), jnp.float32)
    return (w1, b1, w2, b2)


if __name__ == "__main__":
    key = jax.random.PRNGKey(0)
    kx, kp = jax.random.split(key)
    B, C, H, W = 2, 4, 16, 16
    x = jax.random.normal(kx, (B, C, H, W), jnp.float32)   # NCHW, like PyTorch
    params = make_params(kp, C)

    out = jax.block_until_ready(resblock_forward(x, params))
    assert out.shape == (B, C, H, W) and out.dtype == jnp.float32

    # Tight check vs a reference using the same bf16-operand / f32-accumulate conv math.
    ref_bf16 = resblock_reference(x, params, emulate_bf16=True)
    assert jnp.allclose(out, ref_bf16, atol=2e-3, rtol=2e-3), "mismatch vs bf16-operand reference"

    # Loose check vs exact f32 PyTorch semantics (error bounded by bf16 MXU operand rounding).
    ref_f32 = resblock_reference(x, params, emulate_bf16=False)
    assert jnp.allclose(out, ref_f32, atol=5e-2, rtol=5e-2), "mismatch vs f32 reference"

    print("KERNEL_OK")
</pallas_src>

<mosaic_0001>
module attributes {stable_mosaic.version = 11 : i64} {
  func.func @_resblock_kernel(%arg0: i32, %arg1: memref<1x16x16x4xf32, #tpu.memory_space<vmem>>, %arg2: memref<3x12x4xbf16, #tpu.memory_space<vmem>>, %arg3: memref<1x4xf32, #tpu.memory_space<vmem>>, %arg4: memref<3x12x4xbf16, #tpu.memory_space<vmem>>, %arg5: memref<1x4xf32, #tpu.memory_space<vmem>>, %arg6: memref<1x16x16x4xf32, #tpu.memory_space<vmem>>, %arg7: memref<18x16x12xbf16, #tpu.memory_space<vmem>>) attributes {dimension_semantics = [#tpu.dimension_semantics<parallel>], iteration_bounds = array<i64: 2>, scalar_prefetch = 0 : i64, scratch_operands = 1 : i64, tpu.core_type = #tpu.core_type<tc>, window_params = [{transform_indices = @transform_0, window_bounds = array<i64: 1, 16, 16, 4>}, {pipeline_mode = #tpu.pipeline_mode<synchronous>, transform_indices = @transform_1, window_bounds = array<i64: 3, 12, 4>}, {pipeline_mode = #tpu.pipeline_mode<synchronous>, transform_indices = @transform_2, window_bounds = array<i64: 1, 4>}, {pipeline_mode = #tpu.pipeline_mode<synchronous>, transform_indices = @transform_3, window_bounds = array<i64: 3, 12, 4>}, {pipeline_mode = #tpu.pipeline_mode<synchronous>, transform_indices = @transform_4, window_bounds = array<i64: 1, 4>}, {transform_indices = @transform_5, window_bounds = array<i64: 1, 16, 16, 4>}]} {
    %0 = tpu.iota {dimensions = array<i32: 1>} : vector<1x16x1xi32>
    %c0_i32 = arith.constant 0 : i32
    %1 = vector.broadcast %c0_i32 : i32 to vector<1x16x1xi32>
    %2 = arith.cmpi eq, %0, %1 : vector<1x16x1xi32>
    %c15_i32 = arith.constant 15 : i32
    %3 = vector.broadcast %c15_i32 : i32 to vector<1x16x1xi32>
    %4 = arith.cmpi eq, %0, %3 : vector<1x16x1xi32>
    %c0 = arith.constant 0 : index
    %c0_0 = arith.constant 0 : index
    %c0_1 = arith.constant 0 : index
    %c0_2 = arith.constant 0 : index
    %5 = vector.load %arg1[%c0, %c0_0, %c0_1, %c0_2] : memref<1x16x16x4xf32, #tpu.memory_space<vmem>>, vector<1x16x16x4xf32>
    %6 = vector.shape_cast %5 : vector<1x16x16x4xf32> to vector<16x16x4xf32>
    %c1_i32 = arith.constant 1 : i32
    %7 = tpu.dynamic_rotate %6 by %c1_i32 dim 1 : vector<16x16x4xf32>, i32 -> vector<16x16x4xf32>
    %c15_i32_3 = arith.constant 15 : i32
    %8 = tpu.dynamic_rotate %6 by %c15_i32_3 dim 1 : vector<16x16x4xf32>, i32 -> vector<16x16x4xf32>
    %9 = vector.shape_cast %2 : vector<1x16x1xi1> to vector<1x16x1xi1>
    %10 = vector.broadcast %9 : vector<1x16x1xi1> to vector<16x16x4xi1>
    %11 = arith.select %10, %8, %7 : vector<16x16x4xi1>, vector<16x16x4xf32>
    %12 = vector.shape_cast %4 : vector<1x16x1xi1> to vector<1x16x1xi1>
    %13 = vector.broadcast %12 : vector<1x16x1xi1> to vector<16x16x4xi1>
    %14 = arith.select %13, %7, %8 : vector<16x16x4xi1>, vector<16x16x4xf32>
    %15 = arith.truncf %11 : vector<16x16x4xf32> to vector<16x16x4xbf16>
    %c1 = arith.constant 1 : index
    %c0_4 = arith.constant 0 : index
    %c0_5 = arith.constant 0 : index
    %16 = vector.load %arg7[%c1, %c0_4, %c0_5] : memref<18x16x12xbf16, #tpu.memory_space<vmem>>, vector<16x16x4xbf16>
    tpu.vector_store %arg7[%c1, %c0_4, %c0_5], %15 {strides = array<i32>} : memref<18x16x12xbf16, #tpu.memory_space<vmem>>, vector<16x16x4xbf16>,
    %17 = arith.truncf %6 : vector<16x16x4xf32> to vector<16x16x4xbf16>
    %c1_6 = arith.constant 1 : index
    %c0_7 = arith.constant 0 : index
    %c4 = arith.constant 4 : index
    %18 = vector.load %arg7[%c1_6, %c0_7, %c4] : memref<18x16x12xbf16, #tpu.memory_space<vmem>>, vector<16x16x4xbf16>
    tpu.vector_store %arg7[%c1_6, %c0_7, %c4], %17 {strides = array<i32>} : memref<18x16x12xbf16, #tpu.memory_space<vmem>>, vector<16x16x4xbf16>,
    %19 = arith.truncf %14 : vector<16x16x4xf32> to vector<16x16x4xbf16>
    %c1_8 = arith.constant 1 : index
    %c0_9 = arith.constant 0 : index
    %c8 = arith.constant 8 : index
    %20 = vector.load %arg7[%c1_8, %c0_9, %c8] : memref<18x16x12xbf16, #tpu.memory_space<vmem>>, vector<16x16x4xbf16>
    tpu.vector_store %arg7[%c1_8, %c0_9, %c8], %19 {strides = array<i32>} : memref<18x16x12xbf16, #tpu.memory_space<vmem>>, vector<16x16x4xbf16>,
    %c2 = arith.constant 2 : index
    %c0_10 = arith.constant 0 : index
    %c0_11 = arith.constant 0 : index
    %21 = vector.load %arg7[%c2, %c0_10, %c0_11] : memref<18x16x12xbf16, #tpu.memory_space<vmem>>, vector<1x16x12xbf16>
    %c0_12 = arith.constant 0 : index
    %c0_13 = arith.constant 0 : index
    %c0_14 = arith.constant 0 : index
    %22 = vector.load %arg7[%c0_12, %c0_13, %c0_14] : memref<18x16x12xbf16, #tpu.memory_space<vmem>>, vector<1x16x12xbf16>
    tpu.vector_store %arg7[%c0_12, %c0_13, %c0_14], %21 {strides = array<i32>} : memref<18x16x12xbf16, #tpu.memory_space<vmem>>, vector<1x16x12xbf16>,
    %c15 = arith.constant 15 : index
    %c0_15 = arith.constant 0 : index
    %c0_16 = arith.constant 0 : index
    %23 = vector.load %arg7[%c15, %c0_15, %c0_16] : memref<18x16x12xbf16, #tpu.memory_space<vmem>>, vector<1x16x12xbf16>
    %c17 = arith.constant 17 : index
    %c0_17 = arith.constant 0 : index
    %c0_18 = arith.constant 0 : index
    %24 = vector.load %arg7[%c17, %c0_17, %c0_18] : memref<18x16x12xbf16, #tpu.memory_space<vmem>>, vector<1x16x12xbf16>
    tpu.vector_store %arg7[%c17, %c0_17, %c0_18], %23 {strides = array<i32>} : memref<18x16x12xbf16, #tpu.memory_space<vmem>>, vector<1x16x12xbf16>,
    %c0_19 = arith.constant 0 : index
    %c0_20 = arith.constant 0 : index
    %c0_21 = arith.constant 0 : index
    %25 = vector.load %arg7[%c0_19, %c0_20, %c0_21] : memref<18x16x12xbf16, #tpu.memory_space<vmem>>, vector<16x16x12xbf16>
    %26 = vector.shape_cast %25 : vector<16x16x12xbf16> to vector<256x12xbf16>
    %c0_22 = arith.constant 0 : index
    %c0_23 = arith.constant 0 : index
    %c0_24 = arith.constant 0 : index
    %27 = vector.load %arg2[%c0_22, %c0_23, %c0_24] : memref<3x12x4xbf16, #tpu.memory_space<vmem>>, vector<1x12x4xbf16>
    %28 = vector.shape_cast %27 : vector<1x12x4xbf16> to vector<12x4xbf16>
    %cst = arith.constant dense<0.000000e+00> : vector<256x4xf32>
    %29 = tpu.matmul %26, %28, %cst {dimension_numbers = #tpu.dot_dimension_numbers<[1], [0], [0], [1], [0, 0, 1, 1], [], []>} : vector<256x12xbf16>, vector<12x4xbf16>, vector<256x4xf32> -> vector<256x4xf32>
    %c1_25 = arith.constant 1 : index
    %c0_26 = arith.constant 0 : index
    %c0_27 = arith.constant 0 : index
    %30 = vector.load %arg7[%c1_25, %c0_26, %c0_27] : memref<18x16x12xbf16, #tpu.memory_space<vmem>>, vector<16x16x12xbf16>
    %31 = vector.shape_cast %30 : vector<16x16x12xbf16> to vector<256x12xbf16>
    %c1_28 = arith.constant 1 : index
    %c0_29 = arith.constant 0 : index
    %c0_30 = arith.constant 0 : index
    %32 = vector.load %arg2[%c1_28, %c0_29, %c0_30] : memref<3x12x4xbf16, #tpu.memory_space<vmem>>, vector<1x12x4xbf16>
    %33 = vector.shape_cast %32 : vector<1x12x4xbf16> to vector<12x4xbf16>
    %cst_31 = arith.constant dense<0.000000e+00> : vector<256x4xf32>
    %34 = tpu.matmul %31, %33, %cst_31 {dimension_numbers = #tpu.dot_dimension_numbers<[1], [0], [0], [1], [0, 0, 1, 1], [], []>} : vector<256x12xbf16>, vector<12x4xbf16>, vector<256x4xf32> -> vector<256x4xf32>
    %35 = arith.addf %29, %34 : vector<256x4xf32>
    %c2_32 = arith.constant 2 : index
    %c0_33 = arith.constant 0 : index
    %c0_34 = arith.constant 0 : index
    %36 = vector.load %arg7[%c2_32, %c0_33, %c0_34] : memref<18x16x12xbf16, #tpu.memory_space<vmem>>, vector<16x16x12xbf16>
    %37 = vector.shape_cast %36 : vector<16x16x12xbf16> to vector<256x12xbf16>
    %c2_35 = arith.constant 2 : index
    %c0_36 = arith.constant 0 : index
    %c0_37 = arith.constant 0 : index
    %38 = vector.load %arg2[%c2_35, %c0_36, %c0_37] : memref<3x12x4xbf16, #tpu.memory_space<vmem>>, vector<1x12x4xbf16>
    %39 = vector.shape_cast %38 : vector<1x12x4xbf16> to vector<12x4xbf16>
    %cst_38 = arith.constant dense<0.000000e+00> : vector<256x4xf32>
    %40 = tpu.matmul %37, %39, %cst_38 {dimension_numbers = #tpu.dot_dimension_numbers<[1], [0], [0], [1], [0, 0, 1, 1], [], []>} : vector<256x12xbf16>, vector<12x4xbf16>, vector<256x4xf32> -> vector<256x4xf32>
    %41 = arith.addf %35, %40 : vector<256x4xf32>
    %42 = vector.shape_cast %41 : vector<256x4xf32> to vector<16x16x4xf32>
    %c0_39 = arith.constant 0 : index
    %c0_40 = arith.constant 0 : index
    %43 = vector.load %arg3[%c0_39, %c0_40] : memref<1x4xf32, #tpu.memory_space<vmem>>, vector<1x4xf32>
    %44 = vector.shape_cast %43 : vector<1x4xf32> to vector<1x1x4xf32>
    %45 = vector.broadcast %44 : vector<1x1x4xf32> to vector<16x16x4xf32>
    %46 = arith.addf %42, %45 : vector<16x16x4xf32>
    %cst_41 = arith.constant dense<0.000000e+00> : vector<4xf32>
    %47 = vector.multi_reduction <add>, %46, %cst_41 [0, 1] : vector<16x16x4xf32> to vector<4xf32>
    %48 = vector.shape_cast %47 : vector<4xf32> to vector<1x1x4xf32>
    %cst_42 = arith.constant 3.906250e-03 : f32
    %49 = vector.broadcast %cst_42 : f32 to vector<1x1x4xf32>
    %50 = arith.mulf %48, %49 : vector<1x1x4xf32>
    %51 = vector.broadcast %50 : vector<1x1x4xf32> to vector<16x16x4xf32>
    %52 = arith.subf %46, %51 : vector<16x16x4xf32>
    %53 = arith.mulf %52, %52 : vector<16x16x4xf32>
    %cst_43 = arith.constant dense<0.000000e+00> : vector<4xf32>
    %54 = vector.multi_reduction <add>, %53, %cst_43 [0, 1] : vector<16x16x4xf32> to vector<4xf32>
    %55 = vector.shape_cast %54 : vector<4xf32> to vector<1x1x4xf32>
    %cst_44 = arith.constant 3.906250e-03 : f32
    %56 = vector.broadcast %cst_44 : f32 to vector<1x1x4xf32>
    %57 = arith.mulf %55, %56 : vector<1x1x4xf32>
    %cst_45 = arith.constant 9.99999974E-6 : f32
    %58 = vector.broadcast %cst_45 : f32 to vector<1x1x4xf32>
    %59 = arith.addf %57, %58 : vector<1x1x4xf32>
    %60 = math.rsqrt %59 : vector<1x1x4xf32>
    %61 = vector.broadcast %60 : vector<1x1x4xf32> to vector<16x16x4xf32>
    %62 = arith.mulf %52, %61 : vector<16x16x4xf32>
    %cst_46 = arith.constant 0.000000e+00 : f32
    %63 = vector.broadcast %cst_46 : f32 to vector<16x16x4xf32>
    %64 = arith.maximumf %62, %63 : vector<16x16x4xf32>
    %c1_i32_47 = arith.constant 1 : i32
    %65 = tpu.dynamic_rotate %64 by %c1_i32_47 dim 1 : vector<16x16x4xf32>, i32 -> vector<16x16x4xf32>
    %c15_i32_48 = arith.constant 15 : i32
    %66 = tpu.dynamic_rotate %64 by %c15_i32_48 dim 1 : vector<16x16x4xf32>, i32 -> vector<16x16x4xf32>
    %67 = vector.shape_cast %2 : vector<1x16x1xi1> to vector<1x16x1xi1>
    %68 = vector.broadcast %67 : vector<1x16x1xi1> to vector<16x16x4xi1>
    %69 = arith.select %68, %66, %65 : vector<16x16x4xi1>, vector<16x16x4xf32>
    %70 = vector.shape_cast %4 : vector<1x16x1xi1> to vector<1x16x1xi1>
    %71 = vector.broadcast %70 : vector<1x16x1xi1> to vector<16x16x4xi1>
    %72 = arith.select %71, %65, %66 : vector<16x16x4xi1>, vector<16x16x4xf32>
    %73 = arith.truncf %69 : vector<16x16x4xf32> to vector<16x16x4xbf16>
    %c1_49 = arith.constant 1 : index
    %c0_50 = arith.constant 0 : index
    %c0_51 = arith.constant 0 : index
    %74 = vector.load %arg7[%c1_49, %c0_50, %c0_51] : memref<18x16x12xbf16, #tpu.memory_space<vmem>>, vector<16x16x4xbf16>
    tpu.vector_store %arg7[%c1_49, %c0_50, %c0_51], %73 {strides = array<i32>} : memref<18x16x12xbf16, #tpu.memory_space<vmem>>, vector<16x16x4xbf16>,
    %75 = arith.truncf %64 : vector<16x16x4xf32> to vector<16x16x4xbf16>
    %c1_52 = arith.constant 1 : index
    %c0_53 = arith.constant 0 : index
    %c4_54 = arith.constant 4 : index
    %76 = vector.load %arg7[%c1_52, %c0_53, %c4_54] : memref<18x16x12xbf16, #tpu.memory_space<vmem>>, vector<16x16x4xbf16>
    tpu.vector_store %arg7[%c1_52, %c0_53, %c4_54], %75 {strides = array<i32>} : memref<18x16x12xbf16, #tpu.memory_space<vmem>>, vector<16x16x4xbf16>,
    %77 = arith.truncf %72 : vector<16x16x4xf32> to vector<16x16x4xbf16>
    %c1_55 = arith.constant 1 : index
    %c0_56 = arith.constant 0 : index
    %c8_57 = arith.constant 8 : index
    %78 = vector.load %arg7[%c1_55, %c0_56, %c8_57] : memref<18x16x12xbf16, #tpu.memory_space<vmem>>, vector<16x16x4xbf16>
    tpu.vector_store %arg7[%c1_55, %c0_56, %c8_57], %77 {strides = array<i32>} : memref<18x16x12xbf16, #tpu.memory_space<vmem>>, vector<16x16x4xbf16>,
    %c2_58 = arith.constant 2 : index
    %c0_59 = arith.constant 0 : index
    %c0_60 = arith.constant 0 : index
    %79 = vector.load %arg7[%c2_58, %c0_59, %c0_60] : memref<18x16x12xbf16, #tpu.memory_space<vmem>>, vector<1x16x12xbf16>
    %c0_61 = arith.constant 0 : index
    %c0_62 = arith.constant 0 : index
    %c0_63 = arith.constant 0 : index
    %80 = vector.load %arg7[%c0_61, %c0_62, %c0_63] : memref<18x16x12xbf16, #tpu.memory_space<vmem>>, vector<1x16x12xbf16>
    tpu.vector_store %arg7[%c0_61, %c0_62, %c0_63], %79 {strides = array<i32>} : memref<18x16x12xbf16, #tpu.memory_space<vmem>>, vector<1x16x12xbf16>,
    %c15_64 = arith.constant 15 : index
    %c0_65 = arith.constant 0 : index
    %c0_66 = arith.constant 0 : index
    %81 = vector.load %arg7[%c15_64, %c0_65, %c0_66] : memref<18x16x12xbf16, #tpu.memory_space<vmem>>, vector<1x16x12xbf16>
    %c17_67 = arith.constant 17 : index
    %c0_68 = arith.constant 0 : index
    %c0_69 = arith.constant 0 : index
    %82 = vector.load %arg7[%c17_67, %c0_68, %c0_69] : memref<18x16x12xbf16, #tpu.memory_space<vmem>>, vector<1x16x12xbf16>
    tpu.vector_store %arg7[%c17_67, %c0_68, %c0_69], %81 {strides = array<i32>} : memref<18x16x12xbf16, #tpu.memory_space<vmem>>, vector<1x16x12xbf16>,
    %c0_70 = arith.constant 0 : index
    %c0_71 = arith.constant 0 : index
    %c0_72 = arith.constant 0 : index
    %83 = vector.load %arg7[%c0_70, %c0_71, %c0_72] : memref<18x16x12xbf16, #tpu.memory_space<vmem>>, vector<16x16x12xbf16>
    %84 = vector.shape_cast %83 : vector<16x16x12xbf16> to vector<256x12xbf16>
    %c0_73 = arith.constant 0 : index
    %c0_74 = arith.constant 0 : index
    %c0_75 = arith.constant 0 : index
    %85 = vector.load %arg4[%c0_73, %c0_74, %c0_75] : memref<3x12x4xbf16, #tpu.memory_space<vmem>>, vector<1x12x4xbf16>
    %86 = vector.shape_cast %85 : vector<1x12x4xbf16> to vector<12x4xbf16>
    %cst_76 = arith.constant dense<0.000000e+00> : vector<256x4xf32>
    %87 = tpu.matmul %84, %86, %cst_76 {dimension_numbers = #tpu.dot_dimension_numbers<[1], [0], [0], [1], [0, 0, 1, 1], [], []>} : vector<256x12xbf16>, vector<12x4xbf16>, vector<256x4xf32> -> vector<256x4xf32>
    %c1_77 = arith.constant 1 : index
    %c0_78 = arith.constant 0 : index
    %c0_79 = arith.constant 0 : index
    %88 = vector.load %arg7[%c1_77, %c0_78, %c0_79] : memref<18x16x12xbf16, #tpu.memory_space<vmem>>, vector<16x16x12xbf16>
    %89 = vector.shape_cast %88 : vector<16x16x12xbf16> to vector<256x12xbf16>
    %c1_80 = arith.constant 1 : index
    %c0_81 = arith.constant 0 : index
    %c0_82 = arith.constant 0 : index
    %90 = vector.load %arg4[%c1_80, %c0_81, %c0_82] : memref<3x12x4xbf16, #tpu.memory_space<vmem>>, vector<1x12x4xbf16>
    %91 = vector.shape_cast %90 : vector<1x12x4xbf16> to vector<12x4xbf16>
    %cst_83 = arith.constant dense<0.000000e+00> : vector<256x4xf32>
    %92 = tpu.matmul %89, %91, %cst_83 {dimension_numbers = #tpu.dot_dimension_numbers<[1], [0], [0], [1], [0, 0, 1, 1], [], []>} : vector<256x12xbf16>, vector<12x4xbf16>, vector<256x4xf32> -> vector<256x4xf32>
    %93 = arith.addf %87, %92 : vector<256x4xf32>
    %c2_84 = arith.constant 2 : index
    %c0_85 = arith.constant 0 : index
    %c0_86 = arith.constant 0 : index
    %94 = vector.load %arg7[%c2_84, %c0_85, %c0_86] : memref<18x16x12xbf16, #tpu.memory_space<vmem>>, vector<16x16x12xbf16>
    %95 = vector.shape_cast %94 : vector<16x16x12xbf16> to vector<256x12xbf16>
    %c2_87 = arith.constant 2 : index
    %c0_88 = arith.constant 0 : index
    %c0_89 = arith.constant 0 : index
    %96 = vector.load %arg4[%c2_87, %c0_88, %c0_89] : memref<3x12x4xbf16, #tpu.memory_space<vmem>>, vector<1x12x4xbf16>
    %97 = vector.shape_cast %96 : vector<1x12x4xbf16> to vector<12x4xbf16>
    %cst_90 = arith.constant dense<0.000000e+00> : vector<256x4xf32>
    %98 = tpu.matmul %95, %97, %cst_90 {dimension_numbers = #tpu.dot_dimension_numbers<[1], [0], [0], [1], [0, 0, 1, 1], [], []>} : vector<256x12xbf16>, vector<12x4xbf16>, vector<256x4xf32> -> vector<256x4xf32>
    %99 = arith.addf %93, %98 : vector<256x4xf32>
    %100 = vector.shape_cast %99 : vector<256x4xf32> to vector<16x16x4xf32>
    %c0_91 = arith.constant 0 : index
    %c0_92 = arith.constant 0 : index
    %101 = vector.load %arg5[%c0_91, %c0_92] : memref<1x4xf32, #tpu.memory_space<vmem>>, vector<1x4xf32>
    %102 = vector.shape_cast %101 : vector<1x4xf32> to vector<1x1x4xf32>
    %103 = vector.broadcast %102 : vector<1x1x4xf32> to vector<16x16x4xf32>
    %104 = arith.addf %100, %103 : vector<16x16x4xf32>
    %cst_93 = arith.constant dense<0.000000e+00> : vector<4xf32>
    %105 = vector.multi_reduction <add>, %104, %cst_93 [0, 1] : vector<16x16x4xf32> to vector<4xf32>
    %106 = vector.shape_cast %105 : vector<4xf32> to vector<1x1x4xf32>
    %cst_94 = arith.constant 3.906250e-03 : f32
    %107 = vector.broadcast %cst_94 : f32 to vector<1x1x4xf32>
    %108 = arith.mulf %106, %107 : vector<1x1x4xf32>
    %109 = vector.broadcast %108 : vector<1x1x4xf32> to vector<16x16x4xf32>
    %110 = arith.subf %104, %109 : vector<16x16x4xf32>
    %111 = arith.mulf %110, %110 : vector<16x16x4xf32>
    %cst_95 = arith.constant dense<0.000000e+00> : vector<4xf32>
    %112 = vector.multi_reduction <add>, %111, %cst_95 [0, 1] : vector<16x16x4xf32> to vector<4xf32>
    %113 = vector.shape_cast %112 : vector<4xf32> to vector<1x1x4xf32>
    %cst_96 = arith.constant 3.906250e-03 : f32
    %114 = vector.broadcast %cst_96 : f32 to vector<1x1x4xf32>
    %115 = arith.mulf %113, %114 : vector<1x1x4xf32>
    %cst_97 = arith.constant 9.99999974E-6 : f32
    %116 = vector.broadcast %cst_97 : f32 to vector<1x1x4xf32>
    %117 = arith.addf %115, %116 : vector<1x1x4xf32>
    %118 = math.rsqrt %117 : vector<1x1x4xf32>
    %119 = vector.broadcast %118 : vector<1x1x4xf32> to vector<16x16x4xf32>
    %120 = arith.mulf %110, %119 : vector<16x16x4xf32>
    %c0_98 = arith.constant 0 : index
    %c0_99 = arith.constant 0 : index
    %c0_100 = arith.constant 0 : index
    %c0_101 = arith.constant 0 : index
    %121 = vector.load %arg1[%c0_98, %c0_99, %c0_100, %c0_101] : memref<1x16x16x4xf32, #tpu.memory_space<vmem>>, vector<1x16x16x4xf32>
    %122 = vector.shape_cast %121 : vector<1x16x16x4xf32> to vector<16x16x4xf32>
    %123 = arith.addf %122, %120 : vector<16x16x4xf32>
    %c0_102 = arith.constant 0 : index
    %c0_103 = arith.constant 0 : index
    %c0_104 = arith.constant 0 : index
    %c0_105 = arith.constant 0 : index
    %124 = vector.load %arg6[%c0_102, %c0_103, %c0_104, %c0_105] : memref<1x16x16x4xf32, #tpu.memory_space<vmem>>, vector<1x16x16x4xf32>
    %125 = vector.shape_cast %124 : vector<1x16x16x4xf32> to vector<16x16x4xf32>
    %126 = vector.shape_cast %123 : vector<16x16x4xf32> to vector<1x16x16x4xf32>
    tpu.vector_store %arg6[%c0_102, %c0_103, %c0_104, %c0_105], %126 {strides = array<i32>} : memref<1x16x16x4xf32, #tpu.memory_space<vmem>>, vector<1x16x16x4xf32>,
    return
  }
  func.func @transform_0(%arg0: i32) -> (i32, i32, i32, i32) {
    %c0_i32 = arith.constant 0 : i32
    %c0_i32_0 = arith.constant 0 : i32
    %c0_i32_1 = arith.constant 0 : i32
    %c0_i32_2 = arith.constant 0 : i32
    return %arg0, %c0_i32, %c0_i32_0, %c0_i32_1 : i32, i32, i32, i32
  }
  func.func @transform_1(%arg0: i32) -> (i32, i32, i32) {
    %c0_i32 = arith.constant 0 : i32
    %c0_i32_0 = arith.constant 0 : i32
    %c0_i32_1 = arith.constant 0 : i32
    %c0_i32_2 = arith.constant 0 : i32
    return %c0_i32, %c0_i32_0, %c0_i32_1 : i32, i32, i32
  }
  func.func @transform_2(%arg0: i32) -> (i32, i32) {
    %c0_i32 = arith.constant 0 : i32
    %c0_i32_0 = arith.constant 0 : i32
    %c0_i32_1 = arith.constant 0 : i32
    return %c0_i32, %c0_i32_0 : i32, i32
  }
  func.func @transform_3(%arg0: i32) -> (i32, i32, i32) {
    %c0_i32 = arith.constant 0 : i32
    %c0_i32_0 = arith.constant 0 : i32
    %c0_i32_1 = arith.constant 0 : i32
    %c0_i32_2 = arith.constant 0 : i32
    return %c0_i32, %c0_i32_0, %c0_i32_1 : i32, i32, i32
  }
  func.func @transform_4(%arg0: i32) -> (i32, i32) {
    %c0_i32 = arith.constant 0 : i32
    %c0_i32_0 = arith.constant 0 : i32
    %c0_i32_1 = arith.constant 0 : i32
    return %c0_i32, %c0_i32_0 : i32, i32
  }
  func.func @transform_5(%arg0: i32) -> (i32, i32, i32, i32) {
    %c0_i32 = arith.constant 0 : i32
    %c0_i32_0 = arith.constant 0 : i32
    %c0_i32_1 = arith.constant 0 : i32
    %c0_i32_2 = arith.constant 0 : i32
    return %arg0, %c0_i32, %c0_i32_0, %c0_i32_1 : i32, i32, i32, i32
  }
}

</mosaic_0001>

<bundles_post_ra>
// kernel: tpu_custom_call.1
= control target key start
LH: loop header
LB: loop body
LE: loop exit
PB: predicated region body
PF: predicated region fallthrough
CT: control target
= control target key end

     0   :  { %s4638_s18 = smov 0   ;;  %s7703_s0 = inlined_call_operand.vmem [shape: f32[2,16,16,4], index: 0, kind: input, shape index: {}]   ;;  %s7704_s1 = inlined_call_operand.vmem [shape: bf16[3,12,4], index: 1, kind: input, shape index: {}]   ;;  %s7705_s2 = inlined_call_operand.vmem [shape: f32[1,4], index: 2, kind: input, shape index: {}]   ;;  %s7706_s3 = inlined_call_operand.vmem [shape: bf16[3,12,4], index: 3, kind: input, shape index: {}]   ;;  %s7707_s4 = inlined_call_operand.vmem [shape: f32[1,4], index: 4, kind: input, shape index: {}]   ;;  %s7708_s5 = inlined_call_operand.vmem [shape: f32[2,16,16,4], index: 5, kind: output, shape index: {}]  }
   0x1 LB: > { %s3953_s19 = sadd.s32 4294967295, %s4604_s18   ;;  %p3957_p0 = scmp.ge.s32.totalorder %s4604_s18, 1  ;;  %s4604_s18 = sphi %s4638_s18, %s15_s18  }
   0x2   : > { %p187_p1 = scmp.lt.s32.totalorder %s4604_s18, 3 }
   0x4   : > { %p188_p2 = pnand %p3957_p0, %p187_p1 }
   0x6   : > { %191 = sbr.rel (%p188_p2) target bundleno = 1471 (0x5bf), region = 40 }
   0xb   : > { %p215_p3 = scmp.lt.s32.totalorder %s3953_s19, 1  ;;  %v226_v0 = vlaneseq  ;;  %s4606_s24 = smov 4   ;;  %vm500_vm4 = vcmask 27648   ;;  %vm693_vm5 = vcmask 60448   ;;  %vm1134_vm6 = vcmask 1045504  }
   0xc   : > { %s4607_s25 = smov 8   ;;  %vm886_vm7 = vcmask 93248   ;;  %vm1085_vm8 = vcmask 97280   ;;  %vm922_vm9 = vcmask 93184   ;;  %vm1780_vm10 = vcmask 31744  }
   0xd   : > { %s7755_s19 = smov (!%p215_p3, %s3953_s19), 1  ;;  %v4648_v1 = vshrl.u32 %v226_v0, 7 }
   0xe   : > { %s4476_s20 = sshll.u32 %s7755_s19, 8 }
   0xf   : > { %7723 = vst [vmem:[#allocation3_spill] sm:$0xff] %v4648_v1  ;;  %s4656_s23 = scalar_lea.vmem %s7703_s0, %s4476_s20  ;;  %vm362_vm0 = vcmp.lt.s32.totalorder %v4648_v1, 7  ;;  %v4662_v4 = vadd.s32 8, %v4648_v1  ;;  %vm229_vm1 = vcmp.eq.s32.totalorder %v4648_v1, 0  ;;  %vm297_vm2 = vcmp.lt.s32.totalorder %v4648_v1, 1  ;;  %s7552_s10 = scalar_lea.vmem %s7708_s5, %s4476_s20 }
  0x10   : > { %v249_v2 = vld [vmem:[%s4656_s23 + $0x80] sm:$0xff]  ;;  %v250_v3 = vld [vmem:[%s4656_s23 + $0x88] sm:$0xff]  ;;  %v4683_v16 = vld [vmem:[%s4656_s23 + $0x90] sm:$0xff] }
  0x11   : > { %7724 = vst [vmem:[#allocation4_spill] sm:$0xff] %v4662_v4  ;;  %v549_v5 = vpack.c.bf16 %v249_v2, %v249_v2  ;;  %v273_v6 = vrot.slane %v249_v2, 7  ;;  %v338_v7 = vrot.slane %v249_v2, 1  ;;  %v289_v8 = vrot.slane %v250_v3, 7  ;;  %v4686_v17 = vld [vmem:[%s4656_s23 + $0x98] sm:$0xff]  ;;  %v4723_v32 = vld [vmem:[%s4656_s23 + $0xa8] sm:$0xff] }
  0x12   : > { %v354_v9 = vrot.slane %v250_v3, 1  ;;  %vm232_vm3 = vcmp.eq.s32.totalorder %v4662_v4, 15  ;;  %v550_v18 = vpack.c.bf16 %v250_v3, %v250_v3  ;;  %v551_v19 = vpack.c.bf16 %v4683_v16, %v4683_v16  ;;  %v4726_v33 = vld [vmem:[%s4656_s23 + $0xa0] sm:$0xff]  ;;  %v4755_v44 = vld [vmem:[%s4656_s23 + $0xb8] sm:$0xff]  ;;  %v4764_v47 = vld [vmem:[%s4656_s23 + $0xb0] sm:$0xff] }
  0x13   : > { %629 = vrot.lane.b32.xlu0 %v549_v5, %s4606_s24  ;;  %v322_v10 = vsel %vm297_vm2, %v289_v8, %v273_v6  ;;  %v4678_v14 = vsel %vm297_vm2, %v273_v6, %v289_v8  ;;  %v339_v21 = vrot.slane %v4683_v16, 1  ;;  %v355_v22 = vrot.slane %v4686_v17, 1  ;;  %v4795_v59 = vld [vmem:[%s4656_s23 + $0xc8] sm:$0xff]  ;;  %v4801_v62 = vld [vmem:[%s4656_s23 + $0xc0] sm:$0xff] }
  0x14   : > { %v371_v11 = vsel %vm362_vm0, %v338_v7, %v354_v9  ;;  %v387_v15 = vsel %vm362_vm0, %v354_v9, %v338_v7  ;;  %v274_v23 = vrot.slane %v4683_v16, 7  ;;  %v290_v24 = vrot.slane %v4686_v17, 7  ;;  %633 = vrot.lane.b32.xlu2 %v551_v19, %s4606_s24 }
  0x15   : > { %v742_v12 = vpack.c.bf16 %v371_v11, %v371_v11  ;;  %v4674_v13 = vsel %vm229_vm1, %v371_v11, %v322_v10  ;;  %v452_v20 = vsel %vm232_vm3, %v4678_v14, %v387_v15  ;;  %v4702_v26 = vsel %vm362_vm0, %v339_v21, %v355_v22  ;;  %v4837_v15 = vld [vmem:[%s4656_s23 + $0xd0] sm:$0xff] }
  0x16   : > { %v743_v25 = vpack.c.bf16 %v452_v20, %v452_v20  ;;  %v4710_v27 = vsel %vm297_vm2, %v274_v23, %v290_v24  ;;  %v388_v28 = vsel %vm362_vm0, %v355_v22, %v339_v21  ;;  %v552_v29 = vpack.c.bf16 %v4686_v17, %v4686_v17 }
  0x17   : > { %822 = vrot.lane.b32.xlu1 %v742_v12, %s4607_s25  ;;  %v744_v30 = vpack.c.bf16 %v4702_v26, %v4702_v26  ;;  %v454_v31 = vsel %vm232_vm3, %v4710_v27, %v388_v28  ;;  %v291_v35 = vrot.slane %v4723_v32, 7  ;;  %v275_v36 = vrot.slane %v4726_v33, 7  ;;  %v4834_v12 = vld [vmem:[%s4656_s23 + $0xd8] sm:$0xff] }
  0x18   : > { %v745_v34 = vpack.c.bf16 %v454_v31, %v454_v31  ;;  %v356_v37 = vrot.slane %v4723_v32, 1  ;;  %v340_v38 = vrot.slane %v4726_v33, 1  ;;  %v553_v39 = vpack.c.bf16 %v4726_v33, %v4726_v33 }
  0x19   : > { %v554_v40 = vpack.c.bf16 %v4723_v32, %v4723_v32  ;;  %v4745_v41 = vsel %vm297_vm2, %v275_v36, %v291_v35  ;;  %v276_v48 = vrot.slane %v4764_v47, 7  ;;  %v341_v49 = vrot.slane %v4764_v47, 1 }
  0x1a   : > { %v389_v42 = vsel %vm362_vm0, %v356_v37, %v340_v38  ;;  %v4751_v43 = vsel %vm362_vm0, %v340_v38, %v356_v37  ;;  %v292_v50 = vrot.slane %v4755_v44, 7  ;;  %v357_v51 = vrot.slane %v4755_v44, 1 }
  0x1b   : > { %631 = vrot.lane.b32.xlu0 %v550_v18, %s4606_s24  ;;  %v456_v45 = vsel %vm232_vm3, %v4745_v41, %v389_v42  ;;  %v746_v46 = vpack.c.bf16 %v4751_v43, %v4751_v43  ;;  %v555_v53 = vpack.c.bf16 %v4764_v47, %v4764_v47  ;;  %v556_v57 = vpack.c.bf16 %v4755_v44, %v4755_v44 }
  0x1c   : > { %635 = vrot.lane.b32.xlu2 %v552_v29, %s4606_s24  ;;  %v747_v52 = vpack.c.bf16 %v456_v45, %v456_v45  ;;  %v4779_v54 = vsel %vm297_vm2, %v276_v48, %v292_v50  ;;  %v390_v55 = vsel %vm362_vm0, %v357_v51, %v341_v49  ;;  %v4786_v56 = vsel %vm362_vm0, %v341_v49, %v357_v51 }
  0x1d   : > { %v458_v58 = vsel %vm232_vm3, %v4779_v54, %v390_v55  ;;  %v748_v60 = vpack.c.bf16 %v4786_v56, %v4786_v56  ;;  %v342_v63 = vrot.slane %v4801_v62, 1  ;;  %v358_v0 = vrot.slane %v4795_v59, 1 }
  0x1e   : > { %v749_v61 = vpack.c.bf16 %v458_v58, %v458_v58  ;;  %v277_v2 = vrot.slane %v4801_v62, 7  ;;  %v293_v3 = vrot.slane %v4795_v59, 7  ;;  %v557_v5 = vpack.c.bf16 %v4801_v62, %v4801_v62 }
  0x1f   : > { %824 = vrot.lane.b32.xlu1 %v743_v25, %s4607_s25  ;;  %v4813_v6 = vsel %vm362_vm0, %v342_v63, %v358_v0  ;;  %v391_v8 = vsel %vm362_vm0, %v358_v0, %v342_v63  ;;  %v558_v9 = vpack.c.bf16 %v4795_v59, %v4795_v59  ;;  %v294_v19 = vrot.slane %v4834_v12, 7  ;;  %v4912_v0 = vld [vmem:[%s4656_s23 + $0xf0] sm:$0xff] }
  0x20   : > { %v4821_v7 = vsel %vm297_vm2, %v277_v2, %v293_v3  ;;  %v750_v10 = vpack.c.bf16 %v4813_v6, %v4813_v6  ;;  %v278_v20 = vrot.slane %v4837_v15, 7  ;;  %v359_v21 = vrot.slane %v4834_v12, 1 }
  0x21   : > { %v460_v11 = vsel %vm232_vm3, %v4821_v7, %v391_v8  ;;  %v343_v22 = vrot.slane %v4837_v15, 1  ;;  %v559_v25 = vpack.c.bf16 %v4837_v15, %v4837_v15  ;;  %v560_v28 = vpack.c.bf16 %v4834_v12, %v4834_v12 }
  0x22   : > { %v751_v18 = vpack.c.bf16 %v460_v11, %v460_v11  ;;  %v4856_v29 = vsel %vm297_vm2, %v278_v20, %v294_v19  ;;  %v563_v11 = vpack.c.bf16 %v4912_v0, %v4912_v0 }
  0x23   : > { %826 = vrot.lane.b32.xlu0 %v744_v30, %s4607_s25  ;;  %v392_v30 = vsel %vm362_vm0, %v359_v21, %v343_v22  ;;  %v4862_v31 = vsel %vm362_vm0, %v343_v22, %v359_v21 }
  0x24   : > { %637 = vrot.lane.b32.xlu2 %v553_v39, %s4606_s24  ;;  %v462_v37 = vsel %vm232_vm3, %v4856_v29, %v392_v30  ;;  %v752_v38 = vpack.c.bf16 %v4862_v31, %v4862_v31  ;;  %v4875_v39 = vld [vmem:[%s4656_s23 + $0xe0] sm:$0xff]  ;;  %v483_v30 = vpack.c.bf16 %v4674_v13, %v4674_v13 }
  0x25   : > { %v344_v42 = vrot.slane %v4875_v39, 1  ;;  %v753_v49 = vpack.c.bf16 %v462_v37, %v462_v37  ;;  %v561_v51 = vpack.c.bf16 %v4875_v39, %v4875_v39 }
  0x26   : > { %517 = vst.msk [vmem:[#allocation2 + $0x48] sm:$0xf] %vm500_vm4, %v483_v30 }
  0x27   : > { %828 = vrot.lane.b32.xlu1 %v745_v34, %s4607_s25  ;;  %v4866_v34 = vld [vmem:[%s4656_s23 + $0xe8] sm:$0xff] }
  0x28   : > { %v295_v45 = vrot.slane %v4866_v34, 7 }
  0x2b   : > { %639 = vrot.lane.b32.xlu0 %v554_v40, %s4606_s24  ;;  %v279_v40 = vrot.slane %v4875_v39, 7 }
  0x2c   : > { %832 = vrot.lane.b32.xlu2 %v747_v52, %s4607_s25 }
  0x2d   : > { %v4890_v52 = vsel %vm297_vm2, %v279_v40, %v295_v45 }
  0x2f   : > { %830 = vrot.lane.b32.xlu1 %v746_v46, %s4607_s25  ;;  %v360_v46 = vrot.slane %v4866_v34, 1 }
  0x31   : > { %v4897_v55 = vsel %vm362_vm0, %v344_v42, %v360_v46 }
  0x33   : > { %641 = vrot.lane.b32.xlu0 %v555_v53, %s4606_s24  ;;  %v393_v53 = vsel %vm362_vm0, %v360_v46, %v344_v42  ;;  %v4950_v42 = vld [vmem:[%s4656_s23 + $0x10] sm:$0xff] }
  0x34   : > { %834 = vrot.lane.b32.xlu2 %v748_v60, %s4607_s25  ;;  %v464_v58 = vsel %vm232_vm3, %v4890_v52, %v393_v53  ;;  %v4906_v60 = vld [vmem:[%s4656_s23 + $0xf8] sm:$0xff]  ;;  %v331_v53 = vrot.slane %v4950_v42, 1 }
  0x35   : > { %v755_v63 = vpack.c.bf16 %v464_v58, %v464_v58  ;;  %v361_v8 = vrot.slane %v4906_v60, 1 }
  0x37   : > { %643 = vrot.lane.b32.xlu1 %v556_v57, %s4606_s24  ;;  %v562_v57 = vpack.c.bf16 %v4866_v34, %v4866_v34 }
  0x3b   : > { %836 = vrot.lane.b32.xlu0 %v749_v61, %s4607_s25  ;;  %v754_v61 = vpack.c.bf16 %v4897_v55, %v4897_v55 }
  0x3c   : > { %647 = vrot.lane.b32.xlu2 %v558_v9, %s4606_s24  ;;  %v280_v9 = vrot.slane %v4912_v0, 7 }
  0x3f   : > { %645 = vrot.lane.b32.xlu1 %v557_v5, %s4606_s24  ;;  %v345_v5 = vrot.slane %v4912_v0, 1 }
  0x41   : > { %v394_v22 = vsel %vm362_vm0, %v361_v8, %v345_v5 }
  0x43   : > { %838 = vrot.lane.b32.xlu0 %v750_v10, %s4607_s25  ;;  %v296_v10 = vrot.slane %v4906_v60, 7 }
  0x44   : > { %649 = vrot.lane.b32.xlu2 %v559_v25, %s4606_s24  ;;  %v564_v25 = vpack.c.bf16 %v4906_v60, %v4906_v60 }
  0x45   : > { %v4932_v21 = vsel %vm297_vm2, %v280_v9, %v296_v10 }
  0x46   : > { %v466_v37 = vsel %vm232_vm3, %v4932_v21, %v394_v22 }
  0x47   : > { %840 = vrot.lane.b32.xlu1 %v751_v18, %s4607_s25  ;;  %v4924_v18 = vsel %vm362_vm0, %v345_v5, %v361_v8  ;;  %v757_v46 = vpack.c.bf16 %v466_v37, %v466_v37  ;;  %v323_v5 = vsel %vm297_vm2, %v290_v24, %v274_v23  ;;  %v4998_v23 = vld [vmem:[%s4656_s23 + $0x20] sm:$0xff] }
  0x48   : > { %v267_v24 = vrot.slane %v4998_v23, 7 }
  0x4b   : > { %651 = vrot.lane.b32.xlu0 %v560_v28, %s4606_s24  ;;  %v756_v28 = vpack.c.bf16 %v4924_v18, %v4924_v18 }
  0x4c   : > { %844 = vrot.lane.b32.xlu2 %v753_v49, %s4607_s25 }
  0x4f   : > { %842 = vrot.lane.b32.xlu1 %v752_v38, %s4607_s25  ;;  %v4947_v38 = vld [vmem:[%s4656_s23 + $0x18] sm:$0xff] }
  0x50   : > { %v282_v49 = vrot.slane %v4947_v38, 7  ;;  %v347_v13 = vrot.slane %v4947_v38, 1  ;;  %v536_v58 = vpack.c.bf16 %v4947_v38, %v4947_v38 }
  0x52   : > { %v4982_v8 = vsel %vm362_vm0, %v331_v53, %v347_v13 }
  0x53   : > { %653 = vrot.lane.b32.xlu0 %v561_v51, %s4606_s24  ;;  %v266_v51 = vrot.slane %v4950_v42, 7  ;;  %v728_v17 = vpack.c.bf16 %v4982_v8, %v4982_v8 }
  0x54   : > { %846 = vrot.lane.b32.xlu2 %v754_v61, %s4607_s25 }
  0x55   : > { %v4970_v61 = vsel %vm297_vm2, %v266_v51, %v282_v49  ;;  %v315_v60 = vsel %vm297_vm2, %v282_v49, %v266_v51 }
  0x57   : > { %655 = vrot.lane.b32.xlu1 %v562_v57, %s4606_s24  ;;  %v535_v57 = vpack.c.bf16 %v4950_v42, %v4950_v42 }
  0x5b   : > { %848 = vrot.lane.b32.xlu0 %v755_v63, %s4607_s25  ;;  %v380_v63 = vsel %vm362_vm0, %v347_v13, %v331_v53  ;;  %v537_v13 = vpack.c.bf16 %v4998_v23, %v4998_v23  ;;  %v486_v53 = vpack.c.bf16 %v4710_v27, %v4710_v27 }
  0x5c   : > { %659 = vrot.lane.b32.xlu2 %v564_v25, %s4606_s24  ;;  %v4989_v25 = vld [vmem:[%s4656_s23 + $0x28] sm:$0xff]  ;;  %v438_v16 = vsel %vm232_vm3, %v4970_v61, %v380_v63 }
  0x5d   : > { %v348_v30 = vrot.slane %v4989_v25, 1  ;;  %v729_v37 = vpack.c.bf16 %v438_v16, %v438_v16  ;;  %520 = vst.msk [vmem:[#allocation2 + $0x54] sm:$0xf] %vm500_vm4, %v486_v53  ;;  %v538_v27 = vpack.c.bf16 %v4989_v25, %v4989_v25 }
  0x5f   : > { %657 = vrot.lane.b32.xlu1 %v563_v11, %s4606_s24  ;;  %v417_v11 = vsel %vm229_vm1, %v4702_v26, %v323_v5  ;;  %v332_v26 = vrot.slane %v4998_v23, 1 }
  0x60   : > { %v485_v22 = vpack.c.bf16 %v417_v11, %v417_v11  ;;  %v4030_v11 = vld [vmem:[%s7704_s1 + $0x8] sm:$0xf] }
  0x62   : > { %519 = vst.msk [vmem:[#allocation2 + $0x50] sm:$0xf] %vm500_vm4, %v485_v22  ;;  %v5040_v22 = vld [vmem:[%s4656_s23 + $0x38] sm:$0xff] }
  0x63   : > { %850 = vrot.lane.b32.xlu0 %v756_v28, %s4607_s25  ;;  %v283_v28 = vrot.slane %v4989_v25, 7  ;;  %v349_v53 = vrot.slane %v5040_v22, 1 }
  0x64   : > { %601 = vrot.lane.b32.xlu2 %v535_v57, %s4606_s24 }
  0x65   : > { %v5019_v57 = vsel %vm297_vm2, %v267_v24, %v283_v28 }
  0x67   : > { %852 = vrot.lane.b32.xlu1 %v757_v46, %s4607_s25  ;;  %v484_v46 = vpack.c.bf16 %v4678_v14, %v4678_v14  ;;  %v381_v14 = vsel %vm362_vm0, %v348_v30, %v332_v26 }
  0x68   : > { %v440_v5 = vsel %vm232_vm3, %v5019_v57, %v381_v14 }
  0x69   : > { %518 = vst.msk [vmem:[#allocation2 + $0x4c] sm:$0xf] %vm500_vm4, %v484_v46  ;;  %v324_v46 = vsel %vm297_vm2, %v291_v35, %v275_v36  ;;  %v4200_v36 = vld [vmem:[%s7704_s1 + $0x10] sm:$0xf] }
  0x6b   : > { %603 = vrot.lane.b32.xlu0 %v536_v58, %s4606_s24  ;;  %v5027_v58 = vsel %vm362_vm0, %v332_v26, %v348_v30  ;;  %v731_v30 = vpack.c.bf16 %v440_v5, %v440_v5  ;;  %v284_v5 = vrot.slane %v5040_v22, 7 }
  0x6c   : > { %796 = vrot.lane.b32.xlu2 %v729_v37, %s4607_s25  ;;  %v730_v16 = vpack.c.bf16 %v5027_v58, %v5027_v58  ;;  %v5049_v37 = vld [vmem:[%s4656_s23 + $0x30] sm:$0xff] }
  0x6d   : > { %v539_v33 = vpack.c.bf16 %v5049_v37, %v5049_v37 }
  0x6e   : > { %v634_v63 = vpop.permute.xlu2 %633 }
  0x6f   : > { %794 = vrot.lane.b32.xlu1 %v728_v17, %s4607_s25  ;;  %712 = vst.msk [vmem:[#allocation2 + $0x50] sm:$0xf] %vm693_vm5, %v634_v63  ;;  %v4511_v17 = vld [vmem:[%s7704_s1 + $0x8] sm:$0x30]  ;;  %v268_v63 = vrot.slane %v5049_v37, 7 }
  0x70   : > { %v4031_v26 = vor.u32 %v4511_v17, %v4030_v11  ;;  %v488_v11 = vpack.c.bf16 %v4745_v41, %v4745_v41  ;;  %v540_v41 = vpack.c.bf16 %v5040_v22, %v5040_v22 }
  0x71   : > { %v317_v25 = vsel %vm297_vm2, %v284_v5, %v268_v63 }
  0x72   : > { %v1136_v14 = vsel %vm1134_vm6, %v4031_v26, 0  ;;  %v5089_v26 = vsel %vm297_vm2, %v268_v63, %v284_v5  ;;  %522 = vst.msk [vmem:[#allocation2 + $0x5c] sm:$0xf] %vm500_vm4, %v488_v11 }
  0x73   : > { %605 = vrot.lane.b32.xlu0 %v537_v13, %s4606_s24  ;;  %v333_v13 = vrot.slane %v5049_v37, 1  ;;  %4580 = vmatpush.bf16.msra.mxu2 %v1136_v14 }
  0x74   : > { %798 = vrot.lane.b32.xlu2 %v730_v16, %s4607_s25  ;;  %1145 = vmatpush.bf16.msra.mxu0 %v1136_v14 }
  0x75   : > { %v5080_v16 = vsel %vm362_vm0, %v333_v13, %v349_v53 }
  0x76   : > { %v636_v35 = vpop.permute.xlu2 %635  ;;  %v732_v14 = vpack.c.bf16 %v5080_v16, %v5080_v16 }
  0x77   : > { %607 = vrot.lane.b32.xlu1 %v538_v27, %s4606_s24  ;;  %v419_v27 = vsel %vm229_vm1, %v4751_v43, %v324_v46  ;;  %v4528_v43 = vld [vmem:[%s7704_s1 + $0x10] sm:$0x30]  ;;  %713 = vst.msk [vmem:[#allocation2 + $0x54] sm:$0xf] %vm693_vm5, %v636_v35 }
  0x78   : > { %v487_v32 = vpack.c.bf16 %v419_v27, %v419_v27  ;;  %v4201_v17 = vor.u32 %v4528_v43, %v4200_v36  ;;  %v325_v36 = vsel %vm297_vm2, %v292_v50, %v276_v48 }
  0x7a   : > { %521 = vst.msk [vmem:[#allocation2 + $0x58] sm:$0xf] %vm500_vm4, %v487_v32  ;;  %v1621_v46 = vsel %vm1134_vm6, %v4201_v17, 0  ;;  %v5104_v32 = vld [vmem:[%s4656_s23 + $0x48] sm:$0xff] }
  0x7b   : > { %800 = vrot.lane.b32.xlu0 %v731_v30, %s4607_s25  ;;  %v382_v30 = vsel %vm362_vm0, %v349_v53, %v333_v13  ;;  %1630 = vmatpush.bf16.msrb.mxu2 %v1621_v46  ;;  %v5107_v13 = vld [vmem:[%s4656_s23 + $0x40] sm:$0xff]  ;;  %v285_v35 = vrot.slane %v5104_v32, 7  ;;  %v350_v11 = vrot.slane %v5104_v32, 1  ;;  %v542_v48 = vpack.c.bf16 %v5104_v32, %v5104_v32 }
  0x7c   : > { %v442_v27 = vsel %vm232_vm3, %v5089_v26, %v382_v30  ;;  %611 = vrot.lane.b32.xlu2 %v540_v41, %s4606_s24  ;;  %v269_v43 = vrot.slane %v5107_v13, 7  ;;  %v334_v17 = vrot.slane %v5107_v13, 1  ;;  %v421_v30 = vsel %vm229_vm1, %v4786_v56, %v325_v36  ;;  %v5161_v36 = vld [vmem:[%s4656_s23 + $0x50] sm:$0xff] }
  0x7d   : > { %v733_v53 = vpack.c.bf16 %v442_v27, %v442_v27  ;;  %v541_v44 = vpack.c.bf16 %v5107_v13, %v5107_v13  ;;  %v489_v47 = vpack.c.bf16 %v421_v30, %v421_v30  ;;  %v490_v46 = vpack.c.bf16 %v4779_v54, %v4779_v54 }
  0x7e   : > { %v5138_v50 = vsel %vm297_vm2, %v269_v43, %v285_v35  ;;  %v383_v56 = vsel %vm362_vm0, %v350_v11, %v334_v17 }
  0x7f   : > { %609 = vrot.lane.b32.xlu1 %v539_v33, %s4606_s24  ;;  %v638_v33 = vpop.permute.xlu2 %637  ;;  %523 = vst.msk [vmem:[#allocation2 + $0x60] sm:$0xf] %vm500_vm4, %v489_v47 }
  0x80   : > { %714 = vst.msk [vmem:[#allocation2 + $0x58] sm:$0xf] %vm693_vm5, %v638_v33  ;;  %v444_v33 = vsel %vm232_vm3, %v5138_v50, %v383_v56  ;;  %v492_v56 = vpack.c.bf16 %v4821_v7, %v4821_v7 }
  0x81   : > { %524 = vst.msk [vmem:[#allocation2 + $0x64] sm:$0xf] %vm500_vm4, %v490_v46  ;;  %v735_v46 = vpack.c.bf16 %v444_v33, %v444_v33 }
  0x82   : > { %526 = vst.msk [vmem:[#allocation2 + $0x6c] sm:$0xf] %vm500_vm4, %v492_v56  ;;  %v5207_v56 = vld [vmem:[%s4656_s23 + $0x68] sm:$0xff] }
  0x83   : > { %802 = vrot.lane.b32.xlu0 %v732_v14, %s4607_s25  ;;  %v5146_v14 = vsel %vm362_vm0, %v334_v17, %v350_v11  ;;  %v270_v17 = vrot.slane %v5161_v36, 7 }
  0x84   : > { %613 = vrot.lane.b32.xlu2 %v541_v44, %s4606_s24  ;;  %v734_v54 = vpack.c.bf16 %v5146_v14, %v5146_v14 }
  0x85   : > { %v630_v41 = vpop.permute.xlu0 %629 }
  0x86   : > { %710 = vst.msk [vmem:[#allocation2 + $0x48] sm:$0xf] %vm693_vm5, %v630_v41  ;;  %v335_v41 = vrot.slane %v5161_v36, 1 }
  0x87   : > { %804 = vrot.lane.b32.xlu1 %v733_v53, %s4607_s25  ;;  %v5152_v53 = vld [vmem:[%s4656_s23 + $0x58] sm:$0xff]  ;;  %v833_v11 = vpop.permute.xlu2 %832 }
  0x88   : > { %v286_v44 = vrot.slane %v5152_v53, 7  ;;  %v351_v47 = vrot.slane %v5152_v53, 1 }
  0x89   : > { %v823_v27 = vpop.permute.xlu1 %822 }
  0x8a   : > { %903 = vst.msk [vmem:[#allocation2 + $0x48] sm:$0xf] %vm886_vm7, %v823_v27  ;;  %v326_v27 = vsel %vm297_vm2, %v293_v3, %v277_v2  ;;  %v5188_v7 = vsel %vm297_vm2, %v270_v17, %v286_v44  ;;  %v384_v59 = vsel %vm362_vm0, %v351_v47, %v335_v41  ;;  %v5197_v2 = vsel %vm362_vm0, %v335_v41, %v351_v47 }
  0x8b   : > { %615 = vrot.lane.b32.xlu0 %v542_v48, %s4606_s24  ;;  %v543_v48 = vpack.c.bf16 %v5161_v36, %v5161_v36  ;;  %v423_v33 = vsel %vm229_vm1, %v4813_v6, %v326_v27  ;;  %v544_v3 = vpack.c.bf16 %v5152_v53, %v5152_v53  ;;  %v736_v27 = vpack.c.bf16 %v5197_v2, %v5197_v2 }
  0x8c   : > { %808 = vrot.lane.b32.xlu2 %v735_v46, %s4607_s25  ;;  %v491_v62 = vpack.c.bf16 %v423_v33, %v423_v33  ;;  %v327_v41 = vsel %vm297_vm2, %v294_v19, %v278_v20  ;;  %v287_v19 = vrot.slane %v5207_v56, 7  ;;  %v319_v13 = vsel %vm297_vm2, %v286_v44, %v270_v17 }
  0x8d   : > { %v632_v30 = vpop.permute.xlu0 %631  ;;  %v425_v33 = vsel %vm229_vm1, %v4862_v31, %v327_v41  ;;  %v478_v53 = vpack.c.bf16 %v5188_v7, %v5188_v7 }
  0x8e   : > { %711 = vst.msk [vmem:[#allocation2 + $0x4c] sm:$0xf] %vm693_vm5, %v632_v30  ;;  %v493_v15 = vpack.c.bf16 %v425_v33, %v425_v33 }
  0x8f   : > { %806 = vrot.lane.b32.xlu1 %v734_v54, %s4607_s25  ;;  %v835_v6 = vpop.permute.xlu2 %834  ;;  %525 = vst.msk [vmem:[#allocation2 + $0x68] sm:$0xf] %vm500_vm4, %v491_v62  ;;  %v446_v54 = vsel %vm232_vm3, %v5188_v7, %v384_v59  ;;  %v352_v59 = vrot.slane %v5207_v56, 1 }
  0x90   : > { %v737_v47 = vpack.c.bf16 %v446_v54, %v446_v54  ;;  %527 = vst.msk [vmem:[#allocation2 + $0x70] sm:$0xf] %vm500_vm4, %v493_v15 }
  0x91   : > { %v825_v30 = vpop.permute.xlu1 %824  ;;  %512 = vst.msk [vmem:[#allocation2 + $0x34] sm:$0xf] %vm500_vm4, %v478_v53 }
  0x92   : > { %904 = vst.msk [vmem:[#allocation2 + $0x4c] sm:$0xf] %vm886_vm7, %v825_v30 }
  0x93   : > { %617 = vrot.lane.b32.xlu0 %v543_v48, %s4606_s24  ;;  %v5220_v48 = vld [vmem:[%s4656_s23 + $0x60] sm:$0xff] }
  0x94   : > { %v336_v30 = vrot.slane %v5220_v48, 1  ;;  %810 = vrot.lane.b32.xlu2 %v736_v27, %s4607_s25  ;;  %v545_v20 = vpack.c.bf16 %v5220_v48, %v5220_v48 }
  0x95   : > { %v827_v46 = vpop.permute.xlu0 %826 }
  0x96   : > { %905 = vst.msk [vmem:[#allocation2 + $0x50] sm:$0xf] %vm886_vm7, %v827_v46  ;;  %v271_v46 = vrot.slane %v5220_v48, 7  ;;  %v5240_v54 = vsel %vm362_vm0, %v336_v30, %v352_v59  ;;  %v4494_v48 = vld [vmem:[%s7704_s1] sm:$0x30] }
  0x97   : > { %619 = vrot.lane.b32.xlu1 %v544_v3, %s4606_s24  ;;  %v648_v31 = vpop.permute.xlu2 %647  ;;  %v494_v3 = vpack.c.bf16 %v4856_v29, %v4856_v29  ;;  %v546_v29 = vpack.c.bf16 %v5207_v56, %v5207_v56  ;;  %v738_v33 = vpack.c.bf16 %v5240_v54, %v5240_v54  ;;  %v4114_v56 = vld [vmem:[%s7704_s1] sm:$0xf] }
  0x98   : > { %719 = vst.msk [vmem:[#allocation2 + $0x6c] sm:$0xf] %vm693_vm5, %v648_v31  ;;  %v5249_v41 = vsel %vm297_vm2, %v271_v46, %v287_v19  ;;  %v320_v7 = vsel %vm297_vm2, %v287_v19, %v271_v46  ;;  %v4115_v19 = vor.u32 %v4494_v48, %v4114_v56 }
  0x99   : > { %v829_v62 = vpop.permute.xlu1 %828  ;;  %v4503_v12 = vld [vmem:[#allocation2 + $0x48] sm:$0xff]  ;;  %528 = vst.msk [vmem:[#allocation2 + $0x74] sm:$0xf] %vm500_vm4, %v494_v3 }
  0x9a   : > { %906 = vst.msk [vmem:[#allocation2 + $0x54] sm:$0xf] %vm886_vm7, %v829_v62  ;;  %4040 = vmatmul.msk.bf16.vlgmr.msra.gmra.mxu2 %vm1085_vm8, %v4503_v12 }
  0x9b   : > { %812 = vrot.lane.b32.xlu0 %v737_v47, %s4607_s25  ;;  %v385_v47 = vsel %vm362_vm0, %v352_v59, %v336_v30  ;;  %v5265_v30 = vld [vmem:[%s4656_s23 + $0x78] sm:$0xff]  ;;  %v5268_v59 = vld [vmem:[%s4656_s23 + $0x70] sm:$0xff] }
  0x9c   : > { %v448_v15 = vsel %vm232_vm3, %v5249_v41, %v385_v47  ;;  %623 = vrot.lane.b32.xlu2 %v546_v29, %s4606_s24  ;;  %v353_v47 = vrot.slane %v5265_v30, 1  ;;  %v337_v39 = vrot.slane %v5268_v59, 1  ;;  %v548_v29 = vpack.c.bf16 %v5265_v30, %v5265_v30 }
  0x9d   : > { %v640_v27 = vpop.permute.xlu0 %639  ;;  %v739_v12 = vpack.c.bf16 %v448_v15, %v448_v15 }
  0x9e   : > { %715 = vst.msk [vmem:[#allocation2 + $0x5c] sm:$0xf] %vm693_vm5, %v640_v27  ;;  %v7710_v27 = vrot.slane %v5268_v59, 7  ;;  %v386_v15 = vsel %vm362_vm0, %v353_v47, %v337_v39 }
  0x9f   : > { %621 = vrot.lane.b32.xlu1 %v545_v20, %s4606_s24  ;;  %908 = vst.msk [vmem:[#allocation2 + $0x5c] sm:$0xf] %vm886_vm7, %v833_v11  ;;  %v328_v11 = vsel %vm297_vm2, %v295_v45, %v279_v40  ;;  %v7709_v20 = vrot.slane %v5265_v30, 7  ;;  %v650_v31 = vpop.permute.xlu2 %649  ;;  %v547_v45 = vpack.c.bf16 %v5268_v59, %v5268_v59 }
  0xa0   : > { %v427_v3 = vsel %vm229_vm1, %v4897_v55, %v328_v11  ;;  %720 = vst.msk [vmem:[#allocation2 + $0x70] sm:$0xf] %vm693_vm5, %v650_v31  ;;  %v5312_v11 = vld [vmem:[%s4656_s23 + $0x8] sm:$0xff] }
  0xa1   : > { %v831_v62 = vpop.permute.xlu1 %830  ;;  %v495_v34 = vpack.c.bf16 %v427_v3, %v427_v3  ;;  %v4504_v55 = vld [vmem:[#allocation2 + $0x50] sm:$0xff]  ;;  %v5322_v3 = vld [vmem:[%s4656_s23] sm:$0xff] }
  0xa2   : > { %907 = vst.msk [vmem:[#allocation2 + $0x58] sm:$0xf] %vm886_vm7, %v831_v62  ;;  %v5306_v62 = vsel %vm362_vm0, %v337_v39, %v353_v47  ;;  %v7712_v39 = vrot.slane %v5322_v3, 7 }
  0xa3   : > { %814 = vrot.lane.b32.xlu0 %v738_v33, %s4607_s25  ;;  %v5300_v33 = vsel %vm297_vm2, %v7710_v27, %v7709_v20  ;;  %529 = vst.msk [vmem:[#allocation2 + $0x78] sm:$0xf] %vm500_vm4, %v495_v34  ;;  %v740_v31 = vpack.c.bf16 %v5306_v62, %v5306_v62 }
  0xa4   : > { %625 = vrot.lane.b32.xlu2 %v547_v45, %s4606_s24  ;;  %v7711_v45 = vrot.slane %v5312_v11, 7 }
  0xa5   : > { %v642_v40 = vpop.permute.xlu0 %641 }
  0xa6   : > { %716 = vst.msk [vmem:[#allocation2 + $0x60] sm:$0xf] %vm693_vm5, %v642_v40  ;;  %v330_v40 = vrot.slane %v5322_v3, 1  ;;  %v5340_v27 = vsel %vm297_vm2, %v7712_v39, %v7711_v45 }
  0xa7   : > { %816 = vrot.lane.b32.xlu1 %v739_v12, %s4607_s25  ;;  %909 = vst.msk [vmem:[#allocation2 + $0x60] sm:$0xf] %vm886_vm7, %v835_v6  ;;  %v450_v12 = vsel %vm232_vm3, %v5300_v33, %v386_v15  ;;  %v845_v47 = vpop.permute.xlu2 %844 }
  0xa8   : > { %v741_v15 = vpack.c.bf16 %v450_v12, %v450_v12 }
  0xa9   : > { %v644_v6 = vpop.permute.xlu1 %643 }
  0xaa   : > { %717 = vst.msk [vmem:[#allocation2 + $0x64] sm:$0xf] %vm693_vm5, %v644_v6  ;;  %4041 = vmatmul.msk.bf16.gmra.mxu2 %vm1085_vm8, %v4504_v55  ;;  %v346_v6 = vrot.slane %v5312_v11, 1  ;;  %v533_v55 = vpack.c.bf16 %v5322_v3, %v5322_v3 }
  0xab   : > { %627 = vrot.lane.b32.xlu0 %v548_v29, %s4606_s24  ;;  %v496_v29 = vpack.c.bf16 %v4890_v52, %v4890_v52 }
  0xac   : > { %v379_v12 = vsel %vm362_vm0, %v346_v6, %v330_v40  ;;  %820 = vrot.lane.b32.xlu2 %v741_v15, %s4607_s25  ;;  %v5349_v52 = vsel %vm362_vm0, %v330_v40, %v346_v6  ;;  %v329_v40 = vsel %vm297_vm2, %v296_v10, %v280_v9  ;;  %v4505_v6 = vld [vmem:[#allocation2 + $0x58] sm:$0xff]  ;;  %v401_v9 = vsel %vm229_vm1, %v4982_v8, %v315_v60 }
  0xad   : > { %v837_v34 = vpop.permute.xlu0 %836  ;;  %530 = vst.msk [vmem:[#allocation2 + $0x7c] sm:$0xf] %vm500_vm4, %v496_v29  ;;  %v436_v45 = vsel %vm232_vm3, %v5340_v27, %v379_v12  ;;  %v726_v15 = vpack.c.bf16 %v5349_v52, %v5349_v52  ;;  %v429_v29 = vsel %vm229_vm1, %v4924_v18, %v329_v40  ;;  %v469_v10 = vpack.c.bf16 %v401_v9, %v401_v9 }
  0xae   : > { %910 = vst.msk [vmem:[#allocation2 + $0x64] sm:$0xf] %vm886_vm7, %v837_v34  ;;  %v316_v8 = vsel %vm297_vm2, %v283_v28, %v267_v24  ;;  %v405_v24 = vsel %vm229_vm1, %v5080_v16, %v317_v25  ;;  %v411_v60 = vsel %vm229_vm1, %v5240_v54, %v320_v7 }
  0xaf   : > { %818 = vrot.lane.b32.xlu1 %v740_v31, %s4607_s25  ;;  %v534_v31 = vpack.c.bf16 %v5312_v11, %v5312_v11  ;;  %v847_v34 = vpop.permute.xlu2 %846  ;;  %503 = vst.msk [vmem:[#allocation2 + $0x10] sm:$0xf] %vm500_vm4, %v469_v10  ;;  %v473_v28 = vpack.c.bf16 %v405_v24, %v405_v24  ;;  %v480_v10 = vpack.c.bf16 %v5249_v41, %v5249_v41  ;;  %v1361_v41 = vsel %vm1134_vm6, %v4115_v19, 0 }
  0xb0   : > { %1370 = vmatpush.bf16.msra.mxu1 %v1361_v41  ;;  %4581 = vmatpush.bf16.msra.mxu3 %v1361_v41 }
  0xb1   : > { %v646_v20 = vpop.permute.xlu1 %645  ;;  %507 = vst.msk [vmem:[#allocation2 + $0x20] sm:$0xf] %vm500_vm4, %v473_v28 }
  0xb2   : > { %718 = vst.msk [vmem:[#allocation2 + $0x68] sm:$0xf] %vm693_vm5, %v646_v20  ;;  %v498_v20 = vpack.c.bf16 %v4932_v21, %v4932_v21  ;;  %v470_v21 = vpack.c.bf16 %v4970_v61, %v4970_v61 }
  0xb3   : > { %597 = vrot.lane.b32.xlu0 %v533_v55, %s4606_s24  ;;  %v727_v55 = vpack.c.bf16 %v436_v45, %v436_v45  ;;  %514 = vst.msk [vmem:[#allocation2 + $0x3c] sm:$0xf] %vm500_vm4, %v480_v10  ;;  %v4489_v10 = vld [vmem:[#allocation2 + $0x58] sm:$0xff] }
  0xb4   : > { %532 = vst.msk [vmem:[#allocation2 + $0x84] sm:$0xf] %vm500_vm4, %v498_v20  ;;  %790 = vrot.lane.b32.xlu2 %v726_v15, %s4607_s25 }
  0xb5   : > { %v839_v39 = vpop.permute.xlu0 %838  ;;  %504 = vst.msk [vmem:[#allocation2 + $0x14] sm:$0xf] %vm500_vm4, %v470_v21  ;;  %v4506_v51 = vld [vmem:[#allocation2 + $0x60] sm:$0xff] }
  0xb6   : > { %911 = vst.msk [vmem:[#allocation2 + $0x68] sm:$0xf] %vm886_vm7, %v839_v39  ;;  %v497_v39 = vpack.c.bf16 %v429_v29, %v429_v29  ;;  %v4490_v19 = vld [vmem:[#allocation2 + $0x60] sm:$0xff] }
  0xb7   : > { %599 = vrot.lane.b32.xlu1 %v534_v31, %s4606_s24  ;;  %v660_v0 = vpop.permute.xlu2 %659  ;;  %v403_v31 = vsel %vm229_vm1, %v5027_v58, %v316_v8  ;;  %v474_v58 = vpack.c.bf16 %v5089_v26, %v5089_v26  ;;  %v318_v26 = vsel %vm297_vm2, %v285_v35, %v269_v43  ;;  %v409_v43 = vsel %vm229_vm1, %v5197_v2, %v319_v13 }
  0xb8   : > { %531 = vst.msk [vmem:[#allocation2 + $0x80] sm:$0xf] %vm500_vm4, %v497_v39  ;;  %v407_v40 = vsel %vm229_vm1, %v5146_v14, %v318_v26  ;;  %v477_v14 = vpack.c.bf16 %v409_v43, %v409_v43 }
  0xb9   : > { %v841_v12 = vpop.permute.xlu1 %840  ;;  %725 = vst.msk [vmem:[#allocation2 + $0x84] sm:$0xf] %vm693_vm5, %v660_v0  ;;  %v479_v0 = vpack.c.bf16 %v411_v60, %v411_v60 }
  0xba   : > { %912 = vst.msk [vmem:[#allocation2 + $0x6c] sm:$0xf] %vm886_vm7, %v841_v12  ;;  %4042 = vmatmul.msk.bf16.gmra.mxu2 %vm1085_vm8, %v4505_v6  ;;  %v476_v6 = vpack.c.bf16 %v5138_v50, %v5138_v50 }
  0xbb   : > { %792 = vrot.lane.b32.xlu0 %v727_v55, %s4607_s25  ;;  %508 = vst.msk [vmem:[#allocation2 + $0x24] sm:$0xf] %vm500_vm4, %v474_v58  ;;  %v475_v55 = vpack.c.bf16 %v407_v40, %v407_v40 }
  0xbc   : > { %510 = vst.msk [vmem:[#allocation2 + $0x2c] sm:$0xf] %vm500_vm4, %v476_v6 }
  0xbd   : > { %v652_v18 = vpop.permute.xlu0 %651  ;;  %509 = vst.msk [vmem:[#allocation2 + $0x28] sm:$0xf] %vm500_vm4, %v475_v55 }
  0xbe   : > { %721 = vst.msk [vmem:[#allocation2 + $0x74] sm:$0xf] %vm693_vm5, %v652_v18 }
  0xbf   : > { %914 = vst.msk [vmem:[#allocation2 + $0x74] sm:$0xf] %vm886_vm7, %v845_v47  ;;  %v602_v42 = vpop.permute.xlu2 %601  ;;  %v472_v47 = vpack.c.bf16 %v5019_v57, %v5019_v57 }
  0xc0   : > { %696 = vst.msk [vmem:[#allocation2 + $0x10] sm:$0xf] %vm693_vm5, %v602_v42  ;;  %v7725_v42 = vrot.slane %v5268_v59, 7 }
  0xc1   : > { %v843_v38 = vpop.permute.xlu1 %842  ;;  %506 = vst.msk [vmem:[#allocation2 + $0x1c] sm:$0xf] %vm500_vm4, %v472_v47  ;;  %v4507_v5 = vld [vmem:[#allocation2 + $0x68] sm:$0xff]  ;;  %v482_v47 = vpack.c.bf16 %v5300_v33, %v5300_v33  ;;  %v7727_v33 = vrot.slane %v5322_v3, 7 }
  0xc2   : > { %913 = vst.msk [vmem:[#allocation2 + $0x70] sm:$0xf] %vm886_vm7, %v843_v38 }
  0xc3   : > { %511 = vst.msk [vmem:[#allocation2 + $0x30] sm:$0xf] %vm500_vm4, %v477_v14  ;;  %v4487_v14 = vld [vmem:[#allocation2 + $0x48] sm:$0xff] }
  0xc4   : > { %513 = vst.msk [vmem:[#allocation2 + $0x38] sm:$0xf] %vm500_vm4, %v479_v0 }
  0xc5   : > { %v654_v49 = vpop.permute.xlu0 %653  ;;  %516 = vst.msk [vmem:[#allocation2 + $0x44] sm:$0xf] %vm500_vm4, %v482_v47 }
  0xc6   : > { %722 = vst.msk [vmem:[#allocation2 + $0x78] sm:$0xf] %vm693_vm5, %v654_v49  ;;  %v7726_v49 = vrot.slane %v5265_v30, 7 }
  0xc7   : > { %915 = vst.msk [vmem:[#allocation2 + $0x78] sm:$0xf] %vm886_vm7, %v847_v34  ;;  %v797_v45 = vpop.permute.xlu2 %796  ;;  %v471_v34 = vpack.c.bf16 %v403_v31, %v403_v31 }
  0xc9   : > { %v656_v61 = vpop.permute.xlu1 %655  ;;  %505 = vst.msk [vmem:[#allocation2 + $0x18] sm:$0xf] %vm500_vm4, %v471_v34  ;;  %v4508_v36 = vld [vmem:[#allocation2 + $0x70] sm:$0xff]  ;;  %v7728_v34 = vrot.slane %v5312_v11, 7  ;;  %v468_v11 = vpack.c.bf16 %v5340_v27, %v5340_v27 }
  0xca   : > { %723 = vst.msk [vmem:[#allocation2 + $0x7c] sm:$0xf] %vm693_vm5, %v656_v61  ;;  %4043 = vmatmul.msk.bf16.gmra.mxu2 %vm1085_vm8, %v4506_v51  ;;  %v321_v51 = vsel %vm297_vm2, %v7726_v49, %v7725_v42  ;;  %v4491_v49 = vld [vmem:[#allocation2 + $0x68] sm:$0xff] }
  0xcb   : > { %v413_v8 = vsel %vm229_vm1, %v5306_v62, %v321_v51  ;;  %502 = vst.msk [vmem:[#allocation2 + $0xc] sm:$0xf] %vm500_vm4, %v468_v11  ;;  %v4521_v11 = vld [vmem:[#allocation2 + $0x58] sm:$0xff] }
  0xcc   : > { %v481_v59 = vpack.c.bf16 %v413_v8, %v413_v8 }
  0xcd   : > { %v849_v23 = vpop.permute.xlu0 %848 }
  0xce   : > { %v926_v15 = vld [vmem:[#allocation2 + $0x78] sm:$0xf]  ;;  %916 = vst.msk [vmem:[#allocation2 + $0x7c] sm:$0xf] %vm886_vm7, %v849_v23  ;;  %v314_v23 = vsel %vm297_vm2, %v7728_v34, %v7727_v33 }
  0xcf   : > { %929 = vst.msk [vmem:[#allocation2 + $0x88] sm:$0xf] %vm922_vm9, %v926_v15  ;;  %v799_v37 = vpop.permute.xlu2 %798  ;;  %v399_v15 = vsel %vm229_vm1, %v5349_v52, %v314_v23 }
  0xd0   : > { %515 = vst.msk [vmem:[#allocation2 + $0x40] sm:$0xf] %vm500_vm4, %v481_v59  ;;  %v467_v24 = vpack.c.bf16 %v399_v15, %v399_v15  ;;  %v4520_v15 = vld [vmem:[#allocation2 + $0x50] sm:$0xff] }
  0xd1   : > { %v658_v57 = vpop.permute.xlu1 %657 }
  0xd2   : > { %724 = vst.msk [vmem:[#allocation2 + $0x80] sm:$0xf] %vm693_vm5, %v658_v57 }
  0xd3   : > { %501 = vst.msk [vmem:[#allocation2 + $0x8] sm:$0xf] %vm500_vm4, %v467_v24 }
  0xd5   : > { %v927_v22 = vld [vmem:[#allocation2 + $0x7c] sm:$0xf]  ;;  %v851_v63 = vpop.permute.xlu0 %850 }
  0xd6   : > { %930 = vst.msk [vmem:[#allocation2 + $0x8c] sm:$0xf] %vm922_vm9, %v927_v22  ;;  %v4509_v54 = vld [vmem:[#allocation2 + $0x78] sm:$0xff] }
  0xd7   : > { %917 = vst.msk [vmem:[#allocation2 + $0x80] sm:$0xf] %vm886_vm7, %v851_v63  ;;  %v612_v20 = vpop.permute.xlu2 %611  ;;  %v4493_v23 = vld [vmem:[#allocation2 + $0x78] sm:$0xff] }
  0xd8   : > { %701 = vst.msk [vmem:[#allocation2 + $0x24] sm:$0xf] %vm693_vm5, %v612_v20 }
  0xd9   : > { %v853_v16 = vpop.permute.xlu1 %852 }
  0xda   : > { %918 = vst.msk [vmem:[#allocation2 + $0x84] sm:$0xf] %vm886_vm7, %v853_v16  ;;  %4044 = vmatmul.msk.bf16.gmra.mxu2 %vm1085_vm8, %v4507_v5 }
  0xdd   : > { %v604_v29 = vpop.permute.xlu0 %603 }
  0xde   : > { %697 = vst.msk [vmem:[#allocation2 + $0x14] sm:$0xf] %vm693_vm5, %v604_v29 }
  0xdf   : > { %890 = vst.msk [vmem:[#allocation2 + $0x14] sm:$0xf] %vm886_vm7, %v797_v45  ;;  %v614_v35 = vpop.permute.xlu2 %613 }
  0xe0   : > { %702 = vst.msk [vmem:[#allocation2 + $0x28] sm:$0xf] %vm693_vm5, %v614_v35 }
  0xe1   : > { %v795_v32 = vpop.permute.xlu1 %794  ;;  %v4510_v25 = vld [vmem:[#allocation2 + $0x80] sm:$0xff] }
  0xe2   : > { %889 = vst.msk [vmem:[#allocation2 + $0x10] sm:$0xf] %vm886_vm7, %v795_v32 }
  0xe5   : > { %v606_v50 = vpop.permute.xlu0 %605 }
  0xe6   : > { %v921_v39 = vld [vmem:[#allocation2 + $0x14] sm:$0xf]  ;;  %698 = vst.msk [vmem:[#allocation2 + $0x18] sm:$0xf] %vm693_vm5, %v606_v50 }
  0xe7   : > { %924 = vst.msk [vmem:[#allocation2 + $0x4] sm:$0xf] %vm922_vm9, %v921_v39  ;;  %v809_v2 = vpop.permute.xlu2 %808 }
  0xe8   : > { %891 = vst.msk [vmem:[#allocation2 + $0x18] sm:$0xf] %vm886_vm7, %v799_v37 }
  0xe9   : > { %v920_v17 = vld [vmem:[#allocation2 + $0x10] sm:$0xf]  ;;  %v608_v44 = vpop.permute.xlu1 %607 }
  0xea   : > { %923 = vst.msk [vmem:[#allocation2] sm:$0xf] %vm922_vm9, %v920_v17  ;;  %4045 = vmatmul.msk.bf16.gmra.mxu2 %vm1085_vm8, %v4508_v36  ;;  %v4512_v58 = vld [vmem:[#allocation2 + $0x10] sm:$0xff] }
  0xeb   : > { %699 = vst.msk [vmem:[#allocation2 + $0x1c] sm:$0xf] %vm693_vm5, %v608_v44  ;;  %v4496_v36 = vld [vmem:[#allocation2 + $0x10] sm:$0xff] }
  0xec   : > { %v4480_v53 = vld [vmem:[#allocation2 + $0x10] sm:$0xff] }
  0xed   : > { %v801_v12 = vpop.permute.xlu0 %800 }
  0xee   : > { %892 = vst.msk [vmem:[#allocation2 + $0x1c] sm:$0xf] %vm886_vm7, %v801_v12 }
  0xef   : > { %v811_v18 = vpop.permute.xlu2 %810 }
  0xf1   : > { %v610_v9 = vpop.permute.xlu1 %609  ;;  %v4478_v38 = vld [vmem:[#allocation2] sm:$0xff] }
  0xf2   : > { %700 = vst.msk [vmem:[#allocation2 + $0x20] sm:$0xf] %vm693_vm5, %v610_v9  ;;  %4116 = vmatmul.msk.bf16.vlgmr.msra.gmra.mxu1 %vm1085_vm8, %v4478_v38 }
  0xf5   : > { %v803_v46 = vpop.permute.xlu0 %802  ;;  %v4513_v40 = vld [vmem:[#allocation2 + $0x18] sm:$0xff] }
  0xf6   : > { %893 = vst.msk [vmem:[#allocation2 + $0x20] sm:$0xf] %vm886_vm7, %v803_v46  ;;  %v4497_v7 = vld [vmem:[#allocation2 + $0x18] sm:$0xff] }
  0xf7   : > { %v624_v61 = vpop.permute.xlu2 %623  ;;  %v4481_v60 = vld [vmem:[#allocation2 + $0x18] sm:$0xff] }
  0xf8   : > { %707 = vst.msk [vmem:[#allocation2 + $0x3c] sm:$0xf] %vm693_vm5, %v624_v61 }
  0xf9   : > { %v805_v21 = vpop.permute.xlu1 %804 }
  0xfa   : > { %894 = vst.msk [vmem:[#allocation2 + $0x24] sm:$0xf] %vm886_vm7, %v805_v21  ;;  %4046 = vmatmul.msk.bf16.gmra.mxu2 %vm1085_vm8, %v4509_v54 }
  0xfd   : > { %v616_v45 = vpop.permute.xlu0 %615 }
  0xfe   : > { %703 = vst.msk [vmem:[#allocation2 + $0x2c] sm:$0xf] %vm693_vm5, %v616_v45  ;;  %v4492_v45 = vld [vmem:[#allocation2 + $0x70] sm:$0xff] }
  0xff   : > { %896 = vst.msk [vmem:[#allocation2 + $0x2c] sm:$0xf] %vm886_vm7, %v809_v2  ;;  %v626_v62 = vpop.permute.xlu2 %625  ;;  %v4488_v2 = vld [vmem:[#allocation2 + $0x50] sm:$0xff] }
 0x100   : > { %708 = vst.msk [vmem:[#allocation2 + $0x40] sm:$0xf] %vm693_vm5, %v626_v62 }
 0x101   : > { %v807_v30 = vpop.permute.xlu1 %806  ;;  %v4514_v50 = vld [vmem:[#allocation2 + $0x20] sm:$0xff] }
 0x102   : > { %895 = vst.msk [vmem:[#allocation2 + $0x28] sm:$0xf] %vm886_vm7, %v807_v30  ;;  %v4498_v56 = vld [vmem:[#allocation2 + $0x20] sm:$0xff]  ;;  %v4519_v30 = vld [vmem:[#allocation2 + $0x48] sm:$0xff] }
 0x103   : > { %v4482_v48 = vld [vmem:[#allocation2 + $0x20] sm:$0xff] }
 0x105   : > { %v618_v31 = vpop.permute.xlu0 %617 }
 0x106   : > { %704 = vst.msk [vmem:[#allocation2 + $0x30] sm:$0xf] %vm693_vm5, %v618_v31 }
 0x107   : > { %897 = vst.msk [vmem:[#allocation2 + $0x30] sm:$0xf] %vm886_vm7, %v811_v18  ;;  %v821_v22 = vpop.permute.xlu2 %820 }
 0x109   : > { %v620_v28 = vpop.permute.xlu1 %619  ;;  %v4515_v44 = vld [vmem:[#allocation2 + $0x28] sm:$0xff] }
 0x10a   : > { %705 = vst.msk [vmem:[#allocation2 + $0x34] sm:$0xf] %vm693_vm5, %v620_v28  ;;  %4047 = vmatmul.msk.bf16.gmra.mxu2 %vm1085_vm8, %v4510_v25  ;;  %v4499_v21 = vld [vmem:[#allocation2 + $0x28] sm:$0xff] }
 0x10b   : > { %v4483_v38 = vld [vmem:[#allocation2 + $0x28] sm:$0xff] }
 0x10d   : > { %v813_v3 = vpop.permute.xlu0 %812 }
 0x10e   : > { %898 = vst.msk [vmem:[#allocation2 + $0x34] sm:$0xf] %vm886_vm7, %v813_v3 }
 0x10f   : > { %v791_v16 = vpop.permute.xlu2 %790 }
 0x111   : > { %v622_v52 = vpop.permute.xlu1 %621 }
 0x112   : > { %706 = vst.msk [vmem:[#allocation2 + $0x38] sm:$0xf] %vm693_vm5, %v622_v52 }
 0x115   : > { %v815_v57 = vpop.permute.xlu0 %814  ;;  %v4516_v9 = vld [vmem:[#allocation2 + $0x30] sm:$0xff] }
 0x116   : > { %899 = vst.msk [vmem:[#allocation2 + $0x38] sm:$0xf] %vm886_vm7, %v815_v57  ;;  %v4500_v8 = vld [vmem:[#allocation2 + $0x30] sm:$0xff] }
 0x117   : > { %v4484_v47 = vld [vmem:[#allocation2 + $0x30] sm:$0xff] }
 0x119   : > { %v817_v37 = vpop.permute.xlu1 %816 }
 0x11a   : > { %900 = vst.msk [vmem:[#allocation2 + $0x3c] sm:$0xf] %vm886_vm7, %v817_v37  ;;  %4202 = vmatmul.msk.bf16.vlgmr.msrb.gmra.mxu2 %vm1085_vm8, %v4512_v58 }
 0x11d   : > { %v628_v63 = vpop.permute.xlu0 %627  ;;  %v5537_v27 = vpop.f32.mrf.mxu2 }
 0x11e   : > { %709 = vst.msk [vmem:[#allocation2 + $0x44] sm:$0xf] %vm693_vm5, %v628_v63 }
 0x11f   : > { %902 = vst.msk [vmem:[#allocation2 + $0x44] sm:$0xf] %vm886_vm7, %v821_v22 }
 0x121   : > { %v819_v5 = vpop.permute.xlu1 %818  ;;  %v4517_v54 = vld [vmem:[#allocation2 + $0x38] sm:$0xff] }
 0x122   : > { %901 = vst.msk [vmem:[#allocation2 + $0x40] sm:$0xf] %vm886_vm7, %v819_v5  ;;  %v4501_v31 = vld [vmem:[#allocation2 + $0x38] sm:$0xff]  ;;  %v4522_v5 = vld [vmem:[#allocation2 + $0x60] sm:$0xff] }
 0x123   : > { %v4485_v33 = vld [vmem:[#allocation2 + $0x38] sm:$0xff] }
 0x125   : > { %v598_v26 = vpop.permute.xlu0 %597  ;;  %v5542_v20 = vpop.f32.mrf.mxu2 }
 0x126   : > { %694 = vst.msk [vmem:[#allocation2 + $0x8] sm:$0xf] %vm693_vm5, %v598_v26 }
 0x127   : > { %887 = vst.msk [vmem:[#allocation2 + $0x8] sm:$0xf] %vm886_vm7, %v791_v16 }
 0x129   : > { %v4486_v6 = vld [vmem:[#allocation2 + $0x40] sm:$0xff]  ;;  %v600_v55 = vpop.permute.xlu1 %599 }
 0x12a   : > { %695 = vst.msk [vmem:[#allocation2 + $0xc] sm:$0xf] %vm693_vm5, %v600_v55  ;;  %4124 = vmatmul.msk.bf16.vlgmr.msra.gmra.mxu3 %vm1085_vm8, %v4486_v6  ;;  %4203 = vmatmul.msk.bf16.gmra.mxu2 %vm1085_vm8, %v4513_v40  ;;  %v4518_v51 = vld [vmem:[#allocation2 + $0x40] sm:$0xff] }
 0x12b   : > { %v4502_v24 = vld [vmem:[#allocation2 + $0x40] sm:$0xff] }
 0x12d   : > { %v793_v29 = vpop.permute.xlu0 %792  ;;  %v5549_v32 = vpop.f32.mrf.mxu2 }
 0x12e   : > { %888 = vst.msk [vmem:[#allocation2 + $0xc] sm:$0xf] %vm886_vm7, %v793_v29 }
 0x135   : > { %v4495_v13 = vld [vmem:[#allocation2 + $0x8] sm:$0xff]  ;;  %v5551_v43 = vpop.f32.mrf.mxu2 }
 0x136   : > { %v4479_v35 = vld [vmem:[#allocation2 + $0x8] sm:$0xff]  ;;  %4032 = vmatmul.msk.bf16.vlgmr.msra.gmra.mxu0 %vm1085_vm8, %v4495_v13 }
 0x137   : > { %4117 = vmatmul.msk.bf16.gmra.mxu1 %vm1085_vm8, %v4479_v35  ;;  %v4523_v35 = vld [vmem:[#allocation2 + $0x68] sm:$0xff] }
 0x13a   : > { %4125 = vmatmul.msk.bf16.gmra.mxu3 %vm1085_vm8, %v4487_v14  ;;  %4204 = vmatmul.msk.bf16.gmra.mxu2 %vm1085_vm8, %v4514_v50 }
 0x13d   : > { %v5557_v39 = vpop.f32.mrf.mxu2 }
 0x145   : > { %v5559_v17 = vpop.f32.mrf.mxu2 }
 0x146   : > { %4033 = vmatmul.msk.bf16.gmra.mxu0 %vm1085_vm8, %v4496_v36 }
 0x147   : > { %4118 = vmatmul.msk.bf16.gmra.mxu1 %vm1085_vm8, %v4480_v53 }
 0x14a   : > { %4126 = vmatmul.msk.bf16.gmra.mxu3 %vm1085_vm8, %v4488_v2  ;;  %4205 = vmatmul.msk.bf16.gmra.mxu2 %vm1085_vm8, %v4515_v44 }
 0x14d   : > { %v5565_v12 = vpop.f32.mrf.mxu2 }
 0x155   : > { %v5567_v0 = vpop.f32.mrf.mxu2 }
 0x156   : > { %4034 = vmatmul.msk.bf16.gmra.mxu0 %vm1085_vm8, %v4497_v7 }
 0x157   : > { %4119 = vmatmul.msk.bf16.gmra.mxu1 %vm1085_vm8, %v4481_v60 }
 0x15a   : > { %4127 = vmatmul.msk.bf16.gmra.mxu3 %vm1085_vm8, %v4489_v10  ;;  %4206 = vmatmul.msk.bf16.gmra.mxu2 %vm1085_vm8, %v4516_v9  ;;  %v4524_v9 = vld [vmem:[#allocation2 + $0x70] sm:$0xff] }
 0x15d   : > { %v5573_v18 = vpop.f32.mrf.mxu2 }
 0x165   : > { %v5575_v46 = vpop.f32.mrf.mxu2 }
 0x166   : > { %4035 = vmatmul.msk.bf16.gmra.mxu0 %vm1085_vm8, %v4498_v56 }
 0x167   : > { %4120 = vmatmul.msk.bf16.gmra.mxu1 %vm1085_vm8, %v4482_v48  ;;  %v4525_v48 = vld [vmem:[#allocation2 + $0x78] sm:$0xff] }
 0x16a   : > { %4128 = vmatmul.msk.bf16.gmra.mxu3 %vm1085_vm8, %v4490_v19  ;;  %4207 = vmatmul.msk.bf16.gmra.mxu2 %vm1085_vm8, %v4517_v54 }
 0x16d   : > { %v5581_v41 = vpop.f32.mrf.mxu2 }
 0x16e   : > { %7729 = vst [vmem:[#allocation5_spill] sm:$0xff] %v5581_v41 }
 0x16f   : > { %v1372_v3 = vpop.f32.mrf.mxu1 }
 0x175   : > { %v5583_v42 = vpop.f32.mrf.mxu2 }
 0x176   : > { %7730 = vst [vmem:[#allocation6_spill] sm:$0xff] %v5583_v42  ;;  %4036 = vmatmul.msk.bf16.gmra.mxu0 %vm1085_vm8, %v4499_v21  ;;  %v4526_v21 = vld [vmem:[#allocation2 + $0x80] sm:$0xff] }
 0x177   : > { %4121 = vmatmul.msk.bf16.gmra.mxu1 %vm1085_vm8, %v4483_v38  ;;  %v5613_v63 = vpop.f32.mrf.mxu1 }
 0x17a   : > { %4129 = vmatmul.msk.bf16.gmra.mxu3 %vm1085_vm8, %v4491_v49  ;;  %4208 = vmatmul.msk.bf16.gmra.mxu2 %vm1085_vm8, %v4518_v51 }
 0x17d   : > { %v5589_v61 = vpop.f32.mrf.mxu2 }
 0x17e   : > { %7731 = vst [vmem:[#allocation7_spill] sm:$0xff] %v5589_v61 }
 0x185   : > { %v5591_v59 = vpop.f32.mrf.mxu2 }
 0x186   : > { %7732 = vst [vmem:[#allocation8_spill] sm:$0xff] %v5591_v59  ;;  %4037 = vmatmul.msk.bf16.gmra.mxu0 %vm1085_vm8, %v4500_v8 }
 0x187   : > { %4122 = vmatmul.msk.bf16.gmra.mxu1 %vm1085_vm8, %v4484_v47 }
 0x18a   : > { %4130 = vmatmul.msk.bf16.gmra.mxu3 %vm1085_vm8, %v4492_v45  ;;  %4209 = vmatmul.msk.bf16.gmra.mxu2 %vm1085_vm8, %v4519_v30 }
 0x18d   : > { %v5597_v62 = vpop.f32.mrf.mxu2 }
 0x18e   : > { %7733 = vst [vmem:[#allocation9_spill] sm:$0xff] %v5597_v62 }
 0x195   : > { %v5599_v34 = vpop.f32.mrf.mxu2 }
 0x196   : > { %7734 = vst [vmem:[#allocation10_spill] sm:$0xff] %v5599_v34  ;;  %4038 = vmatmul.msk.bf16.gmra.mxu0 %vm1085_vm8, %v4501_v31  ;;  %v4527_v31 = vld [vmem:[#allocation2 + $0x88] sm:$0xff] }
 0x197   : > { %4123 = vmatmul.msk.bf16.gmra.mxu1 %vm1085_vm8, %v4485_v33 }
 0x19a   : > { %4131 = vmatmul.msk.bf16.gmra.mxu3 %vm1085_vm8, %v4493_v23  ;;  %4210 = vmatmul.msk.bf16.gmra.mxu2 %vm1085_vm8, %v4520_v15 }
 0x19d   : > { %v1632_v25 = vpop.f32.mrf.mxu2 }
 0x1a5   : > { %v5605_v28 = vpop.f32.mrf.mxu2 }
 0x1a6   : > { %4039 = vmatmul.msk.bf16.gmra.mxu0 %vm1085_vm8, %v4502_v24 }
 0x1aa   : > { %4211 = vmatmul.msk.bf16.gmra.mxu2 %vm1085_vm8, %v4521_v11 }
 0x1ad   : > { %v1637_v52 = vpop.f32.mrf.mxu2  ;;  %v1412_v38 = vpop.f32.mrf.mxu3 }
 0x1b3   : > { %v1147_v57 = vpop.f32.mrf.mxu0 }
 0x1b4   : > { %v1373_v58 = vadd.f32 %v1372_v3, %v1147_v57  ;;  %v1377_v40 = vpop.f32.mrf.mxu1  ;;  %v1413_v57 = vadd.f32 %v1412_v38, %v5537_v27 }
 0x1b5   : > { %v5609_v37 = vpop.f32.mrf.mxu2  ;;  %v5644_v47 = vpop.f32.mrf.mxu3 }
 0x1b6   : > { %v5611_v22 = vadd.f32 %v1632_v25, %v1373_v58 }
 0x1ba   : > { %4212 = vmatmul.msk.bf16.gmra.mxu2 %vm1085_vm8, %v4522_v5 }
 0x1bb   : > { %v5616_v16 = vpop.f32.mrf.mxu0 }
 0x1bc   : > { %v5622_v50 = vpop.f32.mrf.mxu1 }
 0x1bd   : > { %v1642_v26 = vpop.f32.mrf.mxu2  ;;  %v1417_v15 = vpop.f32.mrf.mxu3 }
 0x1c3   : > { %v1152_v6 = vpop.f32.mrf.mxu0 }
 0x1c4   : > { %v1378_v55 = vadd.f32 %v1377_v40, %v1152_v6  ;;  %v1382_v53 = vpop.f32.mrf.mxu1 }
 0x1c5   : > { %v5618_v29 = vpop.f32.mrf.mxu2  ;;  %v5653_v3 = vpop.f32.mrf.mxu3 }
 0x1c6   : > { %v5620_v13 = vadd.f32 %v1637_v52, %v1378_v55 }
 0x1ca   : > { %4213 = vmatmul.msk.bf16.gmra.mxu2 %vm1085_vm8, %v4523_v35 }
 0x1cb   : > { %v1154_v14 = vpop.f32.mrf.mxu0 }
 0x1cc   : > { %v1384_v8 = vpop.f32.mrf.mxu1  ;;  %v1380_v61 = vadd.f32 %v5622_v50, %v1154_v14 }
 0x1cd   : > { %v5625_v36 = vpop.f32.mrf.mxu2  ;;  %v1422_v40 = vpop.f32.mrf.mxu3 }
 0x1d3   : > { %v1157_v44 = vpop.f32.mrf.mxu0 }
 0x1d4   : > { %v1383_v2 = vadd.f32 %v1382_v53, %v1157_v44  ;;  %v1387_v33 = vpop.f32.mrf.mxu1  ;;  %v1418_v53 = vadd.f32 %v1417_v15, %v5549_v32 }
 0x1d5   : > { %v5627_v7 = vpop.f32.mrf.mxu2  ;;  %v5661_v44 = vpop.f32.mrf.mxu3 }
 0x1d6   : > { %v5629_v60 = vadd.f32 %v1642_v26, %v1383_v2 }
 0x1da   : > { %4214 = vmatmul.msk.bf16.gmra.mxu2 %vm1085_vm8, %v4524_v9 }
 0x1db   : > { %v1159_v49 = vpop.f32.mrf.mxu0 }
 0x1dc   : > { %v1389_v24 = vpop.f32.mrf.mxu1 }
 0x1dd   : > { %v5632_v10 = vpop.f32.mrf.mxu2  ;;  %v5667_v27 = vpop.f32.mrf.mxu3 }
 0x1e3   : > { %v1162_v30 = vpop.f32.mrf.mxu0 }
 0x1e4   : > { %v1392_v58 = vpop.f32.mrf.mxu1  ;;  %v1388_v14 = vadd.f32 %v1387_v33, %v1162_v30 }
 0x1e5   : > { %v5634_v56 = vpop.f32.mrf.mxu2  ;;  %v5672_v34 = vpop.f32.mrf.mxu3 }
 0x1e6   : > { %v1718_v30 = vadd.f32 %v5625_v36, %v1388_v14 }
 0x1ea   : > { %4215 = vmatmul.msk.bf16.gmra.mxu2 %vm1085_vm8, %v4525_v48 }
 0x1eb   : > { %v1164_v25 = vpop.f32.mrf.mxu0 }
 0x1ec   : > { %v1394_v35 = vpop.f32.mrf.mxu1 }
 0x1ed   : > { %v5637_v19 = vpop.f32.mrf.mxu2 }
 0x1f3   : > { %v1167_v52 = vpop.f32.mrf.mxu0 }
 0x1f4   : > { %v1393_v33 = vadd.f32 %v1392_v58, %v1167_v52 }
 0x1f5   : > { %v5639_v54 = vpop.f32.mrf.mxu2 }
 0x1f6   : > { %v1720_v36 = vadd.f32 %v5632_v10, %v1393_v33 }
 0x1fa   : > { %4216 = vmatmul.msk.bf16.gmra.mxu2 %vm1085_vm8, %v4526_v21  ;;  %v1397_v21 = vpop.f32.mrf.mxu1 }
 0x1fb   : > { %v1169_v6 = vpop.f32.mrf.mxu0 }
 0x1fd   : > { %v5642_v51 = vpop.f32.mrf.mxu2 }
 0x203   : > { %v1172_v48 = vpop.f32.mrf.mxu0 }
 0x204   : > { %v1398_v52 = vadd.f32 %v1397_v21, %v1172_v48 }
 0x205   : > { %v5646_v45 = vpop.f32.mrf.mxu2 }
 0x206   : > { %v1722_v10 = vadd.f32 %v5637_v19, %v1398_v52 }
 0x20a   : > { %4217 = vmatmul.msk.bf16.gmra.mxu2 %vm1085_vm8, %v4527_v31 }
 0x20b   : > { %v1174_v38 = vpop.f32.mrf.mxu0 }
 0x20d   : > { %v5649_v23 = vpop.f32.mrf.mxu2 }
 0x213   : > { %v1177_v32 = vpop.f32.mrf.mxu0 }
 0x215   : > { %v5651_v11 = vpop.f32.mrf.mxu2 }
 0x21d   : > { %v1672_v5 = vpop.f32.mrf.mxu2 }
 0x21e   : > { %v5656_v26 = vadd.f32 %v1672_v5, %v1413_v57  ;;  %v1399_v57 = vpop.f32.mrf.mxu1  ;;  %v1423_v5 = vadd.f32 %v1422_v40, %v5557_v39  ;;  %v1179_v39 = vpop.f32.mrf.mxu0 }
 0x225   : > { %v5658_v55 = vpop.f32.mrf.mxu2 }
 0x226   : > { %v1402_v15 = vpop.f32.mrf.mxu1 }
 0x227   : > { %v1403_v48 = vadd.f32 %v1402_v15, %v1177_v32 }
 0x229   : > { %v1724_v32 = vadd.f32 %v5642_v51, %v1403_v48 }
 0x22d   : > { %v1677_v2 = vpop.f32.mrf.mxu2 }
 0x22e   : > { %v5663_v9 = vadd.f32 %v1677_v2, %v1418_v53  ;;  %v1375_v53 = vadd.f32 %v5613_v63, %v5616_v16  ;;  %v5678_v2 = vpop.f32.mrf.mxu3  ;;  %v1715_v63 = vadd.f32 %v5609_v37, %v1380_v61  ;;  %v1385_v16 = vadd.f32 %v1384_v8, %v1159_v49 }
 0x22f   : > { %v1390_v61 = vadd.f32 %v1389_v24, %v1164_v25 }
 0x230   : > { %v1713_v59 = vadd.f32 %v5605_v28, %v1375_v53 }
 0x235   : > { %v5665_v31 = vpop.f32.mrf.mxu2 }
 0x23d   : > { %v1682_v4 = vpop.f32.mrf.mxu2 }
 0x23e   : > { %v5670_v1 = vadd.f32 %v1682_v4, %v1423_v5  ;;  %v5685_v4 = vld [vmem:[%s7705_s2] ss:$0 sm:$0xff]  ;;  %v1404_v5 = vpop.f32.mrf.mxu1 }
 0x23f   : > { %v5690_v42 = vadd.f32 %v5685_v4, %v1713_v59  ;;  %v5695_v28 = vadd.f32 %v5685_v4, %v5611_v22  ;;  %v5699_v50 = vadd.f32 %v5685_v4, %v5620_v13  ;;  %v5704_v41 = vadd.f32 %v5685_v4, %v1715_v63  ;;  %v5709_v22 = vpop.f32.mrf.mxu3 }
 0x240   : > { %v1717_v59 = vadd.f32 %v5618_v29, %v1385_v16  ;;  %7738 = vst [vmem:[#allocation14_spill] sm:$0xff] %v5709_v22  ;;  %v5717_v8 = vadd.f32 %v5685_v4, %v5629_v60  ;;  %v1182_v29 = vpop.f32.mrf.mxu0  ;;  %v1719_v16 = vadd.f32 %v5627_v7, %v1390_v61  ;;  %v5729_v22 = vadd.f32 %v5685_v4, %v1718_v30 }
 0x241   : > { %7735 = vst [vmem:[#allocation11_spill] sm:$0xff] %v5690_v42  ;;  %v1782_v53 = vsel %vm1780_vm10, %v5690_v42, 0.0  ;;  %v1781_v37 = vsel %vm1780_vm10, %v5695_v28, 0.0  ;;  %v1784_v13 = vsel %vm1780_vm10, %v5699_v50, 0.0  ;;  %v1786_v25 = vsel %vm1780_vm10, %v5704_v41, 0.0 }
 0x242   : > { %7736 = vst [vmem:[#allocation12_spill] sm:$0xff] %v5695_v28  ;;  %v1783_v63 = vadd.f32 %v1782_v53, %v1781_v37  ;;  %v5723_v24 = vadd.f32 %v5685_v4, %v1717_v59  ;;  %v1395_v42 = vadd.f32 %v1394_v35, %v1169_v6  ;;  %v1788_v60 = vsel %vm1780_vm10, %v5717_v8, 0.0 }
 0x243   : > { %7737 = vst [vmem:[#allocation13_spill] sm:$0xff] %v5699_v50  ;;  %v5735_v53 = vadd.f32 %v5685_v4, %v1719_v16  ;;  %v1400_v6 = vadd.f32 %v1399_v57, %v1174_v38  ;;  %v1792_v61 = vsel %vm1780_vm10, %v5729_v22, 0.0  ;;  %v5743_v37 = vadd.f32 %v5685_v4, %v1720_v36 }
 0x244   : > { %v1785_v28 = vadd.f32 %v1784_v13, %v1783_v63  ;;  %v1790_v14 = vsel %vm1780_vm10, %v5723_v24, 0.0  ;;  %v1721_v7 = vadd.f32 %v5634_v56, %v1395_v42  ;;  %v1405_v38 = vadd.f32 %v1404_v5, %v1179_v39 }
 0x245   : > { %v5674_v62 = vpop.f32.mrf.mxu2  ;;  %v1794_v13 = vsel %vm1780_vm10, %v5735_v53, 0.0  ;;  %v1723_v56 = vadd.f32 %v5639_v54, %v1400_v6  ;;  %v1796_v33 = vsel %vm1780_vm10, %v5743_v37, 0.0  ;;  %v5757_v19 = vadd.f32 %v5685_v4, %v1722_v10 }
 0x246   : > { %v1407_v50 = vpop.f32.mrf.mxu1  ;;  %v1787_v58 = vadd.f32 %v1786_v25, %v1785_v28  ;;  %v5751_v42 = vadd.f32 %v5685_v4, %v1721_v7  ;;  %v1725_v54 = vadd.f32 %v5646_v45, %v1405_v38  ;;  %v1415_v38 = vadd.f32 %v5644_v47, %v5542_v20 }
 0x247   : > { %v5746_v28 = vpop.f32.mrf.mxu3  ;;  %v1408_v15 = vadd.f32 %v1407_v50, %v1182_v29  ;;  %v1800_v52 = vsel %vm1780_vm10, %v5757_v19, 0.0 }
 0x248   : > { %v1789_v35 = vadd.f32 %v1788_v60, %v1787_v58  ;;  %v1184_v30 = vpop.f32.mrf.mxu0  ;;  %v1798_v16 = vsel %vm1780_vm10, %v5751_v42, 0.0  ;;  %v5763_v60 = vadd.f32 %v5685_v4, %v1723_v56  ;;  %v5769_v58 = vadd.f32 %v5685_v4, %v1724_v32 }
 0x249   : > { %v1726_v51 = vadd.f32 %v5649_v23, %v1408_v15  ;;  %v1729_v32 = vadd.f32 %v5658_v55, %v1415_v38 }
 0x24a   : > { %v1791_v21 = vadd.f32 %v1790_v14, %v1789_v35  ;;  %v1802_v29 = vsel %vm1780_vm10, %v5763_v60, 0.0  ;;  %v5775_v14 = vadd.f32 %v5685_v4, %v1725_v54  ;;  %v1804_v35 = vsel %vm1780_vm10, %v5769_v58, 0.0 }
 0x24b   : > { %v5804_v20 = vadd.f32 %v5685_v4, %v1729_v32 }
 0x24c   : > { %v1793_v57 = vadd.f32 %v1792_v61, %v1791_v21  ;;  %v5781_v61 = vadd.f32 %v5685_v4, %v1726_v51  ;;  %v1806_v23 = vsel %vm1780_vm10, %v5775_v14, 0.0 }
 0x24d   : > { %v5687_v40 = vpop.f32.mrf.mxu2  ;;  %v1814_v55 = vsel %vm1780_vm10, %v5804_v20, 0.0 }
 0x24e   : > { %v1795_v63 = vadd.f32 %v1794_v13, %v1793_v57  ;;  %v1409_v25 = vpop.f32.mrf.mxu1 }
 0x24f   : > { %v1410_v39 = vadd.f32 %v1409_v25, %v1184_v30  ;;  %v1439_v6 = vpop.f32.mrf.mxu3 }
 0x250   : > { %v1797_v5 = vadd.f32 %v1796_v33, %v1795_v63  ;;  %v5796_v33 = vadd.f32 %v5685_v4, %v5656_v26  ;;  %v1425_v26 = vadd.f32 %v5661_v44, %v5559_v17  ;;  %v1430_v17 = vadd.f32 %v5672_v34, %v5567_v0  ;;  %v7739_v34 = vld [vmem:[#allocation14_spill] sm:$0xff] }
 0x251   : > { %v1727_v45 = vadd.f32 %v5651_v11, %v1410_v39  ;;  %v1808_v11 = vsel %vm1780_vm10, %v5781_v61, 0.0 }
 0x252   : > { %v1799_v50 = vadd.f32 %v1798_v16, %v1797_v5  ;;  %v1420_v16 = vadd.f32 %v5653_v3, %v5551_v43  ;;  %v1812_v54 = vsel %vm1780_vm10, %v5796_v33, 0.0  ;;  %v5813_v5 = vadd.f32 %v5685_v4, %v5663_v9 }
 0x253   : > { %v5786_v48 = vadd.f32 %v5685_v4, %v1727_v45  ;;  %v1428_v3 = vadd.f32 %v5667_v27, %v5565_v12  ;;  %v1733_v51 = vadd.f32 %v5674_v62, %v1425_v26  ;;  %v5827_v9 = vadd.f32 %v5685_v4, %v5670_v1 }
 0x254   : > { %v1801_v7 = vadd.f32 %v1800_v52, %v1799_v50  ;;  %v1731_v39 = vadd.f32 %v5665_v31, %v1420_v16  ;;  %v1816_v44 = vsel %vm1780_vm10, %v5813_v5, 0.0  ;;  %v1433_v27 = vadd.f32 %v5678_v2, %v5573_v18  ;;  %v7740_v2 = vld [vmem:[#allocation5_spill] sm:$0xff] }
 0x255   : > { %v5711_v49 = vpop.f32.mrf.mxu2  ;;  %v1810_v57 = vsel %vm1780_vm10, %v5786_v48, 0.0  ;;  %v5835_v45 = vadd.f32 %v5685_v4, %v1733_v51  ;;  %v1820_v1 = vsel %vm1780_vm10, %v5827_v9, 0.0  ;;  %v7744_v51 = vld [vmem:[#allocation9_spill] sm:$0xff] }
 0x256   : > { %v1803_v10 = vadd.f32 %v1802_v29, %v1801_v7  ;;  %v5818_v52 = vadd.f32 %v5685_v4, %v1731_v39  ;;  %v1734_v29 = vadd.f32 %v5687_v40, %v1428_v3  ;;  %v1735_v0 = vadd.f32 %v5711_v49, %v1430_v17 }
 0x257   : > { %v1442_v15 = vpop.f32.mrf.mxu3  ;;  %v1435_v7 = vadd.f32 %v7739_v34, %v5575_v46 }
 0x258   : > { %v1805_v21 = vadd.f32 %v1804_v35, %v1803_v10  ;;  %v1818_v62 = vsel %vm1780_vm10, %v5818_v52, 0.0  ;;  %v5843_v40 = vadd.f32 %v5685_v4, %v1734_v29  ;;  %v1438_v10 = vadd.f32 %v5746_v28, %v7740_v2 }
 0x259   : > { %v5851_v49 = vadd.f32 %v5685_v4, %v1735_v0 }
 0x25a   : > { %v1807_v56 = vadd.f32 %v1806_v23, %v1805_v21  ;;  %v1822_v23 = vsel %vm1780_vm10, %v5835_v45, 0.0 }
 0x25c   : > { %v1809_v30 = vadd.f32 %v1808_v11, %v1807_v56  ;;  %v7741_v56 = vld [vmem:[#allocation6_spill] sm:$0xff] }
 0x25d   : > { %v5738_v59 = vpop.f32.mrf.mxu2  ;;  %v1440_v38 = vadd.f32 %v1439_v6, %v7741_v56  ;;  %v7743_v6 = vld [vmem:[#allocation8_spill] sm:$0xff] }
 0x25e   : > { %v1811_v63 = vadd.f32 %v1810_v57, %v1809_v30  ;;  %v1736_v35 = vadd.f32 %v5738_v59, %v1433_v27  ;;  %v1824_v57 = vsel %vm1780_vm10, %v5843_v40, 0.0 }
 0x25f   : > { %v1444_v31 = vpop.f32.mrf.mxu3 }
 0x260   : > { %v1813_v47 = vadd.f32 %v1812_v54, %v1811_v63  ;;  %v5857_v59 = vadd.f32 %v5685_v4, %v1736_v35  ;;  %v7742_v63 = vld [vmem:[#allocation7_spill] sm:$0xff]  ;;  %v1826_v54 = vsel %vm1780_vm10, %v5851_v49, 0.0  ;;  %v1445_v26 = vadd.f32 %v1444_v31, %v7743_v6 }
 0x261   : > { %v1443_v16 = vadd.f32 %v1442_v15, %v7742_v63 }
 0x262   : > { %v1815_v43 = vadd.f32 %v1814_v55, %v1813_v47  ;;  %v1828_v55 = vsel %vm1780_vm10, %v5857_v59, 0.0 }
 0x264   : > { %v1817_v12 = vadd.f32 %v1816_v44, %v1815_v43 }
 0x265   : > { %v1694_v36 = vpop.f32.mrf.mxu2 }
 0x266   : > { %v1819_v18 = vadd.f32 %v1818_v62, %v1817_v12  ;;  %v1737_v21 = vadd.f32 %v1694_v36, %v1435_v7 }
 0x267   : > { %v1447_v32 = vpop.f32.mrf.mxu3 }
 0x268   : > { %v1821_v46 = vadd.f32 %v1820_v1, %v1819_v18  ;;  %v5863_v36 = vadd.f32 %v5685_v4, %v1737_v21  ;;  %v1448_v15 = vadd.f32 %v1447_v32, %v7744_v51 }
 0x26a   : > { %v1823_v28 = vadd.f32 %v1822_v23, %v1821_v46  ;;  %v1830_v17 = vsel %vm1780_vm10, %v5863_v36, 0.0 }
 0x26c   : > { %v1825_v39 = vadd.f32 %v1824_v57, %v1823_v28 }
 0x26d   : > { %v1697_v13 = vpop.f32.mrf.mxu2 }
 0x26e   : > { %v1738_v30 = vadd.f32 %v1697_v13, %v1438_v10  ;;  %v1827_v3 = vadd.f32 %v1826_v54, %v1825_v39  ;;  %v7745_v10 = vld [vmem:[#allocation10_spill] sm:$0xff] }
 0x26f   : > { %v1449_v7 = vpop.f32.mrf.mxu3 }
 0x270   : > { %v5869_v43 = vadd.f32 %v5685_v4, %v1738_v30  ;;  %v1829_v29 = vadd.f32 %v1828_v55, %v1827_v3  ;;  %v1450_v23 = vadd.f32 %v1449_v7, %v7745_v10 }
 0x272   : > { %v1832_v31 = vsel %vm1780_vm10, %v5869_v43, 0.0 }
 0x275   : > { %v1699_v25 = vpop.f32.mrf.mxu2 }
 0x276   : > { %v1739_v47 = vadd.f32 %v1699_v25, %v1440_v38 }
 0x278   : > { %v5875_v44 = vadd.f32 %v5685_v4, %v1739_v47 }
 0x27a   : > { %v1834_v0 = vsel %vm1780_vm10, %v5875_v44, 0.0 }
 0x27d   : > { %v1702_v50 = vpop.f32.mrf.mxu2 }
 0x27e   : > { %v1740_v13 = vadd.f32 %v1702_v50, %v1443_v16  ;;  %v1831_v50 = vadd.f32 %v1830_v17, %v1829_v29 }
 0x280   : > { %v5880_v27 = vadd.f32 %v5685_v4, %v1740_v13  ;;  %v1833_v1 = vadd.f32 %v1832_v31, %v1831_v50  ;;  %v7746_v13 = vld [vmem:[#allocation12_spill] sm:$0xff] }
 0x282   : > { %v1836_v35 = vsel %vm1780_vm10, %v5880_v27, 0.0  ;;  %v1835_v2 = vadd.f32 %v1834_v0, %v1833_v1 }
 0x284   : > { %v1837_v46 = vadd.f32 %v1836_v35, %v1835_v2 }
 0x285   : > { %v1704_v11 = vpop.f32.mrf.mxu2 }
 0x286   : > { %v1741_v25 = vadd.f32 %v1704_v11, %v1445_v26 }
 0x288   : > { %v5885_v34 = vadd.f32 %v5685_v4, %v1741_v25 }
 0x28a   : > { %v1838_v21 = vsel %vm1780_vm10, %v5885_v34, 0.0 }
 0x28b   : > { %v1839_v57 = vadd.f32 %v1838_v21, %v1837_v46 }
 0x28d   : > { %v1707_v12 = vpop.f32.mrf.mxu2 }
 0x28e   : > { %v1742_v62 = vadd.f32 %v1707_v12, %v1448_v15  ;;  %v7748_v15 = vld [vmem:[#allocation13_spill] sm:$0xff] }
 0x290   : > { %v5890_v18 = vadd.f32 %v5685_v4, %v1742_v62 }
 0x292   : > { %v1840_v56 = vsel %vm1780_vm10, %v5890_v18, 0.0 }
 0x293   : > { %v1841_v32 = vadd.f32 %v1840_v56, %v1839_v57 }
 0x295   : > { %v1709_v11 = vpop.f32.mrf.mxu2 }
 0x296   : > { %v1743_v38 = vadd.f32 %v1709_v11, %v1450_v23 }
 0x298   : > { %v5898_v30 = vadd.f32 %v5685_v4, %v1743_v38  ;;  %v7747_v4 = vld [vmem:[#allocation11_spill] sm:$0xff] }
 0x29a   : > { %v1842_v28 = vsel %vm1780_vm10, %v5898_v30, 0.0 }
 0x29b   : > { %v1843_v63 = vadd.f32 %v1842_v28, %v1841_v32 }
 0x29d   : > { %v1844_v16 = vrot.slane %v1843_v63, 4 }
 0x29f   : > { %v1845_v54 = vadd.f32 %v1844_v16, %v1843_v63 }
 0x2a1   : > { %v1846_v47 = vrot.slane %v1845_v54, 2 }
 0x2a3   : > { %v1847_v39 = vadd.f32 %v1846_v47, %v1845_v54 }
 0x2a5   : > { %v1848_v6 = vrot.slane %v1847_v39, 1 }
 0x2a7   : > { %v1849_v26 = vadd.f32 %v1848_v6, %v1847_v39 }
 0x2a9   : > { %v5902_v55 = vmul.f32 0.00390625, %v1849_v26 }
 0x2ab   : > { %v5906_v3 = vsub.f32 %v7746_v13, %v5902_v55  ;;  %v5910_v51 = vsub.f32 %v7747_v4, %v5902_v55  ;;  %v5914_v17 = vsub.f32 %v7748_v15, %v5902_v55  ;;  %v5918_v25 = vsub.f32 %v5704_v41, %v5902_v55 }
 0x2ac   : > { %v5926_v31 = vsub.f32 %v5717_v8, %v5902_v55  ;;  %v5932_v50 = vsub.f32 %v5723_v24, %v5902_v55  ;;  %v5940_v35 = vsub.f32 %v5729_v22, %v5902_v55  ;;  %v5947_v24 = vsub.f32 %v5735_v53, %v5902_v55 }
 0x2ad   : > { %v1883_v29 = vmul.f32 %v5906_v3, %v5906_v3  ;;  %v1884_v12 = vmul.f32 %v5910_v51, %v5910_v51  ;;  %v1885_v62 = vmul.f32 %v5914_v17, %v5914_v17  ;;  %v1886_v41 = vmul.f32 %v5918_v25, %v5918_v25 }
 0x2ae   : > { %v1887_v8 = vmul.f32 %v5926_v31, %v5926_v31  ;;  %v1888_v23 = vmul.f32 %v5932_v50, %v5932_v50  ;;  %v5954_v22 = vsub.f32 %v5743_v37, %v5902_v55  ;;  %v1889_v11 = vmul.f32 %v5940_v35, %v5940_v35 }
 0x2af   : > { %v1915_v0 = vsel %vm1780_vm10, %v1883_v29, 0.0  ;;  %v1916_v7 = vsel %vm1780_vm10, %v1884_v12, 0.0  ;;  %v1918_v2 = vsel %vm1780_vm10, %v1885_v62, 0.0  ;;  %v1920_v21 = vsel %vm1780_vm10, %v1886_v41, 0.0 }
 0x2b0   : > { %v1917_v1 = vadd.f32 %v1916_v7, %v1915_v0  ;;  %v1922_v56 = vsel %vm1780_vm10, %v1887_v8, 0.0  ;;  %v5961_v53 = vsub.f32 %v5751_v42, %v5902_v55  ;;  %v1890_v57 = vmul.f32 %v5947_v24, %v5947_v24 }
 0x2b1   : > { %v1924_v32 = vsel %vm1780_vm10, %v1888_v23, 0.0  ;;  %v5968_v37 = vsub.f32 %v5757_v19, %v5902_v55  ;;  %v1891_v63 = vmul.f32 %v5954_v22, %v5954_v22  ;;  %v1926_v16 = vsel %vm1780_vm10, %v1889_v11, 0.0 }
 0x2b2   : > { %v1919_v10 = vadd.f32 %v1918_v2, %v1917_v1  ;;  %v5975_v42 = vsub.f32 %v5763_v60, %v5902_v55  ;;  %v1892_v47 = vmul.f32 %v5961_v53, %v5961_v53  ;;  %v1928_v39 = vsel %vm1780_vm10, %v1890_v57, 0.0 }
 0x2b3   : > { %v5982_v19 = vsub.f32 %v5769_v58, %v5902_v55  ;;  %v1893_v26 = vmul.f32 %v5968_v37, %v5968_v37  ;;  %v1930_v13 = vsel %vm1780_vm10, %v1891_v63, 0.0  ;;  %v5989_v60 = vsub.f32 %v5775_v14, %v5902_v55 }
 0x2b4   : > { %v1921_v46 = vadd.f32 %v1920_v21, %v1919_v10  ;;  %v1894_v15 = vmul.f32 %v5975_v42, %v5975_v42  ;;  %v1932_v29 = vsel %vm1780_vm10, %v1892_v47, 0.0  ;;  %v5996_v58 = vsub.f32 %v5781_v61, %v5902_v55 }
 0x2b5   : > { %v1895_v62 = vmul.f32 %v5982_v19, %v5982_v19  ;;  %v1934_v41 = vsel %vm1780_vm10, %v1893_v26, 0.0  ;;  %v6003_v14 = vsub.f32 %v5786_v48, %v5902_v55  ;;  %v1896_v7 = vmul.f32 %v5989_v60, %v5989_v60 }
 0x2b6   : > { %v1923_v38 = vadd.f32 %v1922_v56, %v1921_v46  ;;  %v1936_v1 = vsel %vm1780_vm10, %v1894_v15, 0.0  ;;  %v6010_v61 = vsub.f32 %v5796_v33, %v5902_v55  ;;  %v1897_v2 = vmul.f32 %v5996_v58, %v5996_v58 }
 0x2b7   : > { %v1938_v10 = vsel %vm1780_vm10, %v1895_v62, 0.0  ;;  %v6017_v48 = vsub.f32 %v5804_v20, %v5902_v55  ;;  %v1898_v21 = vmul.f32 %v6003_v14, %v6003_v14  ;;  %v1940_v46 = vsel %vm1780_vm10, %v1896_v7, 0.0 }
 0x2b8   : > { %v1925_v28 = vadd.f32 %v1924_v32, %v1923_v38  ;;  %v6024_v33 = vsub.f32 %v5813_v5, %v5902_v55  ;;  %v1899_v56 = vmul.f32 %v6010_v61, %v6010_v61  ;;  %v1942_v38 = vsel %vm1780_vm10, %v1897_v2, 0.0 }
 0x2b9   : > { %v6031_v20 = vsub.f32 %v5818_v52, %v5902_v55  ;;  %v1900_v32 = vmul.f32 %v6017_v48, %v6017_v48  ;;  %v6038_v5 = vsub.f32 %v5827_v9, %v5902_v55  ;;  %v6045_v52 = vsub.f32 %v5835_v45, %v5902_v55 }
 0x2ba   : > { %v1927_v54 = vadd.f32 %v1926_v16, %v1925_v28  ;;  %v1944_v28 = vsel %vm1780_vm10, %v1898_v21, 0.0  ;;  %v1901_v16 = vmul.f32 %v6024_v33, %v6024_v33  ;;  %v6052_v9 = vsub.f32 %v5843_v40, %v5902_v55 }
 0x2bb   : > { %v6059_v45 = vsub.f32 %v5851_v49, %v5902_v55  ;;  %v6066_v40 = vsub.f32 %v5857_v59, %v5902_v55  ;;  %v6073_v49 = vsub.f32 %v5863_v36, %v5902_v55  ;;  %v6080_v59 = vsub.f32 %v5869_v43, %v5902_v55 }
 0x2bc   : > { %v1929_v6 = vadd.f32 %v1928_v39, %v1927_v54  ;;  %v1946_v54 = vsel %vm1780_vm10, %v1899_v56, 0.0  ;;  %v1902_v39 = vmul.f32 %v6031_v20, %v6031_v20  ;;  %v6087_v36 = vsub.f32 %v5875_v44, %v5902_v55 }
 0x2bd   : > { %v6094_v43 = vsub.f32 %v5880_v27, %v5902_v55  ;;  %v6101_v44 = vsub.f32 %v5885_v34, %v5902_v55  ;;  %v6108_v27 = vsub.f32 %v5890_v18, %v5902_v55  ;;  %v1882_v34 = vsub.f32 %v5898_v30, %v5902_v55 }
 0x2be   : > { %v1931_v4 = vadd.f32 %v1930_v13, %v1929_v6  ;;  %v1948_v6 = vsel %vm1780_vm10, %v1900_v32, 0.0  ;;  %v1903_v13 = vmul.f32 %v6038_v5, %v6038_v5 }
 0x2c0   : > { %v1933_v12 = vadd.f32 %v1932_v29, %v1931_v4  ;;  %v1950_v4 = vsel %vm1780_vm10, %v1901_v16, 0.0  ;;  %v1904_v29 = vmul.f32 %v6045_v52, %v6045_v52 }
 0x2c2   : > { %v1935_v0 = vadd.f32 %v1934_v41, %v1933_v12  ;;  %v1952_v12 = vsel %vm1780_vm10, %v1902_v39, 0.0  ;;  %v1905_v41 = vmul.f32 %v6052_v9, %v6052_v9 }
 0x2c4   : > { %v1937_v8 = vadd.f32 %v1936_v1, %v1935_v0  ;;  %v1954_v0 = vsel %vm1780_vm10, %v1903_v13, 0.0  ;;  %v1906_v1 = vmul.f32 %v6059_v45, %v6059_v45 }
 0x2c6   : > { %v1939_v23 = vadd.f32 %v1938_v10, %v1937_v8  ;;  %v1956_v8 = vsel %vm1780_vm10, %v1904_v29, 0.0  ;;  %v1907_v10 = vmul.f32 %v6066_v40, %v6066_v40  ;;  %v1914_v29 = vmul.f32 %v1882_v34, %v1882_v34 }
 0x2c8   : > { %v1941_v11 = vadd.f32 %v1940_v46, %v1939_v23  ;;  %v1958_v23 = vsel %vm1780_vm10, %v1905_v41, 0.0  ;;  %v1908_v46 = vmul.f32 %v6073_v49, %v6073_v49  ;;  %v1976_v30 = vsel %vm1780_vm10, %v1914_v29, 0.0 }
 0x2ca   : > { %v1943_v57 = vadd.f32 %v1942_v38, %v1941_v11  ;;  %v1960_v11 = vsel %vm1780_vm10, %v1906_v1, 0.0  ;;  %v1909_v38 = vmul.f32 %v6080_v59, %v6080_v59 }
 0x2cc   : > { %v1945_v63 = vadd.f32 %v1944_v28, %v1943_v57  ;;  %v1962_v57 = vsel %vm1780_vm10, %v1907_v10, 0.0  ;;  %v1910_v28 = vmul.f32 %v6087_v36, %v6087_v36 }
 0x2ce   : > { %v1947_v47 = vadd.f32 %v1946_v54, %v1945_v63  ;;  %v1964_v63 = vsel %vm1780_vm10, %v1908_v46, 0.0  ;;  %v1911_v54 = vmul.f32 %v6094_v43, %v6094_v43 }
 0x2d0   : > { %v1949_v26 = vadd.f32 %v1948_v6, %v1947_v47  ;;  %v1966_v47 = vsel %vm1780_vm10, %v1909_v38, 0.0  ;;  %v1912_v6 = vmul.f32 %v6101_v44, %v6101_v44  ;;  %v1970_v18 = vsel %vm1780_vm10, %v1911_v54, 0.0 }
 0x2d2   : > { %v1951_v15 = vadd.f32 %v1950_v4, %v1949_v26  ;;  %v1968_v26 = vsel %vm1780_vm10, %v1910_v28, 0.0  ;;  %v1913_v4 = vmul.f32 %v6108_v27, %v6108_v27 }
 0x2d4   : > { %v1953_v62 = vadd.f32 %v1952_v12, %v1951_v15  ;;  %v1972_v12 = vsel %vm1780_vm10, %v1912_v6, 0.0  ;;  %v1974_v41 = vsel %vm1780_vm10, %v1913_v4, 0.0  ;;  %v4562_v6 = vld [vmem:[%s7706_s3 + $0x8] sm:$0x30] }
 0x2d6   : > { %v1955_v7 = vadd.f32 %v1954_v0, %v1953_v62 }
 0x2d8   : > { %v1957_v2 = vadd.f32 %v1956_v8, %v1955_v7 }
 0x2da   : > { %v1959_v21 = vadd.f32 %v1958_v23, %v1957_v2 }
 0x2dc   : > { %v1961_v56 = vadd.f32 %v1960_v11, %v1959_v21 }
 0x2de   : > { %v1963_v32 = vadd.f32 %v1962_v57, %v1961_v56 }
 0x2e0   : > { %v1965_v16 = vadd.f32 %v1964_v63, %v1963_v32 }
 0x2e2   : > { %v1967_v39 = vadd.f32 %v1966_v47, %v1965_v16 }
 0x2e4   : > { %v1969_v13 = vadd.f32 %v1968_v26, %v1967_v39  ;;  %v4286_v39 = vld [vmem:[%s7706_s3 + $0x8] sm:$0xf] }
 0x2e6   : > { %v1971_v15 = vadd.f32 %v1970_v18, %v1969_v13  ;;  %v4287_v18 = vor.u32 %v4562_v6, %v4286_v39 }
 0x2e8   : > { %v1973_v62 = vadd.f32 %v1972_v12, %v1971_v15 }
 0x2ea   : > { %v1975_v0 = vadd.f32 %v1974_v41, %v1973_v62 }
 0x2ec   : > { %v1977_v55 = vadd.f32 %v1976_v30, %v1975_v0  ;;  %v4545_v0 = vld [vmem:[%s7706_s3] sm:$0x30] }
 0x2ee   : > { %v1978_v7 = vrot.slane %v1977_v55, 4 }
 0x2f0   : > { %v1979_v1 = vadd.f32 %v1978_v7, %v1977_v55 }
 0x2f2   : > { %v1980_v8 = vrot.slane %v1979_v1, 2 }
 0x2f4   : > { %v1981_v2 = vadd.f32 %v1980_v8, %v1979_v1 }
 0x2f6   : > { %v1982_v10 = vrot.slane %v1981_v2, 1 }
 0x2f8   : > { %v1983_v23 = vadd.f32 %v1982_v10, %v1981_v2  ;;  %v2911_v10 = vsel %vm1134_vm6, %v4287_v18, 0 }
 0x2f9   : > { %2920 = vmatpush.bf16.msrb.mxu3 %v2911_v10 }
 0x2fa   : > { %v1984_v21 = vmul.f32 0.00390625, %v1983_v23 }
 0x2fc   : > { %v1985_v46 = vadd.f32 1e-05, %v1984_v21 }
 0x2fe   : > { %4594 = vrsqrt.f32 %v1985_v46  ;;  %vm1992_vm12 = vweird.f32 %v1985_v46 }
 0x304   : > { %v4595_v11 = vpop.eup %4594 }
 0x305   : > { %v1987_v56 = vmul.f32 %v4595_v11, %v1985_v46  ;;  %vm1993_vm11 = vweird.f32 %v4595_v11 }
 0x306   : > { %vm1994_vm13 = vmor %vm1992_vm12, %vm1993_vm11 }
 0x307   : > { %v1988_v38 = vmul.f32 %v4595_v11, %v1987_v56  ;;  %v4456_v56 = vld [vmem:[%s7706_s3 + $0x10] sm:$0xf] }
 0x309   : > { %v1989_v57 = vmul.f32 0.5, %v1988_v38 }
 0x30b   : > { %v1990_v32 = vsub.f32 1.5, %v1989_v57 }
 0x30d   : > { %v1991_v28 = vmul.f32 %v4595_v11, %v1990_v32 }
 0x30f   : > { %v6124_v63 = vsel %vm1994_vm13, %v4595_v11, %v1991_v28 }
 0x310   : > { %v1999_v16 = vmul.f32 %v6124_v63, %v5918_v25  ;;  %v1998_v54 = vmul.f32 %v6124_v63, %v5914_v17  ;;  %v2027_v26 = vmul.f32 %v6124_v63, %v1882_v34  ;;  %v1996_v25 = vmul.f32 %v6124_v63, %v5906_v3 }
 0x311   : > { %v2000_v17 = vmul.f32 %v6124_v63, %v5926_v31  ;;  %v2002_v15 = vmul.f32 %v6124_v63, %v5940_v35  ;;  %v6146_v12 = vmul.f32 %v6124_v63, %v5954_v22  ;;  %v6150_v34 = vmul.f32 %v6124_v63, %v5968_v37  ;;  %v4370_v37 = vld [vmem:[%s7706_s3] sm:$0xf] }
 0x312   : > { %v2031_v47 = vmax.f32 %v1999_v16, 0.0  ;;  %v2030_v4 = vmax.f32 %v1998_v54, 0.0  ;;  %v6152_v3 = vmax.f32 %v2027_v26, 0.0  ;;  %v6156_v31 = vmul.f32 %v6124_v63, %v5982_v19  ;;  %v4579_v16 = vld [vmem:[%s7706_s3 + $0x10] sm:$0x30] }
 0x313   : > { %v6160_v35 = vmul.f32 %v6124_v63, %v5996_v58  ;;  %v6164_v22 = vmul.f32 %v6124_v63, %v6010_v61  ;;  %v6174_v19 = vmul.f32 %v6124_v63, %v6017_v48  ;;  %v6178_v58 = vmul.f32 %v6124_v63, %v6024_v33 }
 0x314   : > { %v2319_v13 = vpack.c.bf16 %v2031_v47, %v2031_v47  ;;  %v2077_v29 = vrot.slane %v2031_v47, 7  ;;  %v2318_v62 = vpack.c.bf16 %v2030_v4, %v2030_v4  ;;  %v2061_v41 = vrot.slane %v2030_v4, 7 }
 0x315   : > { %v6182_v61 = vmul.f32 %v6124_v63, %v6031_v20  ;;  %v2125_v30 = vrot.slane %v2030_v4, 1  ;;  %v2141_v55 = vrot.slane %v2031_v47, 1  ;;  %v2028_v48 = vmax.f32 %v1996_v25, 0.0 }
 0x316   : > { %2386 = vrot.lane.b32.xlu2 %v2319_v13, %s4606_s24  ;;  %2384 = vrot.lane.b32.xlu1 %v2318_v62, %s4606_s24  ;;  %v2109_v1 = vsel %vm297_vm2, %v2077_v29, %v2061_v41  ;;  %v2093_v8 = vsel %vm297_vm2, %v2061_v41, %v2077_v29  ;;  %v1997_v33 = vmul.f32 %v6124_v63, %v5910_v51 }
 0x317   : > { %v2255_v2 = vpack.c.bf16 %v2093_v8, %v2093_v8  ;;  %v4371_v23 = vor.u32 %v4545_v0, %v4370_v37  ;;  %v2157_v20 = vsel %vm362_vm0, %v2125_v30, %v2141_v55  ;;  %v2173_v21 = vsel %vm362_vm0, %v2141_v55, %v2125_v30 }
 0x318   : > { %v2316_v46 = vpack.c.bf16 %v2028_v48, %v2028_v48  ;;  %v2060_v11 = vrot.slane %v2028_v48, 7  ;;  %v2510_v38 = vpack.c.bf16 %v2157_v20, %v2157_v20  ;;  %v2190_v51 = vsel %vm229_vm1, %v2157_v20, %v2109_v1 }
 0x319   : > { %v2223_v32 = vsel %vm232_vm3, %v2093_v8, %v2173_v21  ;;  %2287 = vst.msk [vmem:[#allocation2 + $0x14] sm:$0xf] %vm500_vm4, %v2255_v2  ;;  %v2029_v28 = vmax.f32 %v1997_v33, 0.0  ;;  %v6209_v54 = vmul.f32 %v6124_v63, %v6038_v5  ;;  %v2254_v47 = vpack.c.bf16 %v2190_v51, %v2190_v51 }
 0x31a   : > { %v2124_v39 = vrot.slane %v2028_v48, 1  ;;  %v3136_v6 = vsel %vm1134_vm6, %v4371_v23, 0  ;;  %v6215_v26 = vmul.f32 %v6124_v63, %v6045_v52  ;;  %2576 = vrot.lane.b32.xlu0 %v2510_v38, %s4607_s25  ;;  %v2511_v13 = vpack.c.bf16 %v2223_v32, %v2223_v32 }
 0x31b   : > { %v2076_v4 = vrot.slane %v2029_v28, 7  ;;  %v2140_v18 = vrot.slane %v2029_v28, 1  ;;  %3145 = vmatpush.bf16.msrb.mxu0 %v3136_v6  ;;  %2286 = vst.msk [vmem:[#allocation2 + $0x10] sm:$0xf] %vm500_vm4, %v2254_v47  ;;  %v6219_v5 = vmax.f32 %v2000_v17, 0.0  ;;  %v4457_v25 = vor.u32 %v4579_v16, %v4456_v56 }
 0x31c   : > { %v2001_v29 = vmul.f32 %v6124_v63, %v5932_v50  ;;  %v2003_v62 = vmul.f32 %v6124_v63, %v5947_v24  ;;  %v6238_v30 = vmax.f32 %v2002_v15, 0.0  ;;  %v2091_v55 = vrot.slane %v6152_v3, 7 }
 0x31d   : > { %v2156_v52 = vsel %vm362_vm0, %v2124_v39, %v2140_v18  ;;  %v2108_v41 = vsel %vm297_vm2, %v2076_v4, %v2060_v11  ;;  %v2092_v37 = vsel %vm297_vm2, %v2060_v11, %v2076_v4  ;;  %v2172_v17 = vsel %vm362_vm0, %v2140_v18, %v2124_v39 }
 0x31e   : > { %2380 = vrot.lane.b32.xlu2 %v2316_v46, %s4606_s24  ;;  %2578 = vrot.lane.b32.xlu1 %v2511_v13, %s4607_s25  ;;  %v2188_v50 = vsel %vm229_vm1, %v2156_v52, %v2108_v41  ;;  %v2221_v24 = vsel %vm232_vm3, %v2092_v37, %v2172_v17  ;;  %v2253_v0 = vpack.c.bf16 %v2092_v37, %v2092_v37  ;;  %v2062_v2 = vrot.slane %v6219_v5, 7 }
 0x31f   : > { %v6243_v1 = vmul.f32 %v6124_v63, %v6052_v9  ;;  %v2252_v8 = vpack.c.bf16 %v2188_v50, %v2188_v50  ;;  %v2509_v48 = vpack.c.bf16 %v2221_v24, %v2221_v24  ;;  %v3396_v33 = vsel %vm1134_vm6, %v4457_v25, 0 }
 0x320   : > { %2285 = vst.msk [vmem:[#allocation2 + $0xc] sm:$0xf] %vm500_vm4, %v2253_v0  ;;  %v2033_v10 = vmax.f32 %v2001_v29, 0.0  ;;  %v2126_v23 = vrot.slane %v6219_v5, 1  ;;  %v6251_v15 = vmul.f32 %v6124_v63, %v6059_v45  ;;  %v6255_v20 = vmul.f32 %v6124_v63, %v6066_v40  ;;  %3405 = vmatpush.bf16.msrb.mxu1 %v3396_v33 }
 0x321   : > { %v2317_v9 = vpack.c.bf16 %v2029_v28, %v2029_v28  ;;  %2284 = vst.msk [vmem:[#allocation2 + $0x8] sm:$0xf] %vm500_vm4, %v2252_v8  ;;  %v6258_v21 = vmax.f32 %v2003_v62, 0.0  ;;  %v2063_v56 = vrot.slane %v6238_v30, 7  ;;  %v2127_v38 = vrot.slane %v6238_v30, 1 }
 0x322   : > { %v2078_v46 = vrot.slane %v2033_v10, 7  ;;  %v2142_v11 = vrot.slane %v2033_v10, 1  ;;  %v6265_v45 = vmul.f32 %v6124_v63, %v6073_v49  ;;  %v2508_v40 = vpack.c.bf16 %v2156_v52, %v2156_v52 }
 0x323   : > { %2382 = vrot.lane.b32.xlu0 %v2317_v9, %s4606_s24  ;;  %v2079_v51 = vrot.slane %v6258_v21, 7  ;;  %v2143_v32 = vrot.slane %v6258_v21, 1  ;;  %v6272_v28 = vmul.f32 %v6124_v63, %v6080_v59  ;;  %v6284_v13 = vmax.f32 %v6146_v12, 0.0 }
 0x324   : > { %v2110_v16 = vsel %vm297_vm2, %v2078_v46, %v2062_v2  ;;  %v2158_v47 = vsel %vm362_vm0, %v2126_v23, %v2142_v11  ;;  %v2094_v49 = vsel %vm297_vm2, %v2062_v2, %v2078_v46  ;;  %v2005_v59 = vmul.f32 %v6124_v63, %v5961_v53 }
 0x325   : > { %v2192_v39 = vsel %vm229_vm1, %v2158_v47, %v2110_v16  ;;  %v2257_v6 = vpack.c.bf16 %v2094_v49, %v2094_v49  ;;  %v6290_v4 = vmul.f32 %v6124_v63, %v6087_v36  ;;  %v2111_v25 = vsel %vm297_vm2, %v2079_v51, %v2063_v56 }
 0x326   : > { %2574 = vrot.lane.b32.xlu2 %v2509_v48, %s4607_s25  ;;  %2572 = vrot.lane.b32.xlu1 %v2508_v40, %s4607_s25  ;;  %v2256_v18 = vpack.c.bf16 %v2192_v39, %v2192_v39  ;;  %v6300_v29 = vsel %vm362_vm0, %v2127_v38, %v2143_v32  ;;  %v6304_v12 = vmul.f32 %v6124_v63, %v6094_v43  ;;  %v2064_v37 = vrot.slane %v6284_v13, 7 }
 0x327   : > { %v6308_v53 = vmul.f32 %v6124_v63, %v6101_v44  ;;  %2289 = vst.msk [vmem:[#allocation2 + $0x1c] sm:$0xf] %vm500_vm4, %v2257_v6  ;;  %v2194_v36 = vsel %vm229_vm1, %v6300_v29, %v2111_v25  ;;  %v6316_v62 = vsel %vm297_vm2, %v2063_v56, %v2079_v51  ;;  %v2320_v52 = vpack.c.bf16 %v6219_v5, %v6219_v5 }
 0x328   : > { %v2512_v41 = vpack.c.bf16 %v2158_v47, %v2158_v47  ;;  %2288 = vst.msk [vmem:[#allocation2 + $0x18] sm:$0xf] %vm500_vm4, %v2256_v18  ;;  %v2258_v43 = vpack.c.bf16 %v2194_v36, %v2194_v36  ;;  %v2259_v44 = vpack.c.bf16 %v6316_v62, %v6316_v62  ;;  %v6324_v17 = vmax.f32 %v2005_v59, 0.0 }
 0x329   : > { %v2128_v50 = vrot.slane %v6284_v13, 1  ;;  %v6328_v24 = vmax.f32 %v6150_v34, 0.0  ;;  %v6332_v0 = vmul.f32 %v6124_v63, %v6108_v27  ;;  %v6335_v5 = vmax.f32 %v6164_v22, 0.0 }
 0x32a   : > { %v6338_v8 = vmax.f32 %v6174_v19, 0.0  ;;  %2290 = vst.msk [vmem:[#allocation2 + $0x20] sm:$0xf] %vm500_vm4, %v2258_v43  ;;  %v2007_v48 = vmul.f32 %v6124_v63, %v5975_v42  ;;  %v2321_v34 = vpack.c.bf16 %v2033_v10, %v2033_v10  ;;  %v2174_v27 = vsel %vm362_vm0, %v2142_v11, %v2126_v23 }
 0x32b   : > { %2388 = vrot.lane.b32.xlu0 %v2320_v52, %s4606_s24  ;;  %2291 = vst.msk [vmem:[#allocation2 + $0x24] sm:$0xf] %vm500_vm4, %v2259_v44  ;;  %v2080_v22 = vrot.slane %v6324_v17, 7  ;;  %v2144_v19 = vrot.slane %v6324_v17, 1  ;;  %v6351_v2 = vmax.f32 %v6178_v58, 0.0  ;;  %v6356_v9 = vmax.f32 %v6156_v31, 0.0 }
 0x32c   : > { %v6353_v33 = vmax.f32 %v2007_v48, 0.0  ;;  %v2009_v42 = vmul.f32 %v6124_v63, %v5989_v60  ;;  %v2065_v23 = vrot.slane %v6328_v24, 7  ;;  %v2225_v60 = vsel %vm232_vm3, %v2094_v49, %v2174_v27 }
 0x32d   : > { %v2112_v10 = vsel %vm297_vm2, %v2080_v22, %v2064_v37  ;;  %v6369_v58 = vsel %vm362_vm0, %v2128_v50, %v2144_v19  ;;  %v6373_v31 = vsel %vm297_vm2, %v2064_v37, %v2080_v22  ;;  %v2129_v56 = vrot.slane %v6328_v24, 1 }
 0x32e   : > { %2580 = vrot.lane.b32.xlu2 %v2512_v41, %s4607_s25  ;;  %2390 = vrot.lane.b32.xlu1 %v2321_v34, %s4606_s24  ;;  %v2196_v46 = vsel %vm229_vm1, %v6369_v58, %v2112_v10  ;;  %v2261_v11 = vpack.c.bf16 %v6373_v31, %v6373_v31  ;;  %v6385_v40 = vmax.f32 %v6182_v61, 0.0  ;;  %v6388_v51 = vmax.f32 %v6209_v54, 0.0 }
 0x32f   : > { %v2260_v16 = vpack.c.bf16 %v2196_v46, %v2196_v46  ;;  %v2081_v47 = vrot.slane %v6353_v33, 7  ;;  %v2323_v49 = vpack.c.bf16 %v6258_v21, %v6258_v21  ;;  %v2145_v39 = vrot.slane %v6353_v33, 1 }
 0x330   : > { %2293 = vst.msk [vmem:[#allocation2 + $0x2c] sm:$0xf] %vm500_vm4, %v2261_v11  ;;  %v2066_v6 = vrot.slane %v6356_v9, 7  ;;  %v6396_v59 = vmax.f32 %v2009_v42, 0.0  ;;  %v6399_v61 = vmax.f32 %v6215_v26, 0.0  ;;  %v2513_v18 = vpack.c.bf16 %v2225_v60, %v2225_v60 }
 0x331   : > { %2292 = vst.msk [vmem:[#allocation2 + $0x28] sm:$0xf] %vm500_vm4, %v2260_v16  ;;  %v2113_v54 = vsel %vm297_vm2, %v2081_v47, %v2065_v23  ;;  %v6406_v25 = vsel %vm297_vm2, %v2065_v23, %v2081_v47  ;;  %v6415_v26 = vsel %vm362_vm0, %v2129_v56, %v2145_v39  ;;  %v2130_v41 = vrot.slane %v6356_v9, 1 }
 0x332   : > { %v2263_v36 = vpack.c.bf16 %v6406_v25, %v6406_v25  ;;  %v2082_v52 = vrot.slane %v6396_v59, 7  ;;  %v2322_v43 = vpack.c.bf16 %v6238_v30, %v6238_v30  ;;  %v2175_v44 = vsel %vm362_vm0, %v2143_v32, %v2127_v38 }
 0x333   : > { %2582 = vrot.lane.b32.xlu0 %v2513_v18, %s4607_s25  ;;  %v2198_v37 = vsel %vm229_vm1, %v6415_v26, %v2113_v54  ;;  %v6434_v48 = vmax.f32 %v6160_v35, 0.0  ;;  %v6437_v34 = vmax.f32 %v6243_v1, 0.0  ;;  %v2146_v21 = vrot.slane %v6396_v59, 1 }
 0x334   : > { %v2262_v27 = vpack.c.bf16 %v2198_v37, %v2198_v37  ;;  %2295 = vst.msk [vmem:[#allocation2 + $0x34] sm:$0xf] %vm500_vm4, %v2263_v36  ;;  %v2114_v30 = vsel %vm297_vm2, %v2082_v52, %v2066_v6  ;;  %v6444_v38 = vmax.f32 %v6251_v15, 0.0  ;;  %v2068_v32 = vrot.slane %v6335_v5, 7 }
 0x335   : > { %v6450_v35 = vsel %vm297_vm2, %v2066_v6, %v2082_v52  ;;  %v2011_v1 = vmul.f32 %v6124_v63, %v6003_v14  ;;  %v2084_v22 = vrot.slane %v6338_v8, 7  ;;  %v2227_v42 = vsel %vm232_vm3, %v6316_v62, %v2175_v44 }
 0x336   : > { %2394 = vrot.lane.b32.xlu2 %v2323_v49, %s4606_s24  ;;  %2392 = vrot.lane.b32.xlu1 %v2322_v43, %s4606_s24  ;;  %2294 = vst.msk [vmem:[#allocation2 + $0x30] sm:$0xf] %vm500_vm4, %v2262_v27  ;;  %v6465_v15 = vsel %vm362_vm0, %v2130_v41, %v2146_v21  ;;  %v2265_v10 = vpack.c.bf16 %v6450_v35, %v6450_v35  ;;  %v2067_v63 = vrot.slane %v6434_v48, 7  ;;  %v2131_v23 = vrot.slane %v6434_v48, 1 }
 0x337   : > { %v2200_v14 = vsel %vm229_vm1, %v6465_v15, %v2114_v30  ;;  %v6473_v62 = vmax.f32 %v2011_v1, 0.0  ;;  %v2069_v60 = vrot.slane %v6351_v2, 7  ;;  %v2514_v46 = vpack.c.bf16 %v6300_v29, %v6300_v29 }
 0x338   : > { %v2324_v11 = vpack.c.bf16 %v6284_v13, %v6284_v13  ;;  %v2264_v16 = vpack.c.bf16 %v2200_v14, %v2200_v14  ;;  %2297 = vst.msk [vmem:[#allocation2 + $0x3c] sm:$0xf] %vm500_vm4, %v2265_v10  ;;  %v2132_v6 = vrot.slane %v6335_v5, 1  ;;  %v2148_v18 = vrot.slane %v6338_v8, 1 }
 0x339   : > { %v2083_v47 = vrot.slane %v6473_v62, 7  ;;  %v2147_v49 = vrot.slane %v6473_v62, 1  ;;  %v2085_v54 = vrot.slane %v6385_v40, 7  ;;  %v2515_v36 = vpack.c.bf16 %v2227_v42, %v2227_v42 }
 0x33a   : > { %v2176_v29 = vsel %vm362_vm0, %v2144_v19, %v2128_v50  ;;  %2296 = vst.msk [vmem:[#allocation2 + $0x38] sm:$0xf] %vm500_vm4, %v2264_v16  ;;  %v2116_v52 = vsel %vm297_vm2, %v2084_v22, %v2068_v32  ;;  %v6514_v19 = vsel %vm297_vm2, %v2068_v32, %v2084_v22  ;;  %v6517_v44 = vmax.f32 %v6255_v20, 0.0 }
 0x33b   : > { %2584 = vrot.lane.b32.xlu0 %v2514_v46, %s4607_s25  ;;  %v2115_v43 = vsel %vm297_vm2, %v2083_v47, %v2067_v63  ;;  %v6506_v13 = vsel %vm362_vm0, %v2131_v23, %v2147_v49  ;;  %v6510_v50 = vsel %vm297_vm2, %v2067_v63, %v2083_v47  ;;  %v6520_v37 = vmax.f32 %v6265_v45, 0.0 }
 0x33c   : > { %v2202_v27 = vsel %vm229_vm1, %v6506_v13, %v2115_v43  ;;  %v2267_v30 = vpack.c.bf16 %v6510_v50, %v6510_v50  ;;  %v2229_v32 = vsel %vm232_vm3, %v6373_v31, %v2176_v29  ;;  %v6537_v20 = vsel %vm362_vm0, %v2132_v6, %v2148_v18 }
 0x33d   : > { %v2266_v1 = vpack.c.bf16 %v2202_v27, %v2202_v27  ;;  %v2133_v45 = vrot.slane %v6351_v2, 1  ;;  %v2070_v22 = vrot.slane %v6388_v51, 7  ;;  %v2086_v42 = vrot.slane %v6399_v61, 7 }
 0x33e   : > { %2396 = vrot.lane.b32.xlu2 %v2324_v11, %s4606_s24  ;;  %2586 = vrot.lane.b32.xlu1 %v2515_v36, %s4607_s25  ;;  %2299 = vst.msk [vmem:[#allocation2 + $0x44] sm:$0xf] %vm500_vm4, %v2267_v30  ;;  %v2204_v31 = vsel %vm229_vm1, %v6537_v20, %v2116_v52  ;;  %v2269_v10 = vpack.c.bf16 %v6514_v19, %v6514_v19  ;;  %v6549_v14 = vmax.f32 %v6272_v28, 0.0  ;;  %v7722_v11 = vrot.slane %v6385_v40, 1 }
 0x33f   : > { %2298 = vst.msk [vmem:[#allocation2 + $0x40] sm:$0xf] %vm500_vm4, %v2266_v1  ;;  %v2268_v63 = vpack.c.bf16 %v2204_v31, %v2204_v31  ;;  %v2117_v46 = vsel %vm297_vm2, %v2085_v54, %v2069_v60  ;;  %v6556_v16 = vmax.f32 %v6290_v4, 0.0  ;;  %v2071_v47 = vrot.slane %v6437_v34, 7 }
 0x340   : > { %v2517_v36 = vpack.c.bf16 %v2229_v32, %v2229_v32  ;;  %2301 = vst.msk [vmem:[#allocation2 + $0x4c] sm:$0xf] %vm500_vm4, %v2269_v10  ;;  %v6562_v28 = vsel %vm297_vm2, %v2069_v60, %v2085_v54  ;;  %v2325_v29 = vpack.c.bf16 %v6324_v17, %v6324_v17  ;;  %v6573_v4 = vsel %vm362_vm0, %v2133_v45, %v7722_v11 }
 0x341   : > { %2300 = vst.msk [vmem:[#allocation2 + $0x48] sm:$0xf] %vm500_vm4, %v2268_v63  ;;  %v2271_v52 = vpack.c.bf16 %v6562_v28, %v6562_v28  ;;  %v7721_v43 = vrot.slane %v6388_v51, 1  ;;  %v2087_v60 = vrot.slane %v6444_v38, 7  ;;  %v2206_v17 = vsel %vm229_vm1, %v6573_v4, %v2117_v46 }
 0x342   : > { %v2118_v54 = vsel %vm297_vm2, %v2086_v42, %v2070_v22  ;;  %v7720_v27 = vrot.slane %v6399_v61, 1  ;;  %v2516_v30 = vpack.c.bf16 %v6369_v58, %v6369_v58  ;;  %v2270_v32 = vpack.c.bf16 %v2206_v17, %v2206_v17 }
 0x343   : > { %2398 = vrot.lane.b32.xlu0 %v2325_v29, %s4606_s24  ;;  %2303 = vst.msk [vmem:[#allocation2 + $0x54] sm:$0xf] %vm500_vm4, %v2271_v52  ;;  %v6592_v1 = vsel %vm297_vm2, %v2070_v22, %v2086_v42  ;;  %v2135_v31 = vrot.slane %v6437_v34, 1  ;;  %v6596_v10 = vmax.f32 %v6304_v12, 0.0  ;;  %v6599_v63 = vmax.f32 %v6308_v53, 0.0 }
 0x344   : > { %v6607_v58 = vsel %vm362_vm0, %v7721_v43, %v7720_v27  ;;  %v2273_v22 = vpack.c.bf16 %v6592_v1, %v6592_v1  ;;  %v6612_v42 = vmax.f32 %v6332_v0, 0.0  ;;  %v2072_v12 = vrot.slane %v6517_v44, 7  ;;  %2302 = vst.msk [vmem:[#allocation2 + $0x50] sm:$0xf] %vm500_vm4, %v2270_v32 }
 0x345   : > { %v2208_v53 = vsel %vm229_vm1, %v6607_v58, %v2118_v54  ;;  %v2151_v46 = vrot.slane %v6444_v38, 1  ;;  %v2088_v29 = vrot.slane %v6520_v37, 7  ;;  %v2119_v0 = vsel %vm297_vm2, %v2087_v60, %v2071_v47 }
 0x346   : > { %2590 = vrot.lane.b32.xlu2 %v2517_v36, %s4607_s25  ;;  %2588 = vrot.lane.b32.xlu1 %v2516_v30, %s4607_s25  ;;  %v2073_v36 = vrot.slane %v6549_v14, 7  ;;  %v2272_v52 = vpack.c.bf16 %v2208_v53, %v2208_v53  ;;  %2305 = vst.msk [vmem:[#allocation2 + $0x5c] sm:$0xf] %vm500_vm4, %v2273_v22  ;;  %v2089_v17 = vrot.slane %v6556_v16, 7  ;;  %v2103_v54 = vsel %vm297_vm2, %v2071_v47, %v2087_v60 }
 0x347   : > { %v6629_v30 = vsel %vm362_vm0, %v2135_v31, %v2151_v46  ;;  %v2183_v32 = vsel %vm362_vm0, %v2151_v46, %v2135_v31  ;;  %v2518_v53 = vpack.c.bf16 %v6415_v26, %v6415_v26  ;;  %v2275_v43 = vpack.c.bf16 %v2103_v54, %v2103_v54 }
 0x348   : > { %2304 = vst.msk [vmem:[#allocation2 + $0x58] sm:$0xf] %vm500_vm4, %v2272_v52  ;;  %v2210_v22 = vsel %vm229_vm1, %v6629_v30, %v2119_v0  ;;  %v6643_v27 = vsel %vm232_vm3, %v2103_v54, %v2183_v32  ;;  %v2074_v11 = vrot.slane %v6596_v10, 7  ;;  %v2326_v47 = vpack.c.bf16 %v6328_v24, %v6328_v24 }
 0x349   : > { %v2327_v60 = vpack.c.bf16 %v6353_v33, %v6353_v33  ;;  %v2274_v26 = vpack.c.bf16 %v2210_v22, %v2210_v22  ;;  %2307 = vst.msk [vmem:[#allocation2 + $0x64] sm:$0xf] %vm500_vm4, %v2275_v43  ;;  %v2120_v31 = vsel %vm297_vm2, %v2088_v29, %v2072_v12  ;;  %v2136_v46 = vrot.slane %v6517_v44, 1 }
 0x34a   : > { %v2152_v52 = vrot.slane %v6520_v37, 1  ;;  %v2104_v0 = vsel %vm297_vm2, %v2072_v12, %v2088_v29  ;;  %v2177_v54 = vsel %vm362_vm0, %v2145_v39, %v2129_v56  ;;  %v2121_v32 = vsel %vm297_vm2, %v2089_v17, %v2073_v36 }
 0x34b   : > { %2400 = vrot.lane.b32.xlu0 %v2326_v47, %s4606_s24  ;;  %2306 = vst.msk [vmem:[#allocation2 + $0x60] sm:$0xf] %vm500_vm4, %v2274_v26  ;;  %v2277_v43 = vpack.c.bf16 %v2104_v0, %v2104_v0  ;;  %v2153_v33 = vrot.slane %v6556_v16, 1  ;;  %v2105_v56 = vsel %vm297_vm2, %v2073_v36, %v2089_v17  ;;  %v2075_v39 = vrot.slane %v6612_v42, 7 }
 0x34c   : > { %v6671_v12 = vsel %vm362_vm0, %v2136_v46, %v2152_v52  ;;  %v2184_v24 = vsel %vm362_vm0, %v2152_v52, %v2136_v46  ;;  %v2090_v29 = vrot.slane %v6599_v63, 7  ;;  %v2231_v36 = vsel %vm232_vm3, %v6406_v25, %v2177_v54 }
 0x34d   : > { %v2212_v22 = vsel %vm229_vm1, %v6671_v12, %v2120_v31  ;;  %v6686_v47 = vsel %vm232_vm3, %v2104_v0, %v2184_v24  ;;  %2309 = vst.msk [vmem:[#allocation2 + $0x6c] sm:$0xf] %vm500_vm4, %v2277_v43  ;;  %v2279_v52 = vpack.c.bf16 %v2105_v56, %v2105_v56  ;;  %v2138_v0 = vrot.slane %v6596_v10, 1 }
 0x34e   : > { %2592 = vrot.lane.b32.xlu2 %v2518_v53, %s4607_s25  ;;  %v2137_v53 = vrot.slane %v6549_v14, 1  ;;  %2402 = vrot.lane.b32.xlu1 %v2327_v60, %s4606_s24  ;;  %v2276_v17 = vpack.c.bf16 %v2212_v22, %v2212_v22  ;;  %v2329_v25 = vpack.c.bf16 %v6396_v59, %v6396_v59  ;;  %v2519_v43 = vpack.c.bf16 %v2231_v36, %v2231_v36 }
 0x34f   : > { %2311 = vst.msk [vmem:[#allocation2 + $0x74] sm:$0xf] %vm500_vm4, %v2279_v52  ;;  %v2106_v24 = vsel %vm297_vm2, %v2074_v11, %v2090_v29  ;;  %v2123_v22 = vsel %vm297_vm2, %v2091_v55, %v2075_v39  ;;  %v2139_v36 = vrot.slane %v6612_v42, 1  ;;  %v2528_v7 = vpack.c.bf16 %v6607_v58, %v6607_v58 }
 0x350   : > { %v6694_v26 = vsel %vm362_vm0, %v2137_v53, %v2153_v33  ;;  %v2185_v60 = vsel %vm362_vm0, %v2153_v33, %v2137_v53  ;;  %2308 = vst.msk [vmem:[#allocation2 + $0x68] sm:$0xf] %vm500_vm4, %v2276_v17  ;;  %v2122_v53 = vsel %vm297_vm2, %v2090_v29, %v2074_v11  ;;  %v2328_v33 = vpack.c.bf16 %v6356_v9, %v6356_v9 }
 0x351   : > { %v2214_v31 = vsel %vm229_vm1, %v6694_v26, %v2121_v32  ;;  %v6703_v46 = vsel %vm232_vm3, %v2105_v56, %v2185_v60  ;;  %v2154_v32 = vrot.slane %v6599_v63, 1  ;;  %v2281_v56 = vpack.c.bf16 %v2106_v24, %v2106_v24 }
 0x352   : > { %v2278_v54 = vpack.c.bf16 %v2214_v31, %v2214_v31  ;;  %v2155_v17 = vrot.slane %v6152_v3, 1  ;;  %v2107_v60 = vsel %vm297_vm2, %v2075_v39, %v2091_v55  ;;  %v2178_v55 = vsel %vm362_vm0, %v2146_v21, %v2130_v41 }
 0x353   : > { %2594 = vrot.lane.b32.xlu0 %v2519_v43, %s4607_s25  ;;  %v6727_v11 = vsel %vm362_vm0, %v2138_v0, %v2154_v32  ;;  %v2186_v29 = vsel %vm362_vm0, %v2154_v32, %v2138_v0  ;;  %2313 = vst.msk [vmem:[#allocation2 + $0x7c] sm:$0xf] %vm500_vm4, %v2281_v56  ;;  %v2233_v41 = vsel %vm232_vm3, %v6450_v35, %v2178_v55 }
 0x354   : > { %2310 = vst.msk [vmem:[#allocation2 + $0x70] sm:$0xf] %vm500_vm4, %v2278_v54  ;;  %v2216_v31 = vsel %vm229_vm1, %v6727_v11, %v2122_v53  ;;  %v6741_v52 = vsel %vm232_vm3, %v2106_v24, %v2186_v29  ;;  %v6753_v0 = vsel %vm362_vm0, %v2139_v36, %v2155_v17  ;;  %v2187_v54 = vsel %vm362_vm0, %v2155_v17, %v2139_v36 }
 0x355   : > { %v2280_v39 = vpack.c.bf16 %v2216_v31, %v2216_v31  ;;  %v2218_v43 = vsel %vm229_vm1, %v6753_v0, %v2123_v22  ;;  %v6762_v9 = vsel %vm232_vm3, %v2107_v60, %v2187_v54  ;;  %v2330_v21 = vpack.c.bf16 %v6434_v48, %v6434_v48 }
 0x356   : > { %2406 = vrot.lane.b32.xlu2 %v2329_v25, %s4606_s24  ;;  %v2283_v25 = vpack.c.bf16 %v2107_v60, %v2107_v60  ;;  %2404 = vrot.lane.b32.xlu1 %v2328_v33, %s4606_s24  ;;  %v2282_v59 = vpack.c.bf16 %v2218_v43, %v2218_v43  ;;  %v2520_v53 = vpack.c.bf16 %v6465_v15, %v6465_v15  ;;  %v7752_v17 = vrot.slane %v6388_v51, 1 }
 0x357   : > { %2312 = vst.msk [vmem:[#allocation2 + $0x78] sm:$0xf] %vm500_vm4, %v2280_v39  ;;  %v2179_v32 = vsel %vm362_vm0, %v2147_v49, %v2131_v23  ;;  %v2521_v35 = vpack.c.bf16 %v2233_v41, %v2233_v41  ;;  %v2331_v33 = vpack.c.bf16 %v6473_v62, %v6473_v62  ;;  %v2522_v48 = vpack.c.bf16 %v6506_v13, %v6506_v13 }
 0x358   : > { %2315 = vst.msk [vmem:[#allocation2 + $0x84] sm:$0xf] %vm500_vm4, %v2283_v25  ;;  %v2235_v15 = vsel %vm232_vm3, %v6510_v50, %v2179_v32  ;;  %v2524_v23 = vpack.c.bf16 %v6537_v20, %v6537_v20  ;;  %v2332_v49 = vpack.c.bf16 %v6335_v5, %v6335_v5  ;;  %v2333_v62 = vpack.c.bf16 %v6338_v8, %v6338_v8 }
 0x359   : > { %2314 = vst.msk [vmem:[#allocation2 + $0x80] sm:$0xf] %vm500_vm4, %v2282_v59  ;;  %v2523_v24 = vpack.c.bf16 %v2235_v15, %v2235_v15  ;;  %v2180_v13 = vsel %vm362_vm0, %v2148_v18, %v2132_v6  ;;  %v2335_v56 = vpack.c.bf16 %v6385_v40, %v6385_v40  ;;  %v2334_v5 = vpack.c.bf16 %v6351_v2, %v6351_v2 }
 0x35a   : > { %v2237_v20 = vsel %vm232_vm3, %v6514_v19, %v2180_v13  ;;  %v7751_v6 = vrot.slane %v6385_v40, 1  ;;  %v2336_v36 = vpack.c.bf16 %v6388_v51, %v6388_v51  ;;  %v2526_v29 = vpack.c.bf16 %v6573_v4, %v6573_v4 }
 0x35b   : > { %2596 = vrot.lane.b32.xlu0 %v2520_v53, %s4607_s25  ;;  %v2525_v22 = vpack.c.bf16 %v2237_v20, %v2237_v20  ;;  %v7753_v2 = vrot.slane %v6399_v61, 1  ;;  %v2337_v31 = vpack.c.bf16 %v6399_v61, %v6399_v61  ;;  %v2530_v57 = vpack.c.bf16 %v6629_v30, %v6629_v30 }
 0x35c   : > { %v2181_v18 = vsel %vm362_vm0, %v7751_v6, %v2133_v45  ;;  %v2339_v61 = vpack.c.bf16 %v6444_v38, %v6444_v38  ;;  %v2531_v30 = vpack.c.bf16 %v6643_v27, %v6643_v27  ;;  %v2340_v38 = vpack.c.bf16 %v6517_v44, %v6517_v44 }
 0x35d   : > { %v2239_v19 = vsel %vm232_vm3, %v6562_v28, %v2181_v18  ;;  %v2182_v40 = vsel %vm362_vm0, %v7753_v2, %v7752_v17  ;;  %v2532_v44 = vpack.c.bf16 %v6671_v12, %v6671_v12  ;;  %v2533_v53 = vpack.c.bf16 %v6686_v47, %v6686_v47 }
 0x35e   : > { %2408 = vrot.lane.b32.xlu2 %v2330_v21, %s4606_s24  ;;  %2598 = vrot.lane.b32.xlu1 %v2521_v35, %s4607_s25  ;;  %v2527_v45 = vpack.c.bf16 %v2239_v19, %v2239_v19  ;;  %v2241_v28 = vsel %vm232_vm3, %v6592_v1, %v2182_v40  ;;  %v2338_v1 = vpack.c.bf16 %v6437_v34, %v6437_v34 }
 0x35f   : > { %v2529_v4 = vpack.c.bf16 %v2241_v28, %v2241_v28  ;;  %v2341_v34 = vpack.c.bf16 %v6520_v37, %v6520_v37  ;;  %v2342_v21 = vpack.c.bf16 %v6549_v14, %v6549_v14  ;;  %v2535_v15 = vpack.c.bf16 %v6703_v46, %v6703_v46 }
 0x360   : > { %v2347_v20 = vpack.c.bf16 %v6152_v3, %v6152_v3 }
 0x363   : > { %2410 = vrot.lane.b32.xlu0 %v2331_v33, %s4606_s24  ;;  %v2534_v33 = vpack.c.bf16 %v6694_v26, %v6694_v26  ;;  %v2345_v26 = vpack.c.bf16 %v6599_v63, %v6599_v63  ;;  %v2537_v63 = vpack.c.bf16 %v6741_v52, %v6741_v52  ;;  %v2538_v52 = vpack.c.bf16 %v6753_v0, %v6753_v0 }
 0x366   : > { %2602 = vrot.lane.b32.xlu2 %v2523_v24, %s4607_s25  ;;  %2600 = vrot.lane.b32.xlu1 %v2522_v48, %s4607_s25  ;;  %v2343_v24 = vpack.c.bf16 %v6556_v16, %v6556_v16  ;;  %v2536_v16 = vpack.c.bf16 %v6727_v11, %v6727_v11 }
 0x36b   : > { %2412 = vrot.lane.b32.xlu0 %v2332_v49, %s4606_s24  ;;  %v2344_v49 = vpack.c.bf16 %v6596_v10, %v6596_v10 }
 0x36e   : > { %2604 = vrot.lane.b32.xlu2 %v2524_v23, %s4607_s25  ;;  %2414 = vrot.lane.b32.xlu1 %v2333_v62, %s4606_s24 }
 0x370   : > { %v2387_v50 = vpop.permute.xlu2 %2386 }
 0x371   : > { %2479 = vst.msk [vmem:[#allocation2 + $0x14] sm:$0xf] %vm693_vm5, %v2387_v50 }
 0x373   : > { %2606 = vrot.lane.b32.xlu0 %v2525_v22, %s4607_s25  ;;  %v2346_v22 = vpack.c.bf16 %v6612_v42, %v6612_v42  ;;  %v2539_v42 = vpack.c.bf16 %v6762_v9, %v6762_v9 }
 0x376   : > { %2418 = vrot.lane.b32.xlu2 %v2335_v56, %s4606_s24  ;;  %2416 = vrot.lane.b32.xlu1 %v2334_v5, %s4606_s24 }
 0x378   : > { %v2381_v8 = vpop.permute.xlu2 %2380 }
 0x379   : > { %2476 = vst.msk [vmem:[#allocation2 + $0x8] sm:$0xf] %vm693_vm5, %v2381_v8 }
 0x37b   : > { %2608 = vrot.lane.b32.xlu0 %v2526_v29, %s4607_s25 }
 0x37e   : > { %2420 = vrot.lane.b32.xlu2 %v2336_v36, %s4606_s24  ;;  %2610 = vrot.lane.b32.xlu1 %v2527_v45, %s4607_s25 }
 0x380   : > { %v2575_v60 = vpop.permute.xlu2 %2574 }
 0x383   : > { %2422 = vrot.lane.b32.xlu0 %v2337_v31, %s4606_s24 }
 0x386   : > { %2614 = vrot.lane.b32.xlu2 %v2529_v4, %s4607_s25  ;;  %2612 = vrot.lane.b32.xlu1 %v2528_v7, %s4607_s25 }
 0x388   : > { %v2581_v51 = vpop.permute.xlu2 %2580  ;;  %v2385_v25 = vpop.permute.xlu1 %2384 }
 0x389   : > { %2478 = vst.msk [vmem:[#allocation2 + $0x10] sm:$0xf] %vm693_vm5, %v2385_v25 }
 0x38b   : > { %2424 = vrot.lane.b32.xlu0 %v2338_v1, %s4606_s24 }
 0x38c   : > { %v2577_v55 = vpop.permute.xlu0 %2576 }
 0x38d   : > { %2670 = vst.msk [vmem:[#allocation2 + $0x10] sm:$0xf] %vm886_vm7, %v2577_v55 }
 0x38e   : > { %2616 = vrot.lane.b32.xlu2 %v2530_v57, %s4607_s25  ;;  %2426 = vrot.lane.b32.xlu1 %v2339_v61, %s4606_s24 }
 0x390   : > { %v2395_v58 = vpop.permute.xlu2 %2394  ;;  %v2579_v39 = vpop.permute.xlu1 %2578 }
 0x391   : > { %2483 = vst.msk [vmem:[#allocation2 + $0x24] sm:$0xf] %vm693_vm5, %v2395_v58 }
 0x392   : > { %2671 = vst.msk [vmem:[#allocation2 + $0x14] sm:$0xf] %vm886_vm7, %v2579_v39 }
 0x393   : > { %2618 = vrot.lane.b32.xlu0 %v2531_v30, %s4607_s25 }
 0x394   : > { %v2700_v43 = vld [vmem:[#allocation2 + $0x10] sm:$0xf] }
 0x395   : > { %v2383_v59 = vpop.permute.xlu0 %2382  ;;  %2702 = vst.msk [vmem:[#allocation2] sm:$0xf] %vm922_vm9, %v2700_v43 }
 0x396   : > { %2430 = vrot.lane.b32.xlu2 %v2341_v34, %s4606_s24  ;;  %2428 = vrot.lane.b32.xlu1 %v2340_v38, %s4606_s24  ;;  %2477 = vst.msk [vmem:[#allocation2 + $0xc] sm:$0xf] %vm693_vm5, %v2383_v59 }
 0x397   : > { %2669 = vst.msk [vmem:[#allocation2 + $0xc] sm:$0xf] %vm886_vm7, %v2575_v60 }
 0x398   : > { %v2397_v54 = vpop.permute.xlu2 %2396  ;;  %v2573_v27 = vpop.permute.xlu1 %2572 }
 0x399   : > { %2484 = vst.msk [vmem:[#allocation2 + $0x28] sm:$0xf] %vm693_vm5, %v2397_v54  ;;  %v2701_v37 = vld [vmem:[#allocation2 + $0x14] sm:$0xf] }
 0x39a   : > { %v4563_v41 = vld [vmem:[#allocation2 + $0x10] sm:$0xff]  ;;  %2703 = vst.msk [vmem:[#allocation2 + $0x4] sm:$0xf] %vm922_vm9, %v2701_v37 }
 0x39b   : > { %4458 = vmatmul.msk.bf16.vlgmr.msrb.gmra.mxu1 %vm1085_vm8, %v4563_v41  ;;  %2668 = vst.msk [vmem:[#allocation2 + $0x8] sm:$0xf] %vm886_vm7, %v2573_v27  ;;  %2620 = vrot.lane.b32.xlu0 %v2532_v44, %s4607_s25  ;;  %v4547_v56 = vld [vmem:[#allocation2 + $0x10] sm:$0xff] }
 0x39c   : > { %v4531_v29 = vld [vmem:[#allocation2 + $0x10] sm:$0xff] }
 0x39d   : > { %v2389_v35 = vpop.permute.xlu0 %2388 }
 0x39e   : > { %2432 = vrot.lane.b32.xlu2 %v2342_v21, %s4606_s24  ;;  %2622 = vrot.lane.b32.xlu1 %v2533_v53, %s4607_s25  ;;  %2480 = vst.msk [vmem:[#allocation2 + $0x18] sm:$0xf] %vm693_vm5, %v2389_v35 }
 0x39f   : > { %2672 = vst.msk [vmem:[#allocation2 + $0x18] sm:$0xf] %vm886_vm7, %v2581_v51 }
 0x3a0   : > { %v2591_v32 = vpop.permute.xlu2 %2590  ;;  %v2391_v14 = vpop.permute.xlu1 %2390 }
 0x3a1   : > { %v4529_v12 = vld [vmem:[#allocation2] sm:$0xff]  ;;  %2481 = vst.msk [vmem:[#allocation2 + $0x1c] sm:$0xf] %vm693_vm5, %v2391_v14 }
 0x3a2   : > { %4372 = vmatmul.msk.bf16.vlgmr.msrb.gmra.mxu0 %vm1085_vm8, %v4529_v12  ;;  %v4546_v47 = vld [vmem:[#allocation2 + $0x8] sm:$0xff] }
 0x3a3   : > { %2434 = vrot.lane.b32.xlu0 %v2343_v24, %s4606_s24  ;;  %4288 = vmatmul.msk.bf16.vlgmr.msrb.gmra.mxu3 %vm1085_vm8, %v4546_v47  ;;  %v4530_v10 = vld [vmem:[#allocation2 + $0x8] sm:$0xff] }
 0x3a5   : > { %v2583_v23 = vpop.permute.xlu0 %2582 }
 0x3a6   : > { %2626 = vrot.lane.b32.xlu2 %v2535_v15, %s4607_s25  ;;  %2624 = vrot.lane.b32.xlu1 %v2534_v33, %s4607_s25  ;;  %2673 = vst.msk [vmem:[#allocation2 + $0x1c] sm:$0xf] %vm886_vm7, %v2583_v23 }
 0x3a8   : > { %v2593_v48 = vpop.permute.xlu2 %2592  ;;  %v2393_v46 = vpop.permute.xlu1 %2392 }
 0x3a9   : > { %2482 = vst.msk [vmem:[#allocation2 + $0x20] sm:$0xf] %vm693_vm5, %v2393_v46 }
 0x3ab   : > { %2436 = vrot.lane.b32.xlu0 %v2344_v49, %s4606_s24 }
 0x3ad   : > { %v2585_v13 = vpop.permute.xlu0 %2584  ;;  %v4564_v50 = vld [vmem:[#allocation2 + $0x18] sm:$0xff] }
 0x3ae   : > { %2628 = vrot.lane.b32.xlu2 %v2536_v16, %s4607_s25  ;;  %2438 = vrot.lane.b32.xlu1 %v2345_v26, %s4606_s24  ;;  %2674 = vst.msk [vmem:[#allocation2 + $0x20] sm:$0xf] %vm886_vm7, %v2585_v13  ;;  %v4548_v0 = vld [vmem:[#allocation2 + $0x18] sm:$0xff] }
 0x3af   : > { %4459 = vmatmul.msk.bf16.gmra.mxu1 %vm1085_vm8, %v4564_v50  ;;  %v4532_v4 = vld [vmem:[#allocation2 + $0x18] sm:$0xff] }
 0x3b0   : > { %v2407_v62 = vpop.permute.xlu2 %2406  ;;  %v2587_v11 = vpop.permute.xlu1 %2586 }
 0x3b1   : > { %2489 = vst.msk [vmem:[#allocation2 + $0x3c] sm:$0xf] %vm693_vm5, %v2407_v62 }
 0x3b2   : > { %2675 = vst.msk [vmem:[#allocation2 + $0x24] sm:$0xf] %vm886_vm7, %v2587_v11  ;;  %4373 = vmatmul.msk.bf16.gmra.mxu0 %vm1085_vm8, %v4530_v10 }
 0x3b3   : > { %2630 = vrot.lane.b32.xlu0 %v2537_v63, %s4607_s25  ;;  %4289 = vmatmul.msk.bf16.gmra.mxu3 %vm1085_vm8, %v4547_v56 }
 0x3b5   : > { %v2399_v8 = vpop.permute.xlu0 %2398 }
 0x3b6   : > { %2442 = vrot.lane.b32.xlu2 %v2347_v20, %s4606_s24  ;;  %2440 = vrot.lane.b32.xlu1 %v2346_v22, %s4606_s24  ;;  %2485 = vst.msk [vmem:[#allocation2 + $0x2c] sm:$0xf] %vm693_vm5, %v2399_v8 }
 0x3b7   : > { %2677 = vst.msk [vmem:[#allocation2 + $0x2c] sm:$0xf] %vm886_vm7, %v2591_v32 }
 0x3b8   : > { %v2409_v5 = vpop.permute.xlu2 %2408  ;;  %v2589_v3 = vpop.permute.xlu1 %2588 }
 0x3b9   : > { %2490 = vst.msk [vmem:[#allocation2 + $0x40] sm:$0xf] %vm693_vm5, %v2409_v5  ;;  %v4565_v19 = vld [vmem:[#allocation2 + $0x20] sm:$0xff] }
 0x3ba   : > { %2676 = vst.msk [vmem:[#allocation2 + $0x28] sm:$0xf] %vm886_vm7, %v2589_v3  ;;  %v4549_v31 = vld [vmem:[#allocation2 + $0x20] sm:$0xff] }
 0x3bb   : > { %2632 = vrot.lane.b32.xlu0 %v2538_v52, %s4607_s25  ;;  %v4533_v55 = vld [vmem:[#allocation2 + $0x20] sm:$0xff] }
 0x3bd   : > { %v2401_v18 = vpop.permute.xlu0 %2400 }
 0x3be   : > { %2634 = vrot.lane.b32.xlu1 %v2539_v42, %s4607_s25  ;;  %2486 = vst.msk [vmem:[#allocation2 + $0x30] sm:$0xf] %vm693_vm5, %v2401_v18 }
 0x3bf   : > { %2678 = vst.msk [vmem:[#allocation2 + $0x30] sm:$0xf] %vm886_vm7, %v2593_v48  ;;  %4460 = vmatmul.msk.bf16.gmra.mxu1 %vm1085_vm8, %v4565_v19 }
 0x3c0   : > { %v2603_v6 = vpop.permute.xlu2 %2602  ;;  %v2403_v36 = vpop.permute.xlu1 %2402 }
 0x3c1   : > { %2487 = vst.msk [vmem:[#allocation2 + $0x34] sm:$0xf] %vm693_vm5, %v2403_v36  ;;  %v4566_v60 = vld [vmem:[#allocation2 + $0x28] sm:$0xff] }
 0x3c2   : > { %4374 = vmatmul.msk.bf16.gmra.mxu0 %vm1085_vm8, %v4531_v29  ;;  %v4550_v39 = vld [vmem:[#allocation2 + $0x28] sm:$0xff] }
 0x3c3   : > { %4290 = vmatmul.msk.bf16.gmra.mxu3 %vm1085_vm8, %v4548_v0  ;;  %v4534_v27 = vld [vmem:[#allocation2 + $0x28] sm:$0xff] }
 0x3c5   : > { %v2595_v17 = vpop.permute.xlu0 %2594 }
 0x3c6   : > { %2679 = vst.msk [vmem:[#allocation2 + $0x34] sm:$0xf] %vm886_vm7, %v2595_v17 }
 0x3c8   : > { %v2605_v9 = vpop.permute.xlu2 %2604  ;;  %v2405_v2 = vpop.permute.xlu1 %2404 }
 0x3c9   : > { %2488 = vst.msk [vmem:[#allocation2 + $0x38] sm:$0xf] %vm693_vm5, %v2405_v2 }
 0x3cd   : > { %v2597_v45 = vpop.permute.xlu0 %2596  ;;  %v4567_v61 = vld [vmem:[#allocation2 + $0x30] sm:$0xff] }
 0x3ce   : > { %2680 = vst.msk [vmem:[#allocation2 + $0x38] sm:$0xf] %vm886_vm7, %v2597_v45  ;;  %v4551_v41 = vld [vmem:[#allocation2 + $0x30] sm:$0xff] }
 0x3cf   : > { %4461 = vmatmul.msk.bf16.gmra.mxu1 %vm1085_vm8, %v4566_v60  ;;  %v4535_v15 = vld [vmem:[#allocation2 + $0x30] sm:$0xff] }
 0x3d0   : > { %v2419_v40 = vpop.permute.xlu2 %2418  ;;  %v2599_v28 = vpop.permute.xlu1 %2598 }
 0x3d1   : > { %2495 = vst.msk [vmem:[#allocation2 + $0x54] sm:$0xf] %vm693_vm5, %v2419_v40 }
 0x3d2   : > { %2681 = vst.msk [vmem:[#allocation2 + $0x3c] sm:$0xf] %vm886_vm7, %v2599_v28  ;;  %4375 = vmatmul.msk.bf16.gmra.mxu0 %vm1085_vm8, %v4532_v4 }
 0x3d3   : > { %4291 = vmatmul.msk.bf16.gmra.mxu3 %vm1085_vm8, %v4549_v31 }
 0x3d5   : > { %v2411_v51 = vpop.permute.xlu0 %2410 }
 0x3d6   : > { %2491 = vst.msk [vmem:[#allocation2 + $0x44] sm:$0xf] %vm693_vm5, %v2411_v51 }
 0x3d7   : > { %2683 = vst.msk [vmem:[#allocation2 + $0x44] sm:$0xf] %vm886_vm7, %v2603_v6 }
 0x3d8   : > { %v2421_v7 = vpop.permute.xlu2 %2420  ;;  %v2601_v25 = vpop.permute.xlu1 %2600 }
 0x3d9   : > { %2496 = vst.msk [vmem:[#allocation2 + $0x58] sm:$0xf] %vm693_vm5, %v2421_v7  ;;  %v4568_v59 = vld [vmem:[#allocation2 + $0x38] sm:$0xff] }
 0x3da   : > { %2682 = vst.msk [vmem:[#allocation2 + $0x40] sm:$0xf] %vm886_vm7, %v2601_v25  ;;  %v4552_v24 = vld [vmem:[#allocation2 + $0x38] sm:$0xff] }
 0x3db   : > { %v4536_v26 = vld [vmem:[#allocation2 + $0x38] sm:$0xff] }
 0x3dd   : > { %v2413_v1 = vpop.permute.xlu0 %2412 }
 0x3de   : > { %2492 = vst.msk [vmem:[#allocation2 + $0x48] sm:$0xf] %vm693_vm5, %v2413_v1 }
 0x3df   : > { %2684 = vst.msk [vmem:[#allocation2 + $0x48] sm:$0xf] %vm886_vm7, %v2605_v9  ;;  %4462 = vmatmul.msk.bf16.gmra.mxu1 %vm1085_vm8, %v4567_v61 }
 0x3e0   : > { %v2615_v57 = vpop.permute.xlu2 %2614  ;;  %v2415_v58 = vpop.permute.xlu1 %2414 }
 0x3e1   : > { %2493 = vst.msk [vmem:[#allocation2 + $0x4c] sm:$0xf] %vm693_vm5, %v2415_v58  ;;  %v4569_v14 = vld [vmem:[#allocation2 + $0x40] sm:$0xff] }
 0x3e2   : > { %4376 = vmatmul.msk.bf16.gmra.mxu0 %vm1085_vm8, %v4533_v55  ;;  %v4553_v62 = vld [vmem:[#allocation2 + $0x40] sm:$0xff] }
 0x3e3   : > { %4292 = vmatmul.msk.bf16.gmra.mxu3 %vm1085_vm8, %v4550_v39  ;;  %v4537_v22 = vld [vmem:[#allocation2 + $0x40] sm:$0xff] }
 0x3e5   : > { %v2607_v30 = vpop.permute.xlu0 %2606 }
 0x3e6   : > { %2685 = vst.msk [vmem:[#allocation2 + $0x4c] sm:$0xf] %vm886_vm7, %v2607_v30 }
 0x3e8   : > { %v2617_v34 = vpop.permute.xlu2 %2616  ;;  %v2417_v38 = vpop.permute.xlu1 %2416 }
 0x3e9   : > { %2494 = vst.msk [vmem:[#allocation2 + $0x50] sm:$0xf] %vm693_vm5, %v2417_v38 }
 0x3ed   : > { %v2609_v43 = vpop.permute.xlu0 %2608  ;;  %v4570_v16 = vld [vmem:[#allocation2 + $0x48] sm:$0xff] }
 0x3ee   : > { %2686 = vst.msk [vmem:[#allocation2 + $0x50] sm:$0xf] %vm886_vm7, %v2609_v43  ;;  %v4554_v5 = vld [vmem:[#allocation2 + $0x48] sm:$0xff] }
 0x3ef   : > { %4463 = vmatmul.msk.bf16.gmra.mxu1 %vm1085_vm8, %v4568_v59  ;;  %v4538_v60 = vld [vmem:[#allocation2 + $0x48] sm:$0xff] }
 0x3f0   : > { %v2431_v54 = vpop.permute.xlu2 %2430  ;;  %v2611_v37 = vpop.permute.xlu1 %2610 }
 0x3f1   : > { %2501 = vst.msk [vmem:[#allocation2 + $0x6c] sm:$0xf] %vm693_vm5, %v2431_v54 }
 0x3f2   : > { %2687 = vst.msk [vmem:[#allocation2 + $0x54] sm:$0xf] %vm886_vm7, %v2611_v37  ;;  %4377 = vmatmul.msk.bf16.gmra.mxu0 %vm1085_vm8, %v4534_v27 }
 0x3f3   : > { %4293 = vmatmul.msk.bf16.gmra.mxu3 %vm1085_vm8, %v4551_v41 }
 0x3f5   : > { %v2423_v44 = vpop.permute.xlu0 %2422 }
 0x3f6   : > { %2497 = vst.msk [vmem:[#allocation2 + $0x5c] sm:$0xf] %vm693_vm5, %v2423_v44 }
 0x3f7   : > { %2689 = vst.msk [vmem:[#allocation2 + $0x5c] sm:$0xf] %vm886_vm7, %v2615_v57 }
 0x3f8   : > { %v2433_v21 = vpop.permute.xlu2 %2432  ;;  %v2613_v53 = vpop.permute.xlu1 %2612 }
 0x3f9   : > { %2502 = vst.msk [vmem:[#allocation2 + $0x70] sm:$0xf] %vm693_vm5, %v2433_v21  ;;  %v4571_v20 = vld [vmem:[#allocation2 + $0x50] sm:$0xff] }
 0x3fa   : > { %2688 = vst.msk [vmem:[#allocation2 + $0x58] sm:$0xf] %vm886_vm7, %v2613_v53  ;;  %v4555_v4 = vld [vmem:[#allocation2 + $0x50] sm:$0xff] }
 0x3fd   : > { %v2425_v35 = vpop.permute.xlu0 %2424 }
 0x3fe   : > { %2498 = vst.msk [vmem:[#allocation2 + $0x60] sm:$0xf] %vm693_vm5, %v2425_v35 }
 0x3ff   : > { %2690 = vst.msk [vmem:[#allocation2 + $0x60] sm:$0xf] %vm886_vm7, %v2617_v34  ;;  %4464 = vmatmul.msk.bf16.gmra.mxu1 %vm1085_vm8, %v4569_v14  ;;  %v4539_v34 = vld [vmem:[#allocation2 + $0x50] sm:$0xff] }
 0x400   : > { %v2627_v32 = vpop.permute.xlu2 %2626  ;;  %v2427_v12 = vpop.permute.xlu1 %2426 }
 0x401   : > { %2499 = vst.msk [vmem:[#allocation2 + $0x64] sm:$0xf] %vm693_vm5, %v2427_v12  ;;  %v4572_v9 = vld [vmem:[#allocation2 + $0x58] sm:$0xff] }
 0x402   : > { %4378 = vmatmul.msk.bf16.gmra.mxu0 %vm1085_vm8, %v4535_v15  ;;  %v4556_v38 = vld [vmem:[#allocation2 + $0x58] sm:$0xff] }
 0x403   : > { %4294 = vmatmul.msk.bf16.gmra.mxu3 %vm1085_vm8, %v4552_v24  ;;  %v4540_v14 = vld [vmem:[#allocation2 + $0x58] sm:$0xff] }
 0x405   : > { %v2619_v33 = vpop.permute.xlu0 %2618 }
 0x406   : > { %2691 = vst.msk [vmem:[#allocation2 + $0x64] sm:$0xf] %vm886_vm7, %v2619_v33 }
 0x408   : > { %v2629_v47 = vpop.permute.xlu2 %2628  ;;  %v2429_v48 = vpop.permute.xlu1 %2428 }
 0x409   : > { %2500 = vst.msk [vmem:[#allocation2 + $0x68] sm:$0xf] %vm693_vm5, %v2429_v48 }
 0x40d   : > { %v2621_v46 = vpop.permute.xlu0 %2620  ;;  %v4573_v61 = vld [vmem:[#allocation2 + $0x60] sm:$0xff] }
 0x40e   : > { %2692 = vst.msk [vmem:[#allocation2 + $0x68] sm:$0xf] %vm886_vm7, %v2621_v46  ;;  %v4557_v15 = vld [vmem:[#allocation2 + $0x60] sm:$0xff] }
 0x40f   : > { %4465 = vmatmul.msk.bf16.gmra.mxu1 %vm1085_vm8, %v4570_v16 }
 0x410   : > { %v2443_v23 = vpop.permute.xlu2 %2442  ;;  %v2623_v49 = vpop.permute.xlu1 %2622 }
 0x411   : > { %2507 = vst.msk [vmem:[#allocation2 + $0x84] sm:$0xf] %vm693_vm5, %v2443_v23 }
 0x412   : > { %2693 = vst.msk [vmem:[#allocation2 + $0x6c] sm:$0xf] %vm886_vm7, %v2623_v49  ;;  %4379 = vmatmul.msk.bf16.gmra.mxu0 %vm1085_vm8, %v4536_v26 }
 0x413   : > { %4295 = vmatmul.msk.bf16.gmra.mxu3 %vm1085_vm8, %v4553_v62 }
 0x415   : > { %v2435_v13 = vpop.permute.xlu0 %2434 }
 0x416   : > { %2503 = vst.msk [vmem:[#allocation2 + $0x74] sm:$0xf] %vm693_vm5, %v2435_v13  ;;  %v4541_v13 = vld [vmem:[#allocation2 + $0x60] sm:$0xff] }
 0x417   : > { %2695 = vst.msk [vmem:[#allocation2 + $0x74] sm:$0xf] %vm886_vm7, %v2627_v32 }
 0x418   : > { %v2625_v50 = vpop.permute.xlu1 %2624  ;;  %v3407_v11 = vpop.f32.mrf.mxu1 }
 0x419   : > { %2694 = vst.msk [vmem:[#allocation2 + $0x70] sm:$0xf] %vm886_vm7, %v2625_v50  ;;  %v4574_v44 = vld [vmem:[#allocation2 + $0x68] sm:$0xff] }
 0x41d   : > { %v2437_v10 = vpop.permute.xlu0 %2436 }
 0x41e   : > { %2504 = vst.msk [vmem:[#allocation2 + $0x78] sm:$0xf] %vm693_vm5, %v2437_v10 }
 0x41f   : > { %v3147_v63 = vpop.f32.mrf.mxu0  ;;  %2696 = vst.msk [vmem:[#allocation2 + $0x78] sm:$0xf] %vm886_vm7, %v2629_v47  ;;  %4466 = vmatmul.msk.bf16.gmra.mxu1 %vm1085_vm8, %v4571_v20 }
 0x420   : > { %v2439_v56 = vpop.permute.xlu1 %2438  ;;  %v3409_v8 = vpop.f32.mrf.mxu1  ;;  %v4575_v16 = vld [vmem:[#allocation2 + $0x70] sm:$0xff] }
 0x421   : > { %2505 = vst.msk [vmem:[#allocation2 + $0x7c] sm:$0xf] %vm693_vm5, %v2439_v56 }
 0x422   : > { %4380 = vmatmul.msk.bf16.gmra.mxu0 %vm1085_vm8, %v4537_v22 }
 0x423   : > { %4296 = vmatmul.msk.bf16.gmra.mxu3 %vm1085_vm8, %v4554_v5 }
 0x425   : > { %v2631_v3 = vpop.permute.xlu0 %2630 }
 0x426   : > { %2697 = vst.msk [vmem:[#allocation2 + $0x7c] sm:$0xf] %vm886_vm7, %v2631_v3  ;;  %v2922_v52 = vpop.f32.mrf.mxu3  ;;  %v2704_v54 = vld [vmem:[#allocation2 + $0x78] sm:$0xf] }
 0x427   : > { %v3149_v42 = vpop.f32.mrf.mxu0  ;;  %v3148_v6 = vadd.f32 %v3147_v63, %v2922_v52  ;;  %2706 = vst.msk [vmem:[#allocation2 + $0x88] sm:$0xf] %vm922_vm9, %v2704_v54 }
 0x428   : > { %v2441_v18 = vpop.permute.xlu1 %2440 }
 0x429   : > { %2506 = vst.msk [vmem:[#allocation2 + $0x80] sm:$0xf] %vm693_vm5, %v2441_v18  ;;  %v7001_v19 = vadd.f32 %v3407_v11, %v3148_v6  ;;  %v4558_v11 = vld [vmem:[#allocation2 + $0x68] sm:$0xff] }
 0x42a   : > { %v4542_v6 = vld [vmem:[#allocation2 + $0x68] sm:$0xff] }
 0x42c   : > { %v3412_v36 = vpop.f32.mrf.mxu1 }
 0x42d   : > { %v2705_v29 = vld [vmem:[#allocation2 + $0x7c] sm:$0xf]  ;;  %v2633_v0 = vpop.permute.xlu0 %2632 }
 0x42e   : > { %2707 = vst.msk [vmem:[#allocation2 + $0x8c] sm:$0xf] %vm922_vm9, %v2705_v29  ;;  %v2924_v17 = vpop.f32.mrf.mxu3 }
 0x42f   : > { %v3152_v2 = vpop.f32.mrf.mxu0  ;;  %2698 = vst.msk [vmem:[#allocation2 + $0x80] sm:$0xf] %vm886_vm7, %v2633_v0  ;;  %v3150_v40 = vadd.f32 %v3149_v42, %v2924_v17  ;;  %4467 = vmatmul.msk.bf16.gmra.mxu1 %vm1085_vm8, %v4572_v9 }
 0x430   : > { %v2635_v45 = vpop.permute.xlu1 %2634 }
 0x431   : > { %2699 = vst.msk [vmem:[#allocation2 + $0x84] sm:$0xf] %vm886_vm7, %v2635_v45  ;;  %v7007_v28 = vadd.f32 %v3409_v8, %v3150_v40  ;;  %v4576_v8 = vld [vmem:[#allocation2 + $0x78] sm:$0xff] }
 0x432   : > { %4381 = vmatmul.msk.bf16.gmra.mxu0 %vm1085_vm8, %v4538_v60 }
 0x433   : > { %4297 = vmatmul.msk.bf16.gmra.mxu3 %vm1085_vm8, %v4555_v4 }
 0x434   : > { %v3414_v31 = vpop.f32.mrf.mxu1 }
 0x436   : > { %v2927_v7 = vpop.f32.mrf.mxu3 }
 0x437   : > { %v3154_v51 = vpop.f32.mrf.mxu0  ;;  %v3153_v25 = vadd.f32 %v3152_v2, %v2927_v7  ;;  %v4543_v7 = vld [vmem:[#allocation2 + $0x70] sm:$0xff] }
 0x438   : > { %v4577_v45 = vld [vmem:[#allocation2 + $0x80] sm:$0xff] }
 0x439   : > { %v7011_v57 = vadd.f32 %v3412_v36, %v3153_v25  ;;  %v4559_v36 = vld [vmem:[#allocation2 + $0x70] sm:$0xff]  ;;  %v4560_v25 = vld [vmem:[#allocation2 + $0x78] sm:$0xff] }
 0x43c   : > { %v3417_v1 = vpop.f32.mrf.mxu1 }
 0x43e   : > { %v2929_v58 = vpop.f32.mrf.mxu3 }
 0x43f   : > { %v3157_v55 = vpop.f32.mrf.mxu0  ;;  %v3155_v39 = vadd.f32 %v3154_v51, %v2929_v58  ;;  %4468 = vmatmul.msk.bf16.gmra.mxu1 %vm1085_vm8, %v4573_v61 }
 0x441   : > { %v7014_v30 = vadd.f32 %v3414_v31, %v3155_v39 }
 0x442   : > { %4382 = vmatmul.msk.bf16.gmra.mxu0 %vm1085_vm8, %v4539_v34 }
 0x443   : > { %4298 = vmatmul.msk.bf16.gmra.mxu3 %vm1085_vm8, %v4556_v38  ;;  %v4578_v38 = vld [vmem:[#allocation2 + $0x88] sm:$0xff] }
 0x444   : > { %v3419_v43 = vpop.f32.mrf.mxu1 }
 0x446   : > { %v2932_v59 = vpop.f32.mrf.mxu3 }
 0x447   : > { %v3159_v37 = vpop.f32.mrf.mxu0  ;;  %v3158_v27 = vadd.f32 %v3157_v55, %v2932_v59 }
 0x449   : > { %v7019_v41 = vadd.f32 %v3417_v1, %v3158_v27 }
 0x44c   : > { %v3422_v21 = vpop.f32.mrf.mxu1 }
 0x44e   : > { %v2934_v53 = vpop.f32.mrf.mxu3 }
 0x44f   : > { %v3162_v32 = vpop.f32.mrf.mxu0  ;;  %v3160_v35 = vadd.f32 %v3159_v37, %v2934_v53  ;;  %4469 = vmatmul.msk.bf16.gmra.mxu1 %vm1085_vm8, %v4574_v44  ;;  %v4544_v37 = vld [vmem:[#allocation2 + $0x78] sm:$0xff] }
 0x451   : > { %v7022_v12 = vadd.f32 %v3419_v43, %v3160_v35 }
 0x452   : > { %4383 = vmatmul.msk.bf16.gmra.mxu0 %vm1085_vm8, %v4540_v14 }
 0x453   : > { %4299 = vmatmul.msk.bf16.gmra.mxu3 %vm1085_vm8, %v4557_v15 }
 0x454   : > { %v3424_v24 = vpop.f32.mrf.mxu1 }
 0x456   : > { %v2937_v47 = vpop.f32.mrf.mxu3 }
 0x457   : > { %v3164_v33 = vpop.f32.mrf.mxu0  ;;  %v3163_v48 = vadd.f32 %v3162_v32, %v2937_v47 }
 0x459   : > { %v7026_v23 = vadd.f32 %v3422_v21, %v3163_v48  ;;  %v4561_v21 = vld [vmem:[#allocation2 + $0x80] sm:$0xff] }
 0x45c   : > { %v3427_v46 = vpop.f32.mrf.mxu1 }
 0x45e   : > { %v2939_v49 = vpop.f32.mrf.mxu3 }
 0x45f   : > { %v3167_v26 = vpop.f32.mrf.mxu0  ;;  %v3165_v62 = vadd.f32 %v3164_v33, %v2939_v49  ;;  %4470 = vmatmul.msk.bf16.gmra.mxu1 %vm1085_vm8, %v4575_v16 }
 0x461   : > { %v7029_v50 = vadd.f32 %v3424_v24, %v3165_v62 }
 0x462   : > { %4384 = vmatmul.msk.bf16.gmra.mxu0 %vm1085_vm8, %v4541_v13 }
 0x463   : > { %4300 = vmatmul.msk.bf16.gmra.mxu3 %vm1085_vm8, %v4558_v11 }
 0x464   : > { %v3429_v10 = vpop.f32.mrf.mxu1 }
 0x466   : > { %v2942_v20 = vpop.f32.mrf.mxu3 }
 0x467   : > { %v3169_v63 = vpop.f32.mrf.mxu0  ;;  %v3168_v56 = vadd.f32 %v3167_v26, %v2942_v20 }
 0x469   : > { %v7033_v22 = vadd.f32 %v3427_v46, %v3168_v56 }
 0x46c   : > { %v3432_v5 = vpop.f32.mrf.mxu1 }
 0x46e   : > { %v2944_v3 = vpop.f32.mrf.mxu3 }
 0x46f   : > { %v3172_v52 = vpop.f32.mrf.mxu0  ;;  %v3170_v42 = vadd.f32 %v3169_v63, %v2944_v3  ;;  %4471 = vmatmul.msk.bf16.gmra.mxu1 %vm1085_vm8, %v4576_v8 }
 0x471   : > { %v7036_v18 = vadd.f32 %v3429_v10, %v3170_v42 }
 0x472   : > { %4385 = vmatmul.msk.bf16.gmra.mxu0 %vm1085_vm8, %v4542_v6 }
 0x473   : > { %4301 = vmatmul.msk.bf16.gmra.mxu3 %vm1085_vm8, %v4559_v36 }
 0x474   : > { %v3434_v29 = vpop.f32.mrf.mxu1 }
 0x476   : > { %v2947_v0 = vpop.f32.mrf.mxu3 }
 0x477   : > { %v3174_v9 = vpop.f32.mrf.mxu0  ;;  %v3173_v17 = vadd.f32 %v3172_v52, %v2947_v0 }
 0x479   : > { %v7040_v2 = vadd.f32 %v3432_v5, %v3173_v17 }
 0x47c   : > { %v3437_v40 = vpop.f32.mrf.mxu1 }
 0x47e   : > { %v2949_v60 = vpop.f32.mrf.mxu3 }
 0x47f   : > { %v3177_v4 = vpop.f32.mrf.mxu0  ;;  %v3175_v31 = vadd.f32 %v3174_v9, %v2949_v60  ;;  %4472 = vmatmul.msk.bf16.gmra.mxu1 %vm1085_vm8, %v4577_v45 }
 0x481   : > { %v7043_v51 = vadd.f32 %v3434_v29, %v3175_v31 }
 0x482   : > { %4386 = vmatmul.msk.bf16.gmra.mxu0 %vm1085_vm8, %v4543_v7 }
 0x483   : > { %4302 = vmatmul.msk.bf16.gmra.mxu3 %vm1085_vm8, %v4560_v25 }
 0x484   : > { %v3439_v1 = vpop.f32.mrf.mxu1 }
 0x486   : > { %v2952_v61 = vpop.f32.mrf.mxu3 }
 0x487   : > { %v3179_v58 = vpop.f32.mrf.mxu0  ;;  %v3178_v55 = vadd.f32 %v3177_v4, %v2952_v61 }
 0x489   : > { %v7047_v39 = vadd.f32 %v3437_v40, %v3178_v55 }
 0x48c   : > { %v3442_v34 = vpop.f32.mrf.mxu1 }
 0x48e   : > { %v2954_v54 = vpop.f32.mrf.mxu3 }
 0x48f   : > { %v3182_v43 = vpop.f32.mrf.mxu0  ;;  %v3180_v59 = vadd.f32 %v3179_v58, %v2954_v54  ;;  %4473 = vmatmul.msk.bf16.gmra.mxu1 %vm1085_vm8, %v4578_v38  ;;  %v7093_v38 = vld [vmem:[%s7707_s4] ss:$0 sm:$0xff] }
 0x490   : > { %v7097_v54 = vadd.f32 %v7093_v38, %v7007_v28  ;;  %v7117_v28 = vadd.f32 %v7093_v38, %v7014_v30 }
 0x491   : > { %v7050_v27 = vadd.f32 %v3439_v1, %v3180_v59  ;;  %v7103_v59 = vadd.f32 %v7093_v38, %v7001_v19 }
 0x492   : > { %4387 = vmatmul.msk.bf16.gmra.mxu0 %vm1085_vm8, %v4544_v37  ;;  %v7107_v37 = vadd.f32 %v7093_v38, %v7011_v57  ;;  %v7125_v57 = vadd.f32 %v7093_v38, %v7019_v41 }
 0x493   : > { %4303 = vmatmul.msk.bf16.gmra.mxu3 %vm1085_vm8, %v4561_v21 }
 0x494   : > { %v3444_v44 = vpop.f32.mrf.mxu1  ;;  %v3558_v19 = vsel %vm1780_vm10, %v7107_v37, 0.0 }
 0x496   : > { %v2957_v53 = vpop.f32.mrf.mxu3 }
 0x497   : > { %v3184_v32 = vpop.f32.mrf.mxu0  ;;  %v3183_v35 = vadd.f32 %v3182_v43, %v2957_v53  ;;  %v3556_v53 = vsel %vm1780_vm10, %v7097_v54, 0.0 }
 0x499   : > { %v7054_v14 = vadd.f32 %v3442_v34, %v3183_v35 }
 0x49c   : > { %v3447_v15 = vpop.f32.mrf.mxu1 }
 0x49e   : > { %v2959_v24 = vpop.f32.mrf.mxu3 }
 0x49f   : > { %v3187_v47 = vpop.f32.mrf.mxu0  ;;  %v3185_v33 = vadd.f32 %v3184_v32, %v2959_v24  ;;  %v3555_v32 = vsel %vm1780_vm10, %v7103_v59, 0.0  ;;  %v7131_v24 = vadd.f32 %v7093_v38, %v7022_v12  ;;  %v7147_v12 = vadd.f32 %v7093_v38, %v7029_v50 }
 0x4a0   : > { %v3557_v35 = vadd.f32 %v3556_v53, %v3555_v32  ;;  %v7185_v32 = vadd.f32 %v7093_v38, %v7050_v27 }
 0x4a1   : > { %v7056_v48 = vadd.f32 %v3444_v44, %v3185_v33  ;;  %v7137_v33 = vadd.f32 %v7093_v38, %v7026_v23  ;;  %v7153_v23 = vadd.f32 %v7093_v38, %v7033_v22 }
 0x4a2   : > { %v3559_v30 = vadd.f32 %v3558_v19, %v3557_v35  ;;  %v7191_v35 = vadd.f32 %v7093_v38, %v7054_v14 }
 0x4a3   : > { %v3570_v50 = vsel %vm1780_vm10, %v7153_v23, 0.0 }
 0x4a4   : > { %v3449_v46 = vpop.f32.mrf.mxu1 }
 0x4a6   : > { %v2962_v16 = vpop.f32.mrf.mxu3 }
 0x4a7   : > { %v3189_v49 = vpop.f32.mrf.mxu0  ;;  %v3188_v26 = vadd.f32 %v3187_v47, %v2962_v16  ;;  %v3562_v47 = vsel %vm1780_vm10, %v7125_v57, 0.0 }
 0x4a9   : > { %v7058_v62 = vadd.f32 %v3447_v15, %v3188_v26  ;;  %v3560_v15 = vsel %vm1780_vm10, %v7117_v28, 0.0  ;;  %v3564_v26 = vsel %vm1780_vm10, %v7131_v24, 0.0 }
 0x4aa   : > { %v3561_v41 = vadd.f32 %v3560_v15, %v3559_v30 }
 0x4ac   : > { %v3452_v13 = vpop.f32.mrf.mxu1 }
 0x4ae   : > { %v2964_v11 = vpop.f32.mrf.mxu3 }
 0x4af   : > { %v3192_v10 = vpop.f32.mrf.mxu0  ;;  %v3190_v20 = vadd.f32 %v3189_v49, %v2964_v11  ;;  %v3566_v11 = vsel %vm1780_vm10, %v7137_v33, 0.0 }
 0x4b1   : > { %v7060_v63 = vadd.f32 %v3449_v46, %v3190_v20  ;;  %v3568_v20 = vsel %vm1780_vm10, %v7147_v12, 0.0 }
 0x4b4   : > { %v3454_v56 = vpop.f32.mrf.mxu1 }
 0x4b6   : > { %v2967_v5 = vpop.f32.mrf.mxu3 }
 0x4b7   : > { %v3194_v8 = vpop.f32.mrf.mxu0  ;;  %v3193_v3 = vadd.f32 %v3192_v10, %v2967_v5 }
 0x4b9   : > { %v7062_v52 = vadd.f32 %v3452_v13, %v3193_v3  ;;  %v3563_v13 = vadd.f32 %v3562_v47, %v3561_v41  ;;  %v7197_v47 = vadd.f32 %v7093_v38, %v7056_v48 }
 0x4bb   : > { %v3565_v10 = vadd.f32 %v3564_v26, %v3563_v13  ;;  %v3582_v26 = vsel %vm1780_vm10, %v7191_v35, 0.0  ;;  %v7203_v13 = vadd.f32 %v7093_v38, %v7058_v62  ;;  %v7217_v62 = vadd.f32 %v7093_v38, %v7062_v52 }
 0x4bc   : > { %v3457_v42 = vpop.f32.mrf.mxu1 }
 0x4bd   : > { %v3567_v5 = vadd.f32 %v3566_v11, %v3565_v10  ;;  %v3584_v10 = vsel %vm1780_vm10, %v7197_v47, 0.0  ;;  %v3590_v52 = vsel %vm1780_vm10, %v7217_v62, 0.0 }
 0x4be   : > { %v2969_v6 = vpop.f32.mrf.mxu3 }
 0x4bf   : > { %v3197_v36 = vpop.f32.mrf.mxu0  ;;  %v3195_v29 = vadd.f32 %v3194_v8, %v2969_v6  ;;  %v7165_v8 = vadd.f32 %v7093_v38, %v7040_v2  ;;  %v3569_v3 = vadd.f32 %v3568_v20, %v3567_v5  ;;  %v7179_v2 = vadd.f32 %v7093_v38, %v7047_v39 }
 0x4c0   : > { %v3580_v39 = vsel %vm1780_vm10, %v7185_v32, 0.0  ;;  %v7209_v20 = vadd.f32 %v7093_v38, %v7060_v63 }
 0x4c1   : > { %v7064_v0 = vadd.f32 %v3454_v56, %v3195_v29  ;;  %v7159_v56 = vadd.f32 %v7093_v38, %v7036_v18  ;;  %v3571_v18 = vadd.f32 %v3570_v50, %v3569_v3  ;;  %v3578_v19 = vsel %vm1780_vm10, %v7179_v2, 0.0 }
 0x4c2   : > { %v3586_v50 = vsel %vm1780_vm10, %v7203_v13, 0.0  ;;  %v3588_v63 = vsel %vm1780_vm10, %v7209_v20, 0.0 }
 0x4c3   : > { %v3572_v6 = vsel %vm1780_vm10, %v7159_v56, 0.0 }
 0x4c4   : > { %v7066_v9 = vpop.f32.mrf.mxu1 }
 0x4c6   : > { %v2972_v17 = vpop.f32.mrf.mxu3 }
 0x4c7   : > { %v7068_v40 = vpop.f32.mrf.mxu0  ;;  %v3198_v45 = vadd.f32 %v3197_v36, %v2972_v17  ;;  %v7171_v36 = vadd.f32 %v7093_v38, %v7043_v51  ;;  %v3574_v17 = vsel %vm1780_vm10, %v7165_v8, 0.0 }
 0x4c9   : > { %v7070_v60 = vadd.f32 %v3457_v42, %v3198_v45  ;;  %v3573_v45 = vadd.f32 %v3572_v6, %v3571_v18  ;;  %v3576_v53 = vsel %vm1780_vm10, %v7171_v36, 0.0 }
 0x4cb   : > { %v3575_v51 = vadd.f32 %v3574_v17, %v3573_v45  ;;  %v7225_v17 = vadd.f32 %v7093_v38, %v7064_v0 }
 0x4cc   : > { %v7072_v4 = vpop.f32.mrf.mxu1 }
 0x4cd   : > { %v3577_v15 = vadd.f32 %v3576_v53, %v3575_v51 }
 0x4ce   : > { %v7074_v31 = vpop.f32.mrf.mxu3 }
 0x4cf   : > { %v7076_v7 = vpop.f32.mrf.mxu0  ;;  %v3579_v41 = vadd.f32 %v3578_v19, %v3577_v15  ;;  %v3200_v48 = vadd.f32 %v7068_v40, %v7074_v31 }
 0x4d1   : > { %v3581_v14 = vadd.f32 %v3580_v39, %v3579_v41  ;;  %v3508_v40 = vadd.f32 %v7066_v9, %v3200_v48  ;;  %v3592_v9 = vsel %vm1780_vm10, %v7225_v17, 0.0 }
 0x4d3   : > { %v3583_v5 = vadd.f32 %v3582_v26, %v3581_v14 }
 0x4d4   : > { %v7078_v25 = vpop.f32.mrf.mxu1 }
 0x4d5   : > { %v3585_v6 = vadd.f32 %v3584_v10, %v3583_v5 }
 0x4d6   : > { %v7080_v1 = vpop.f32.mrf.mxu3 }
 0x4d7   : > { %v7082_v61 = vpop.f32.mrf.mxu0  ;;  %v3203_v3 = vadd.f32 %v7076_v7, %v7080_v1  ;;  %v3587_v45 = vadd.f32 %v3586_v50, %v3585_v6  ;;  %v7234_v7 = vadd.f32 %v7093_v38, %v7070_v60 }
 0x4d9   : > { %v3509_v1 = vadd.f32 %v7072_v4, %v3203_v3  ;;  %v3589_v0 = vadd.f32 %v3588_v63, %v3587_v45  ;;  %v3594_v4 = vsel %vm1780_vm10, %v7234_v7, 0.0 }
 0x4db   : > { %v3591_v15 = vadd.f32 %v3590_v52, %v3589_v0  ;;  %v7249_v39 = vadd.f32 %v7093_v38, %v3509_v1 }
 0x4dc   : > { %v7084_v58 = vpop.f32.mrf.mxu1 }
 0x4dd   : > { %v3593_v41 = vadd.f32 %v3592_v9, %v3591_v15  ;;  %v3598_v48 = vsel %vm1780_vm10, %v7249_v39, 0.0 }
 0x4de   : > { %v7086_v55 = vpop.f32.mrf.mxu3 }
 0x4df   : > { %v7088_v34 = vpop.f32.mrf.mxu0  ;;  %v3205_v31 = vadd.f32 %v7082_v61, %v7086_v55  ;;  %v7242_v61 = vadd.f32 %v7093_v38, %v3508_v40  ;;  %v3595_v10 = vadd.f32 %v3594_v4, %v3593_v41 }
 0x4e1   : > { %v3510_v55 = vadd.f32 %v7078_v25, %v3205_v31  ;;  %v3596_v14 = vsel %vm1780_vm10, %v7242_v61, 0.0 }
 0x4e3   : > { %v7256_v25 = vadd.f32 %v7093_v38, %v3510_v55 }
 0x4e4   : > { %v7099_v43 = vpop.f32.mrf.mxu1 }
 0x4e5   : > { %v3600_v50 = vsel %vm1780_vm10, %v7256_v25, 0.0 }
 0x4e6   : > { %v7109_v21 = vpop.f32.mrf.mxu3 }
 0x4e7   : > { %v7111_v44 = vpop.f32.mrf.mxu0  ;;  %v3208_v53 = vadd.f32 %v7088_v34, %v7109_v21 }
 0x4e9   : > { %v3511_v34 = vadd.f32 %v7084_v58, %v3208_v53 }
 0x4eb   : > { %v7262_v5 = vadd.f32 %v7093_v38, %v3511_v34 }
 0x4ec   : > { %v7139_v46 = vpop.f32.mrf.mxu1 }
 0x4ed   : > { %v3602_v63 = vsel %vm1780_vm10, %v7262_v5, 0.0 }
 0x4ee   : > { %v2984_v16 = vpop.f32.mrf.mxu3 }
 0x4ef   : > { %v7141_v49 = vpop.f32.mrf.mxu0  ;;  %v3210_v19 = vadd.f32 %v7111_v44, %v2984_v16 }
 0x4f1   : > { %v3512_v44 = vadd.f32 %v7099_v43, %v3210_v19 }
 0x4f3   : > { %v7268_v3 = vadd.f32 %v7093_v38, %v3512_v44 }
 0x4f4   : > { %v7173_v29 = vpop.f32.mrf.mxu1 }
 0x4f5   : > { %v3604_v45 = vsel %vm1780_vm10, %v7268_v3, 0.0 }
 0x4f6   : > { %v2987_v42 = vpop.f32.mrf.mxu3 }
 0x4f7   : > { %v3214_v22 = vpop.f32.mrf.mxu0  ;;  %v3213_v21 = vadd.f32 %v7141_v49, %v2987_v42  ;;  %v3597_v42 = vadd.f32 %v3596_v14, %v3595_v10 }
 0x4f9   : > { %v3513_v58 = vadd.f32 %v7139_v46, %v3213_v21 }
 0x4fb   : > { %v7274_v40 = vadd.f32 %v7093_v38, %v3513_v58 }
 0x4fc   : > { %v3477_v11 = vpop.f32.mrf.mxu1 }
 0x4fd   : > { %v3606_v0 = vsel %vm1780_vm10, %v7274_v40, 0.0 }
 0x4fe   : > { %v2989_v30 = vpop.f32.mrf.mxu3 }
 0x4ff   : > { %v3217_v27 = vpop.f32.mrf.mxu0  ;;  %v3215_v16 = vadd.f32 %v3214_v22, %v2989_v30  ;;  %v3599_v30 = vadd.f32 %v3598_v48, %v3597_v42 }
 0x501   : > { %v3514_v43 = vadd.f32 %v7173_v29, %v3215_v16 }
 0x503   : > { %v7279_v52 = vadd.f32 %v7093_v38, %v3514_v43 }
 0x504   : > { %v3479_v60 = vpop.f32.mrf.mxu1 }
 0x505   : > { %v3608_v55 = vsel %vm1780_vm10, %v7279_v52, 0.0 }
 0x506   : > { %v2992_v18 = vpop.f32.mrf.mxu3 }
 0x507   : > { %v3219_v51 = vpop.f32.mrf.mxu0  ;;  %v3218_v49 = vadd.f32 %v3217_v27, %v2992_v18  ;;  %v3601_v27 = vadd.f32 %v3600_v50, %v3599_v30 }
 0x509   : > { %v3515_v46 = vadd.f32 %v3477_v11, %v3218_v49  ;;  %v3603_v53 = vadd.f32 %v3602_v63, %v3601_v27 }
 0x50b   : > { %v3605_v11 = vadd.f32 %v3604_v45, %v3603_v53 }
 0x50c   : > { %v3482_v18 = vpop.f32.mrf.mxu1 }
 0x50d   : > { %v3607_v15 = vadd.f32 %v3606_v0, %v3605_v11 }
 0x50e   : > { %v2994_v26 = vpop.f32.mrf.mxu3 }
 0x50f   : > { %v3220_v22 = vadd.f32 %v3219_v51, %v2994_v26  ;;  %v3222_v6 = vpop.f32.mrf.mxu0  ;;  %v7284_v51 = vadd.f32 %v7093_v38, %v3515_v46  ;;  %v3609_v34 = vadd.f32 %v3608_v55, %v3607_v15 }
 0x511   : > { %v3516_v29 = vadd.f32 %v3479_v60, %v3220_v22  ;;  %v3610_v60 = vsel %vm1780_vm10, %v7284_v51, 0.0 }
 0x512   : > { %v3611_v44 = vadd.f32 %v3610_v60, %v3609_v34 }
 0x513   : > { %v7289_v19 = vadd.f32 %v7093_v38, %v3516_v29 }
 0x514   : > { %v3484_v16 = vpop.f32.mrf.mxu1 }
 0x515   : > { %v3612_v26 = vsel %vm1780_vm10, %v7289_v19, 0.0 }
 0x516   : > { %v2997_v31 = vpop.f32.mrf.mxu3  ;;  %v3613_v58 = vadd.f32 %v3612_v26, %v3611_v44 }
 0x517   : > { %v3223_v1 = vadd.f32 %v3222_v6, %v2997_v31  ;;  %v3224_v21 = vpop.f32.mrf.mxu0 }
 0x519   : > { %v3517_v9 = vadd.f32 %v3482_v18, %v3223_v1 }
 0x51b   : > { %v7294_v4 = vadd.f32 %v7093_v38, %v3517_v9 }
 0x51d   : > { %v3614_v10 = vsel %vm1780_vm10, %v7294_v4, 0.0 }
 0x51e   : > { %v2999_v41 = vpop.f32.mrf.mxu3  ;;  %v3615_v42 = vadd.f32 %v3614_v10, %v3613_v58 }
 0x51f   : > { %v3225_v14 = vadd.f32 %v3224_v21, %v2999_v41 }
 0x521   : > { %v3518_v48 = vadd.f32 %v3484_v16, %v3225_v14 }
 0x523   : > { %v7301_v49 = vadd.f32 %v7093_v38, %v3518_v48 }
 0x525   : > { %v3616_v50 = vsel %vm1780_vm10, %v7301_v49, 0.0 }
 0x526   : > { %v3617_v43 = vadd.f32 %v3616_v50, %v3615_v42 }
 0x528   : > { %v3618_v22 = vrot.slane %v3617_v43, 4 }
 0x52a   : > { %v3619_v30 = vadd.f32 %v3618_v22, %v3617_v43 }
 0x52c   : > { %v3620_v6 = vrot.slane %v3619_v30, 2 }
 0x52e   : > { %v3621_v63 = vadd.f32 %v3620_v6, %v3619_v30 }
 0x530   : > { %v3622_v46 = vrot.slane %v3621_v63, 1 }
 0x532   : > { %v3623_v27 = vadd.f32 %v3622_v46, %v3621_v63 }
 0x534   : > { %v7305_v18 = vmul.f32 0.00390625, %v3623_v27 }
 0x536   : > { %v7309_v31 = vsub.f32 %v7103_v59, %v7305_v18  ;;  %v7313_v38 = vsub.f32 %v7097_v54, %v7305_v18  ;;  %v7317_v45 = vsub.f32 %v7107_v37, %v7305_v18  ;;  %v7321_v29 = vsub.f32 %v7117_v28, %v7305_v18 }
 0x537   : > { %v7329_v59 = vsub.f32 %v7125_v57, %v7305_v18  ;;  %v7335_v37 = vsub.f32 %v7131_v24, %v7305_v18  ;;  %v7343_v55 = vsub.f32 %v7137_v33, %v7305_v18  ;;  %v7350_v24 = vsub.f32 %v7147_v12, %v7305_v18 }
 0x538   : > { %v3657_v1 = vmul.f32 %v7309_v31, %v7309_v31  ;;  %v3658_v53 = vmul.f32 %v7313_v38, %v7313_v38  ;;  %v3659_v54 = vmul.f32 %v7317_v45, %v7317_v45  ;;  %v3660_v28 = vmul.f32 %v7321_v29, %v7321_v29 }
 0x539   : > { %v3661_v57 = vmul.f32 %v7329_v59, %v7329_v59  ;;  %v3662_v34 = vmul.f32 %v7335_v37, %v7335_v37  ;;  %v7357_v33 = vsub.f32 %v7153_v23, %v7305_v18  ;;  %v3663_v26 = vmul.f32 %v7343_v55, %v7343_v55 }
 0x53a   : > { %v3689_v0 = vsel %vm1780_vm10, %v3657_v1, 0.0  ;;  %v3690_v9 = vsel %vm1780_vm10, %v3658_v53, 0.0  ;;  %v3692_v15 = vsel %vm1780_vm10, %v3659_v54, 0.0  ;;  %v3694_v21 = vsel %vm1780_vm10, %v3660_v28, 0.0 }
 0x53b   : > { %v3691_v11 = vadd.f32 %v3690_v9, %v3689_v0  ;;  %v3696_v14 = vsel %vm1780_vm10, %v3661_v57, 0.0  ;;  %v7364_v12 = vsub.f32 %v7159_v56, %v7305_v18  ;;  %v3664_v16 = vmul.f32 %v7350_v24, %v7350_v24 }
 0x53c   : > { %v3698_v10 = vsel %vm1780_vm10, %v3662_v34, 0.0  ;;  %v7371_v23 = vsub.f32 %v7165_v8, %v7305_v18  ;;  %v3665_v58 = vmul.f32 %v7357_v33, %v7357_v33  ;;  %v3700_v42 = vsel %vm1780_vm10, %v3663_v26, 0.0 }
 0x53d   : > { %v3693_v60 = vadd.f32 %v3692_v15, %v3691_v11  ;;  %v7378_v56 = vsub.f32 %v7171_v36, %v7305_v18  ;;  %v3666_v43 = vmul.f32 %v7364_v12, %v7364_v12  ;;  %v3702_v22 = vsel %vm1780_vm10, %v3664_v16, 0.0 }
 0x53e   : > { %v7385_v8 = vsub.f32 %v7179_v2, %v7305_v18  ;;  %v3667_v6 = vmul.f32 %v7371_v23, %v7371_v23  ;;  %v3704_v63 = vsel %vm1780_vm10, %v3665_v58, 0.0  ;;  %v7392_v36 = vsub.f32 %v7185_v32, %v7305_v18 }
 0x53f   : > { %v3695_v41 = vadd.f32 %v3694_v21, %v3693_v60  ;;  %v3668_v27 = vmul.f32 %v7378_v56, %v7378_v56  ;;  %v3706_v1 = vsel %vm1780_vm10, %v3666_v43, 0.0  ;;  %v7399_v2 = vsub.f32 %v7191_v35, %v7305_v18 }
 0x540   : > { %v3669_v54 = vmul.f32 %v7385_v8, %v7385_v8  ;;  %v3708_v28 = vsel %vm1780_vm10, %v3667_v6, 0.0  ;;  %v7406_v32 = vsub.f32 %v7197_v47, %v7305_v18  ;;  %v3670_v9 = vmul.f32 %v7392_v36, %v7392_v36 }
 0x541   : > { %v3697_v44 = vadd.f32 %v3696_v14, %v3695_v41  ;;  %v3710_v11 = vsel %vm1780_vm10, %v3668_v27, 0.0  ;;  %v7413_v35 = vsub.f32 %v7203_v13, %v7305_v18  ;;  %v3671_v15 = vmul.f32 %v7399_v2, %v7399_v2 }
 0x542   : > { %v3712_v60 = vsel %vm1780_vm10, %v3669_v54, 0.0  ;;  %v7420_v47 = vsub.f32 %v7209_v20, %v7305_v18  ;;  %v3672_v21 = vmul.f32 %v7406_v32, %v7406_v32  ;;  %v3714_v41 = vsel %vm1780_vm10, %v3670_v9, 0.0 }
 0x543   : > { %v3699_v48 = vadd.f32 %v3698_v10, %v3697_v44  ;;  %v7427_v13 = vsub.f32 %v7217_v62, %v7305_v18  ;;  %v3673_v14 = vmul.f32 %v7413_v35, %v7413_v35  ;;  %v3716_v44 = vsel %vm1780_vm10, %v3671_v15, 0.0 }
 0x544   : > { %v7434_v20 = vsub.f32 %v7225_v17, %v7305_v18  ;;  %v3674_v10 = vmul.f32 %v7420_v47, %v7420_v47  ;;  %v7441_v62 = vsub.f32 %v7234_v7, %v7305_v18  ;;  %v7448_v17 = vsub.f32 %v7242_v61, %v7305_v18 }
 0x545   : > { %v3701_v50 = vadd.f32 %v3700_v42, %v3699_v48  ;;  %v3718_v48 = vsel %vm1780_vm10, %v3672_v21, 0.0  ;;  %v3675_v42 = vmul.f32 %v7427_v13, %v7427_v13  ;;  %v7455_v7 = vsub.f32 %v7249_v39, %v7305_v18 }
 0x546   : > { %v7462_v61 = vsub.f32 %v7256_v25, %v7305_v18  ;;  %v7469_v39 = vsub.f32 %v7262_v5, %v7305_v18  ;;  %v7476_v25 = vsub.f32 %v7268_v3, %v7305_v18  ;;  %v7483_v5 = vsub.f32 %v7274_v40, %v7305_v18 }
 0x547   : > { %v3703_v30 = vadd.f32 %v3702_v22, %v3701_v50  ;;  %v3720_v50 = vsel %vm1780_vm10, %v3673_v14, 0.0  ;;  %v3676_v22 = vmul.f32 %v7434_v20, %v7434_v20  ;;  %v7490_v3 = vsub.f32 %v7279_v52, %v7305_v18 }
 0x548   : > { %v7497_v40 = vsub.f32 %v7284_v51, %v7305_v18  ;;  %v7504_v52 = vsub.f32 %v7289_v19, %v7305_v18  ;;  %v7511_v51 = vsub.f32 %v7294_v4, %v7305_v18  ;;  %v7518_v19 = vsub.f32 %v7301_v49, %v7305_v18 }
 0x549   : > { %v3705_v46 = vadd.f32 %v3704_v63, %v3703_v30  ;;  %v3722_v30 = vsel %vm1780_vm10, %v3674_v10, 0.0  ;;  %v3677_v63 = vmul.f32 %v7441_v62, %v7441_v62 }
 0x54a   : > { %v3687_v4 = vmul.f32 %v7511_v51, %v7511_v51 }
 0x54b   : > { %v3707_v53 = vadd.f32 %v3706_v1, %v3705_v46  ;;  %v3724_v46 = vsel %vm1780_vm10, %v3675_v42, 0.0  ;;  %v3678_v1 = vmul.f32 %v7448_v17, %v7448_v17 }
 0x54c   : > { %v3748_v49 = vsel %vm1780_vm10, %v3687_v4, 0.0 }
 0x54d   : > { %v3709_v0 = vadd.f32 %v3708_v28, %v3707_v53  ;;  %v3726_v53 = vsel %vm1780_vm10, %v3676_v22, 0.0  ;;  %v3679_v28 = vmul.f32 %v7455_v7, %v7455_v7 }
 0x54f   : > { %v3711_v57 = vadd.f32 %v3710_v11, %v3709_v0  ;;  %v3728_v0 = vsel %vm1780_vm10, %v3677_v63, 0.0  ;;  %v3680_v11 = vmul.f32 %v7462_v61, %v7462_v61 }
 0x551   : > { %v3713_v34 = vadd.f32 %v3712_v60, %v3711_v57  ;;  %v3730_v57 = vsel %vm1780_vm10, %v3678_v1, 0.0  ;;  %v3681_v60 = vmul.f32 %v7469_v39, %v7469_v39  ;;  %v3688_v1 = vmul.f32 %v7518_v19, %v7518_v19 }
 0x553   : > { %v3715_v26 = vadd.f32 %v3714_v41, %v3713_v34  ;;  %v3732_v34 = vsel %vm1780_vm10, %v3679_v28, 0.0  ;;  %v3682_v41 = vmul.f32 %v7476_v25, %v7476_v25  ;;  %v3750_v28 = vsel %vm1780_vm10, %v3688_v1, 0.0 }
 0x555   : > { %v3717_v16 = vadd.f32 %v3716_v44, %v3715_v26  ;;  %v3734_v26 = vsel %vm1780_vm10, %v3680_v11, 0.0  ;;  %v3683_v44 = vmul.f32 %v7483_v5, %v7483_v5 }
 0x557   : > { %v3719_v58 = vadd.f32 %v3718_v48, %v3717_v16  ;;  %v3736_v16 = vsel %vm1780_vm10, %v3681_v60, 0.0  ;;  %v3684_v48 = vmul.f32 %v7490_v3, %v7490_v3 }
 0x559   : > { %v3721_v43 = vadd.f32 %v3720_v50, %v3719_v58  ;;  %v3738_v58 = vsel %vm1780_vm10, %v3682_v41, 0.0  ;;  %v3685_v50 = vmul.f32 %v7497_v40, %v7497_v40 }
 0x55b   : > { %v3723_v6 = vadd.f32 %v3722_v30, %v3721_v43  ;;  %v3740_v43 = vsel %vm1780_vm10, %v3683_v44, 0.0  ;;  %v3686_v30 = vmul.f32 %v7504_v52, %v7504_v52 }
 0x55d   : > { %v3725_v27 = vadd.f32 %v3724_v46, %v3723_v6  ;;  %v3742_v6 = vsel %vm1780_vm10, %v3684_v48, 0.0  ;;  %v3744_v46 = vsel %vm1780_vm10, %v3685_v50, 0.0 }
 0x55f   : > { %v3727_v54 = vadd.f32 %v3726_v53, %v3725_v27  ;;  %v3746_v53 = vsel %vm1780_vm10, %v3686_v30, 0.0  ;;  %v3802_v30 = vld [vmem:[%s4656_s23] sm:$0xff] }
 0x561   : > { %v3729_v9 = vadd.f32 %v3728_v0, %v3727_v54 }
 0x563   : > { %v3731_v15 = vadd.f32 %v3730_v57, %v3729_v9 }
 0x565   : > { %v3733_v21 = vadd.f32 %v3732_v34, %v3731_v15 }
 0x567   : > { %v3735_v14 = vadd.f32 %v3734_v26, %v3733_v21 }
 0x569   : > { %v3737_v10 = vadd.f32 %v3736_v16, %v3735_v14 }
 0x56b   : > { %v3739_v42 = vadd.f32 %v3738_v58, %v3737_v10 }
 0x56d   : > { %v3741_v22 = vadd.f32 %v3740_v43, %v3739_v42 }
 0x56f   : > { %v3743_v63 = vadd.f32 %v3742_v6, %v3741_v22  ;;  %v3803_v6 = vld [vmem:[%s4656_s23 + $0x8] sm:$0xff] }
 0x571   : > { %v3745_v27 = vadd.f32 %v3744_v46, %v3743_v63  ;;  %v3804_v63 = vld [vmem:[%s4656_s23 + $0x10] sm:$0xff]  ;;  %v3805_v46 = vld [vmem:[%s4656_s23 + $0x18] sm:$0xff] }
 0x573   : > { %v3747_v54 = vadd.f32 %v3746_v53, %v3745_v27 }
 0x575   : > { %v3749_v18 = vadd.f32 %v3748_v49, %v3747_v54  ;;  %v3808_v54 = vld [vmem:[%s4656_s23 + $0x30] sm:$0xff] }
 0x577   : > { %v3751_v0 = vadd.f32 %v3750_v28, %v3749_v18  ;;  %v3809_v18 = vld [vmem:[%s4656_s23 + $0x38] sm:$0xff] }
 0x579   : > { %v3752_v9 = vrot.slane %v3751_v0, 4 }
 0x57b   : > { %v3753_v11 = vadd.f32 %v3752_v9, %v3751_v0  ;;  %v3810_v0 = vld [vmem:[%s4656_s23 + $0x40] sm:$0xff] }
 0x57d   : > { %v3754_v57 = vrot.slane %v3753_v11, 2 }
 0x57f   : > { %v3755_v15 = vadd.f32 %v3754_v57, %v3753_v11  ;;  %v3811_v11 = vld [vmem:[%s4656_s23 + $0x48] sm:$0xff] }
 0x581   : > { %v3756_v60 = vrot.slane %v3755_v15, 1 }
 0x583   : > { %v3757_v34 = vadd.f32 %v3756_v60, %v3755_v15  ;;  %v3812_v15 = vld [vmem:[%s4656_s23 + $0x50] sm:$0xff] }
 0x585   : > { %v3758_v21 = vmul.f32 0.00390625, %v3757_v34  ;;  %v3813_v34 = vld [vmem:[%s4656_s23 + $0x58] sm:$0xff] }
 0x587   : > { %v3759_v41 = vadd.f32 1e-05, %v3758_v21 }
 0x589   : > { %4596 = vrsqrt.f32 %v3759_v41  ;;  %vm3766_vm15 = vweird.f32 %v3759_v41 }
 0x58f   : > { %v4597_v26 = vpop.eup %4596 }
 0x590   : > { %v3761_v14 = vmul.f32 %v4597_v26, %v3759_v41  ;;  %vm3767_vm14 = vweird.f32 %v4597_v26  ;;  %v3814_v41 = vld [vmem:[%s4656_s23 + $0x60] sm:$0xff] }
 0x591   : > { %vm3768_vm0 = vmor %vm3766_vm15, %vm3767_vm14 }
 0x592   : > { %v3762_v44 = vmul.f32 %v4597_v26, %v3761_v14  ;;  %v3815_v14 = vld [vmem:[%s4656_s23 + $0x68] sm:$0xff] }
 0x594   : > { %v3763_v16 = vmul.f32 0.5, %v3762_v44 }
 0x596   : > { %v3764_v10 = vsub.f32 1.5, %v3763_v16  ;;  %v3816_v16 = vld [vmem:[%s4656_s23 + $0x70] sm:$0xff] }
 0x598   : > { %v3765_v48 = vmul.f32 %v4597_v26, %v3764_v10 }
 0x59a   : > { %v7531_v58 = vsel %vm3768_vm0, %v4597_v26, %v3765_v48  ;;  %v3817_v48 = vld [vmem:[%s4656_s23 + $0x78] sm:$0xff] }
 0x59b   : > { %v3770_v42 = vmul.f32 %v7531_v58, %v7309_v31  ;;  %v3771_v50 = vmul.f32 %v7531_v58, %v7313_v38  ;;  %v3772_v43 = vmul.f32 %v7531_v58, %v7317_v45  ;;  %v3773_v22 = vmul.f32 %v7531_v58, %v7321_v29  ;;  %v3806_v38 = vld [vmem:[%s4656_s23 + $0x20] sm:$0xff]  ;;  %v3807_v29 = vld [vmem:[%s4656_s23 + $0x28] sm:$0xff] }
 0x59c   : > { %v3774_v4 = vmul.f32 %v7531_v58, %v7329_v59  ;;  %v3775_v31 = vmul.f32 %v7531_v58, %v7335_v37  ;;  %v3776_v45 = vmul.f32 %v7531_v58, %v7343_v55  ;;  %v3777_v53 = vmul.f32 %v7531_v58, %v7350_v24 }
 0x59d   : > { %v3834_v59 = vadd.f32 %v3802_v30, %v3770_v42  ;;  %v3835_v27 = vadd.f32 %v3803_v6, %v3771_v50  ;;  %v3836_v1 = vadd.f32 %v3804_v63, %v3772_v43  ;;  %v3837_v49 = vadd.f32 %v3805_v46, %v3773_v22  ;;  %v3818_v50 = vld [vmem:[%s4656_s23 + $0x80] sm:$0xff]  ;;  %v3819_v22 = vld [vmem:[%s4656_s23 + $0x88] sm:$0xff]  ;;  %v3820_v6 = vld [vmem:[%s4656_s23 + $0x90] sm:$0xff] }
 0x59e   : > { %v3778_v37 = vmul.f32 %v7531_v58, %v7357_v33  ;;  %v3838_v28 = vadd.f32 %v3806_v38, %v3774_v4  ;;  %v3779_v55 = vmul.f32 %v7531_v58, %v7364_v12  ;;  %v3839_v9 = vadd.f32 %v3807_v29, %v3775_v31  ;;  %v3821_v4 = vld [vmem:[%s4656_s23 + $0x98] sm:$0xff]  ;;  %v3822_v31 = vld [vmem:[%s4656_s23 + $0xa0] sm:$0xff] }
 0x59f   : > { %3866 = vst.msk [vmem:[%s7552_s10] sm:$0xff] %vm1780_vm10, %v3834_v59  ;;  %v3780_v24 = vmul.f32 %v7531_v58, %v7371_v23  ;;  %v3840_v33 = vadd.f32 %v3808_v54, %v3776_v45  ;;  %v3781_v57 = vmul.f32 %v7531_v58, %v7378_v56  ;;  %v3841_v12 = vadd.f32 %v3809_v18, %v3777_v53  ;;  %v3823_v45 = vld [vmem:[%s4656_s23 + $0xa8] sm:$0xff]  ;;  %v3824_v59 = vld [vmem:[%s4656_s23 + $0xb0] sm:$0xff]  ;;  %v3826_v54 = vld [vmem:[%s4656_s23 + $0xc0] sm:$0xff] }
 0x5a0   : > { %3867 = vst.msk [vmem:[%s7552_s10 + $0x8] sm:$0xff] %vm1780_vm10, %v3835_v27  ;;  %v3782_v60 = vmul.f32 %v7531_v58, %v7385_v8  ;;  %v3842_v23 = vadd.f32 %v3810_v0, %v3778_v37  ;;  %v3783_v21 = vmul.f32 %v7531_v58, %v7392_v36  ;;  %v3843_v56 = vadd.f32 %v3811_v11, %v3779_v55  ;;  %v3827_v37 = vld [vmem:[%s4656_s23 + $0xc8] sm:$0xff] }
 0x5a1   : > { %3868 = vst.msk [vmem:[%s7552_s10 + $0x10] sm:$0xff] %vm1780_vm10, %v3836_v1  ;;  %v3784_v26 = vmul.f32 %v7531_v58, %v7399_v2  ;;  %v3844_v8 = vadd.f32 %v3812_v15, %v3780_v24  ;;  %v3785_v44 = vmul.f32 %v7531_v58, %v7406_v32  ;;  %v3845_v36 = vadd.f32 %v3813_v34, %v3781_v57  ;;  %v3825_v1 = vld [vmem:[%s4656_s23 + $0xb8] sm:$0xff]  ;;  %v3832_v57 = vld [vmem:[%s4656_s23 + $0xf0] sm:$0xff] }
 0x5a2   : > { %3869 = vst.msk [vmem:[%s7552_s10 + $0x18] sm:$0xff] %vm1780_vm10, %v3837_v49  ;;  %v3786_v10 = vmul.f32 %v7531_v58, %v7413_v35  ;;  %v3846_v2 = vadd.f32 %v3814_v41, %v3782_v60  ;;  %v3787_v42 = vmul.f32 %v7531_v58, %v7420_v47  ;;  %v3847_v32 = vadd.f32 %v3815_v14, %v3783_v21 }
 0x5a3   : > { %3870 = vst.msk [vmem:[%s7552_s10 + $0x20] sm:$0xff] %vm1780_vm10, %v3838_v28  ;;  %v3788_v43 = vmul.f32 %v7531_v58, %v7427_v13  ;;  %v3848_v35 = vadd.f32 %v3816_v16, %v3784_v26  ;;  %v3789_v30 = vmul.f32 %v7531_v58, %v7434_v20  ;;  %v3849_v47 = vadd.f32 %v3817_v48, %v3785_v44  ;;  %v3828_v28 = vld [vmem:[%s4656_s23 + $0xd0] sm:$0xff] }
 0x5a4   : > { %3871 = vst.msk [vmem:[%s7552_s10 + $0x28] sm:$0xff] %vm1780_vm10, %v3839_v9  ;;  %v3790_v63 = vmul.f32 %v7531_v58, %v7441_v62  ;;  %v3850_v13 = vadd.f32 %v3818_v50, %v3786_v10  ;;  %v3791_v46 = vmul.f32 %v7531_v58, %v7448_v17  ;;  %v3851_v20 = vadd.f32 %v3819_v22, %v3787_v42 }
 0x5a5   : > { %3872 = vst.msk [vmem:[%s7552_s10 + $0x30] sm:$0xff] %vm1780_vm10, %v3840_v33  ;;  %v3792_v38 = vmul.f32 %v7531_v58, %v7455_v7  ;;  %v3852_v62 = vadd.f32 %v3820_v6, %v3788_v43  ;;  %v3793_v29 = vmul.f32 %v7531_v58, %v7462_v61  ;;  %v3853_v17 = vadd.f32 %v3821_v4, %v3789_v30 }
 0x5a6   : > { %3873 = vst.msk [vmem:[%s7552_s10 + $0x38] sm:$0xff] %vm1780_vm10, %v3841_v12  ;;  %v3794_v27 = vmul.f32 %v7531_v58, %v7469_v39  ;;  %v3854_v7 = vadd.f32 %v3822_v31, %v3790_v63  ;;  %v3795_v53 = vmul.f32 %v7531_v58, %v7476_v25  ;;  %v3855_v61 = vadd.f32 %v3823_v45, %v3791_v46  ;;  %v3833_v12 = vld [vmem:[%s4656_s23 + $0xf8] sm:$0xff] }
 0x5a7   : > { %3874 = vst.msk [vmem:[%s7552_s10 + $0x40] sm:$0xff] %vm1780_vm10, %v3842_v23  ;;  %v3796_v49 = vmul.f32 %v7531_v58, %v7483_v5  ;;  %v3856_v39 = vadd.f32 %v3824_v59, %v3792_v38  ;;  %v3797_v18 = vmul.f32 %v7531_v58, %v7490_v3  ;;  %v3857_v25 = vadd.f32 %v3825_v1, %v3793_v29  ;;  %v3829_v5 = vld [vmem:[%s4656_s23 + $0xd8] sm:$0xff]  ;;  %v3830_v3 = vld [vmem:[%s4656_s23 + $0xe0] sm:$0xff] }
 0x5a8   : > { %3875 = vst.msk [vmem:[%s7552_s10 + $0x48] sm:$0xff] %vm1780_vm10, %v3843_v56  ;;  %v3798_v55 = vmul.f32 %v7531_v58, %v7497_v40  ;;  %v3858_v0 = vadd.f32 %v3826_v54, %v3794_v27  ;;  %v3799_v9 = vmul.f32 %v7531_v58, %v7504_v52  ;;  %v3859_v24 = vadd.f32 %v3827_v37, %v3795_v53  ;;  %v3831_v40 = vld [vmem:[%s4656_s23 + $0xe8] sm:$0xff] }
 0x5a9   : > { %3876 = vst.msk [vmem:[%s7552_s10 + $0x50] sm:$0xff] %vm1780_vm10, %v3844_v8  ;;  %v3800_v11 = vmul.f32 %v7531_v58, %v7511_v51  ;;  %v3860_v33 = vadd.f32 %v3828_v28, %v3796_v49  ;;  %v3801_v52 = vmul.f32 %v7531_v58, %v7518_v19  ;;  %v3861_v15 = vadd.f32 %v3829_v5, %v3797_v18 }
 0x5aa   : > { %3877 = vst.msk [vmem:[%s7552_s10 + $0x58] sm:$0xff] %vm1780_vm10, %v3845_v36  ;;  %v3862_v60 = vadd.f32 %v3830_v3, %v3798_v55  ;;  %v3863_v51 = vadd.f32 %v3831_v40, %v3799_v9 }
 0x5ab   : > { %3878 = vst.msk [vmem:[%s7552_s10 + $0x60] sm:$0xff] %vm1780_vm10, %v3846_v2  ;;  %v3864_v34 = vadd.f32 %v3832_v57, %v3800_v11  ;;  %v3865_v23 = vadd.f32 %v3833_v12, %v3801_v52 }
 0x5ac   : > { %3879 = vst.msk [vmem:[%s7552_s10 + $0x68] sm:$0xff] %vm1780_vm10, %v3847_v32 }
 0x5ad   : > { %3880 = vst.msk [vmem:[%s7552_s10 + $0x70] sm:$0xff] %vm1780_vm10, %v3848_v35 }
 0x5ae   : > { %3881 = vst.msk [vmem:[%s7552_s10 + $0x78] sm:$0xff] %vm1780_vm10, %v3849_v47 }
 0x5af   : > { %3882 = vst.msk [vmem:[%s7552_s10 + $0x80] sm:$0xff] %vm1780_vm10, %v3850_v13 }
 0x5b0   : > { %3883 = vst.msk [vmem:[%s7552_s10 + $0x88] sm:$0xff] %vm1780_vm10, %v3851_v20 }
 0x5b1   : > { %3884 = vst.msk [vmem:[%s7552_s10 + $0x90] sm:$0xff] %vm1780_vm10, %v3852_v62 }
 0x5b2   : > { %3885 = vst.msk [vmem:[%s7552_s10 + $0x98] sm:$0xff] %vm1780_vm10, %v3853_v17 }
 0x5b3   : > { %3886 = vst.msk [vmem:[%s7552_s10 + $0xa0] sm:$0xff] %vm1780_vm10, %v3854_v7 }
 0x5b4   : > { %3887 = vst.msk [vmem:[%s7552_s10 + $0xa8] sm:$0xff] %vm1780_vm10, %v3855_v61 }
 0x5b5   : > { %3888 = vst.msk [vmem:[%s7552_s10 + $0xb0] sm:$0xff] %vm1780_vm10, %v3856_v39 }
 0x5b6   : > { %3889 = vst.msk [vmem:[%s7552_s10 + $0xb8] sm:$0xff] %vm1780_vm10, %v3857_v25 }
 0x5b7   : > { %3890 = vst.msk [vmem:[%s7552_s10 + $0xc0] sm:$0xff] %vm1780_vm10, %v3858_v0 }
 0x5b8   : > { %3891 = vst.msk [vmem:[%s7552_s10 + $0xc8] sm:$0xff] %vm1780_vm10, %v3859_v24 }
 0x5b9   : > { %3892 = vst.msk [vmem:[%s7552_s10 + $0xd0] sm:$0xff] %vm1780_vm10, %v3860_v33 }
 0x5ba   : > { %3893 = vst.msk [vmem:[%s7552_s10 + $0xd8] sm:$0xff] %vm1780_vm10, %v3861_v15 }
 0x5bb   : > { %3894 = vst.msk [vmem:[%s7552_s10 + $0xe0] sm:$0xff] %vm1780_vm10, %v3862_v60 }
 0x5bc   : > { %3895 = vst.msk [vmem:[%s7552_s10 + $0xe8] sm:$0xff] %vm1780_vm10, %v3863_v51 }
 0x5bd   : > { %3896 = vst.msk [vmem:[%s7552_s10 + $0xf0] sm:$0xff] %vm1780_vm10, %v3864_v34 }
 0x5be   : > { %3897 = vst.msk [vmem:[%s7552_s10 + $0xf8] sm:$0xff] %vm1780_vm10, %v3865_v23 }
 0x5bf PF: > { %s15_s18 = sadd.s32 1, %s4604_s18  }
 0x5c0   : > { %p12_p4 = scmp.ge.s32.totalorder %s15_s18, 4  }
 0x5c2   :  { %14 = sbr.rel (!%p12_p4) target bundleno = 1 (0x1), region = 78 }

</bundles_post_ra>
